<compile_context>
chip_gen: v5e
topology: v5e:2x2
jax: 0.10.0
libtpu: 0.0.40
codegen_flags: <defaults>
</compile_context>

<pallas_src>
import math

import jax
import jax.numpy as jnp
from jax import lax
from jax.experimental import pallas as pl
from jax.experimental.pallas import tpu as pltpu


D_FF = 400
D_FF_PAD = 512
ROWS_PER_LAYER = 8        # n1a, n1b, bqkv, bo, n2a, n2b, b1, b2


# ----------------------------------------------------------------------------
# Positional encoding (exact formula of the PyTorch PositionalEncoder)
# ----------------------------------------------------------------------------
def build_positional_encoding(max_seq_len, d_model):
    rows = []
    for pos in range(max_seq_len):
        row = [0.0] * d_model
        for i in range(0, d_model, 2):
            row[i] = math.sin(pos / (10000 ** (2 * i / d_model)))
            row[i + 1] = math.cos(pos / (10000 ** (2 * (i + 1) / d_model)))
        rows.append(row)
    return jnp.asarray(rows, dtype=jnp.float32)


def _win_offsets(d_model, d_ff_pad):
    """Lane offsets of [wqkv | wo | w1] inside the per-layer weight slab,
    each sub-block 128-lane aligned so in-kernel slices start on vreg bounds."""
    def up(x):
        return ((x + 127) // 128) * 128
    off_qkv = 0
    off_wo = up(3 * d_model)
    off_w1 = up(off_wo + d_model)
    return off_qkv, off_wo, off_w1, off_w1 + d_ff_pad


# ----------------------------------------------------------------------------
# Fused kernel: PositionalEncoder + N EncoderLayers + final Norm (x2 encoders)
#               + concat(last tokens) + both output heads (fused)
# ----------------------------------------------------------------------------
def make_fused_kernel(*, n_layer, n_head, d_model, seq_len, pred_len,
                      n_out, bsh, d_ff_pad):
    d = d_model
    d_k = d // n_head
    pe_scale = math.sqrt(d)
    att_scale = 1.0 / math.sqrt(d_k)
    rows_per_enc = ROWS_PER_LAYER * n_layer + 2
    Mr, Mp = bsh * seq_len, bsh * pred_len
    off_qkv, off_wo, off_w1, _ = _win_offsets(d, d_ff_pad)

    def kernel(xr_ref, xp_ref, pe_ref, w_in_ref, w2_ref, wh_ref, vecs_ref, out_ref):
        def vrow(r, width):
            # one packed bias / norm vector as a (1, width) f32 row
            return vecs_ref[r:r + 1, 0:width]

        def cnorm(x, alpha, bias):
            # custom Norm: alpha * (x - mean) / (std_unbiased + 1e-6) + bias
            mu = jnp.mean(x, axis=-1, keepdims=True)
            cen = x - mu
            var = jnp.sum(cen * cen, axis=-1, keepdims=True) / float(d - 1)
            return alpha * cen / (jnp.sqrt(var) + 1e-6) + bias

        def encoder(x, enc, S):
            # x: (bsh*S, d) with PositionalEncoder already applied
            base = enc * rows_per_enc
            for l in range(n_layer):                      # static unroll (n_layer small)
                r0 = base + ROWS_PER_LAYER * l
                w_all = w_in_ref[enc, l]                  # (d, WIN_W) bf16
                wqkv = w_all[:, off_qkv:off_qkv + 3 * d]
                wo = w_all[:, off_wo:off_wo + d]
                w1 = w_all[:, off_w1:off_w1 + d_ff_pad]
                w2 = w2_ref[enc, l]                       # (d_ff_pad, d) bf16

                # ---- multi-head self-attention (pre-norm, residual) ----
                x2 = cnorm(x, vrow(r0 + 0, d), vrow(r0 + 1, d))
                qkv = jnp.dot(x2.astype(jnp.bfloat16), wqkv,
                              preferred_element_type=jnp.float32) + vrow(r0 + 2, 3 * d)
                # batch-major 3D view built from static slices (no risky reshapes)
                qkv3 = jnp.stack([qkv[b * S:(b + 1) * S, :] for b in range(bsh)], axis=0)
                head_outs = []
                for h in range(n_head):                   # static unroll (n_head small)
                    qh = qkv3[:, :, h * d_k:(h + 1) * d_k]
                    kh = qkv3[:, :, d + h * d_k:d + (h + 1) * d_k]
                    vh = qkv3[:, :, 2 * d + h * d_k:2 * d + (h + 1) * d_k]
                    s = jnp.einsum('bqc,bkc->bqk', qh, kh,
                                   preferred_element_type=jnp.float32) * att_scale
                    # reference attention mask is all-ones -> masked_fill is a no-op
                    s = s - jnp.max(s, axis=-1, keepdims=True)
                    p = jnp.exp(s)
                    p = p / jnp.sum(p, axis=-1, keepdims=True)    # exact (feeds top-k)
                    head_outs.append(jnp.einsum('bqk,bkc->bqc', p, vh,
                                                preferred_element_type=jnp.float32))
                attn3 = jnp.concatenate(head_outs, axis=-1)       # (bsh, S, d)
                attn2 = jnp.concatenate([attn3[b] for b in range(bsh)], axis=0)
                attn_out = jnp.dot(attn2.astype(jnp.bfloat16), wo,
                                   preferred_element_type=jnp.float32) + vrow(r0 + 3, d)
                x = x + attn_out                          # dropout = identity (eval)

                # ---- feed-forward (d_ff zero-padded to lane-aligned width) ----
                x2 = cnorm(x, vrow(r0 + 4, d), vrow(r0 + 5, d))
                hdd = jnp.dot(x2.astype(jnp.bfloat16), w1,
                              preferred_element_type=jnp.float32) + vrow(r0 + 6, d_ff_pad)
                hdd = jnp.maximum(hdd, 0.0)
                ff = jnp.dot(hdd.astype(jnp.bfloat16), w2,
                             preferred_element_type=jnp.float32) + vrow(r0 + 7, d)
                x = x + ff

            # final Norm applied to the LAST timestep of each batch element only
            x_last = jnp.concatenate(
                [x[b * S + S - 1:b * S + S, :] for b in range(bsh)], axis=0)   # (bsh, d)
            return cnorm(x_last, vrow(base + ROWS_PER_LAYER * n_layer, d),
                         vrow(base + ROWS_PER_LAYER * n_layer + 1, d))

        # PositionalEncoder: x*sqrt(d) + pe (pe pre-tiled per batch element on host)
        xr = xr_ref[0] * pe_scale + pe_ref[0:Mr, :]
        xp = xp_ref[0] * pe_scale + pe_ref[Mr:Mr + Mp, :]
        h_ret = encoder(xr, 0, seq_len)                   # (bsh, d)
        h_prb = encoder(xp, 1, pred_len)                  # (bsh, d)

        # ---- both output heads fused (W1 concat on lanes, W2 block-diagonal) ----
        hb = 2 * rows_per_enc
        d2 = 2 * d
        wh = wh_ref[...]                                  # (2d, 2d + 2*n_out) f32
        W1 = wh[:, 0:d2]
        W2 = wh[:, d2:d2 + 2 * n_out]
        comb = jnp.concatenate([h_ret, h_prb], axis=-1)   # (bsh, 2d)
        hid = jnp.dot(comb, W1, preferred_element_type=jnp.float32) + vrow(hb + 0, d2)
        gam = vrow(hb + 1, d2)
        bet = vrow(hb + 2, d2)

        def lnseg(v, g, b):
            # nn.LayerNorm (biased variance, eps=1e-5)
            mu = jnp.mean(v, axis=-1, keepdims=True)
            var = jnp.mean((v - mu) ** 2, axis=-1, keepdims=True)
            return (v - mu) * lax.rsqrt(var + 1e-5) * g + b

        h1 = lnseg(hid[:, 0:d], gam[:, 0:d], bet[:, 0:d])
        h2 = lnseg(hid[:, d:d2], gam[:, d:d2], bet[:, d:d2])
        act = jnp.concatenate([h1, h2], axis=-1)
        act = act / (1.0 + jnp.exp(-act))                 # SiLU, exact sigmoid
        out = jnp.dot(act, W2, preferred_element_type=jnp.float32) + vrow(hb + 3, 2 * n_out)
        out_ref[0] = out                                  # (bsh, 2*n_out) lane-dense store

    return kernel


def run_fused(x_returns, x_probs, params, *, n_layer, n_head, num_shards=1):
    batch, seq_len, d_model = x_returns.shape
    pred_len = x_probs.shape[1]
    d_ff_pad = params["w2"].shape[2]
    n_out = (params["w_heads"].shape[1] - 2 * d_model) // 2

    assert batch % num_shards == 0, "num_shards must divide batch"
    bsh = batch // num_shards
    Mr, Mp = bsh * seq_len, bsh * pred_len

    # Fold batch into the matmul M dimension; one leading shard axis for the grid.
    xr = x_returns.reshape(num_shards, Mr, d_model)
    xp = x_probs.reshape(num_shards, Mp, d_model)
    pe_tiled = jnp.concatenate(
        [jnp.tile(params["pe"][:seq_len], (bsh, 1)),
         jnp.tile(params["pe"][:pred_len], (bsh, 1))], axis=0)      # (Mr+Mp, d)

    kernel = make_fused_kernel(
        n_layer=n_layer, n_head=n_head, d_model=d_model,
        seq_len=seq_len, pred_len=pred_len, n_out=n_out,
        bsh=bsh, d_ff_pad=d_ff_pad)

    args = (xr, xp, pe_tiled, params["w_in"], params["w2"],
            params["w_heads"], params["vecs"])

    def full_spec(a):
        return pl.BlockSpec(a.shape, lambda s, nd=a.ndim: (0,) * nd)

    in_specs = [
        pl.BlockSpec((1, Mr, d_model), lambda s: (s, 0, 0)),
        pl.BlockSpec((1, Mp, d_model), lambda s: (s, 0, 0)),
    ] + [full_spec(a) for a in args[2:]]
    out_specs = pl.BlockSpec((1, bsh, 2 * n_out), lambda s: (s, 0, 0))

    # Advisory cost estimate so XLA schedules the surrounding glue sensibly.
    def enc_flops(s):
        att = (2 * s * d_model * 3 * d_model
               + n_head * (4 * s * s * (d_model // n_head))
               + 2 * s * d_model * d_model)
        ffn = 4 * s * d_model * d_ff_pad
        return n_layer * (att + ffn)
    head_fl = 2 * batch * (2 * d_model) * (2 * d_model + 2 * n_out)
    flops = batch * (enc_flops(seq_len) + enc_flops(pred_len)) + head_fl
    transc = (batch * n_layer * n_head * (seq_len ** 2 + pred_len ** 2)
              + batch * 2 * d_model)
    bytes_acc = (sum(int(a.size) * a.dtype.itemsize for a in args)
                 + batch * 2 * n_out * 4)
    cost = pl.CostEstimate(flops=int(flops), transcendentals=int(transc),
                           bytes_accessed=int(bytes_acc))

    out = pl.pallas_call(
        kernel,
        out_shape=jax.ShapeDtypeStruct((num_shards, bsh, 2 * n_out), jnp.float32),
        grid=(num_shards,),
        in_specs=in_specs,
        out_specs=out_specs,
        compiler_params=pltpu.CompilerParams(
            dimension_semantics=("parallel",),          # 2-way TC sharding on v7x
            vmem_limit_bytes=32 * 1024 * 1024),
        cost_estimate=cost,
    )(*args)
    out = out.reshape(batch, 2 * n_out)
    return out[:, :n_out], out[:, n_out:]               # attention_scores, scores


# ----------------------------------------------------------------------------
# rebalance (data-dependent while loop -> plain JAX, vmapped per row)
# ----------------------------------------------------------------------------
def rebalance_row(w, lb, ub):
    sel = (w > 0).astype(w.dtype)
    w = w * sel
    wc = jnp.clip(w, lb, ub)
    excess = jnp.sum(wc) - 1.0

    # TODO(synk): reference while-loop is unbounded; capped at 1000 iterations for safety.
    def cond(state):
        wc_, ex_, done_, it_ = state
        return (jnp.abs(ex_) > 1e-6) & jnp.logical_not(done_) & (it_ < 1000)

    def body(state):
        wc_, ex_, done_, it_ = state
        pos = ex_ > 0
        adj_mask = jnp.where(pos, (wc_ > lb) & (sel == 1.0), (wc_ < ub) & (sel == 1.0))
        any_adj = jnp.any(adj_mask)
        cnt = jnp.maximum(jnp.sum(adj_mask.astype(wc_.dtype)), 1.0)
        adjustment = jnp.abs(ex_) / cnt
        delta = jnp.where(pos, -adjustment, adjustment)
        wc_new = jnp.where(adj_mask, wc_ + delta, wc_)
        wc_new = jnp.clip(wc_new, lb, ub)
        ex_new = jnp.sum(wc_new) - 1.0
        wc_out = jnp.where(any_adj, wc_new, wc_)
        ex_out = jnp.where(any_adj, ex_new, ex_)
        return (wc_out, ex_out, jnp.logical_not(any_adj), it_ + 1)

    wc, _, _, _ = lax.while_loop(
        cond, body, (wc, excess, jnp.array(False), jnp.array(0, jnp.int32)))
    return wc


# ----------------------------------------------------------------------------
# Parameter init (deterministic, synthetic) — packed into a few large slabs:
#   w_in    : (2, n_layer, d, WIN_W)      bf16   [wqkv | wo | w1], 128-lane aligned
#   w2      : (2, n_layer, d_ff_pad, d)   bf16
#   w_heads : (2d, 2d + 2*n_out)          f32    [W1_cat | W2_block_diag]
#   vecs    : (2*(8*n_layer+2)+4, d_ff_pad) f32  all biases / norm params, one per row
#   pe      : (n_timestep, d)             f32
# ----------------------------------------------------------------------------
def init_params(key, n_feature, n_timestep, n_layer, n_output,
                d_ff=D_FF, d_ff_pad=D_FF_PAD):
    d = n_feature
    off_qkv, off_wo, off_w1, win_w = _win_offsets(d, d_ff_pad)

    def lin(k, fi, fo):
        return jax.random.normal(k, (fi, fo), jnp.float32) * 0.05

    def padw(v, width):
        return jnp.pad(v, (0, width - v.shape[0]))

    kenc0, kenc1, khead = jax.random.split(key, 3)
    enc_keys = [jax.random.split(kenc0, n_layer * 6),
                jax.random.split(kenc1, n_layer * 6)]
    head_keys = jax.random.split(khead, 4)

    vec_rows, w_in_all, w2_all = [], [], []
    for e in range(2):
        w_in_e, w2_e = [], []
        for l in range(n_layer):
            k = enc_keys[e][l * 6:(l + 1) * 6]
            wq, wk, wv = lin(k[0], d, d), lin(k[1], d, d), lin(k[2], d, d)
            wo = lin(k[3], d, d)
            w1 = jnp.pad(lin(k[4], d, d_ff), ((0, 0), (0, d_ff_pad - d_ff)))
            w2 = jnp.pad(lin(k[5], d_ff, d), ((0, d_ff_pad - d_ff), (0, 0)))
            slab = jnp.concatenate(
                [wq, wk, wv,
                 jnp.zeros((d, off_wo - 3 * d), jnp.float32),
                 wo,
                 jnp.zeros((d, off_w1 - off_wo - d), jnp.float32),
                 w1], axis=1)
            assert slab.shape == (d, win_w)
            w_in_e.append(slab)
            w2_e.append(w2)
            # per-layer vector rows: n1a, n1b, bqkv, bo, n2a, n2b, b1, b2
            vec_rows += [padw(jnp.ones((d,), jnp.float32), d_ff_pad),
                         padw(jnp.zeros((d,), jnp.float32), d_ff_pad),
                         padw(jnp.zeros((3 * d,), jnp.float32), d_ff_pad),
                         padw(jnp.zeros((d,), jnp.float32), d_ff_pad),
                         padw(jnp.ones((d,), jnp.float32), d_ff_pad),
                         padw(jnp.zeros((d,), jnp.float32), d_ff_pad),
                         jnp.zeros((d_ff_pad,), jnp.float32),
                         padw(jnp.zeros((d,), jnp.float32), d_ff_pad)]
        # per-encoder final Norm: alpha, bias
        vec_rows += [padw(jnp.ones((d,), jnp.float32), d_ff_pad),
                     padw(jnp.zeros((d,), jnp.float32), d_ff_pad)]
        w_in_all.append(jnp.stack(w_in_e))
        w2_all.append(jnp.stack(w2_e))

    # fused output heads
    att_w1 = lin(head_keys[0], 2 * d, d)
    att_w2 = lin(head_keys[1], d, n_output)
    sco_w1 = lin(head_keys[2], 2 * d, d)
    sco_w2 = lin(head_keys[3], d, n_output)
    W1_cat = jnp.concatenate([att_w1, sco_w1], axis=1)               # (2d, 2d)
    zz = jnp.zeros((d, n_output), jnp.float32)
    W2_bd = jnp.block([[att_w2, zz], [zz, sco_w2]])                  # (2d, 2*n_out)
    w_heads = jnp.concatenate([W1_cat, W2_bd], axis=1)               # (2d, 2d+2*n_out)
    # head vector rows: b1_cat, gamma_cat, beta_cat, b2_cat
    vec_rows += [padw(jnp.zeros((2 * d,), jnp.float32), d_ff_pad),
                 padw(jnp.ones((2 * d,), jnp.float32), d_ff_pad),
                 padw(jnp.zeros((2 * d,), jnp.float32), d_ff_pad),
                 padw(jnp.zeros((2 * n_output,), jnp.float32), d_ff_pad)]

    return dict(
        pe=build_positional_encoding(n_timestep, d),
        w_in=jnp.stack(w_in_all).astype(jnp.bfloat16),
        w2=jnp.stack(w2_all).astype(jnp.bfloat16),
        w_heads=w_heads,
        vecs=jnp.stack(vec_rows),
    )


# ----------------------------------------------------------------------------
# Full forward (matches PortfolioTransformerWithProb.forward)
# ----------------------------------------------------------------------------
def forward(params, x_returns, x_probs, *, n_layer, n_head, n_select, lb, ub,
            num_shards=1):
    if x_probs.ndim == 2:
        x_probs = x_probs[:, None, :]

    att_scores, scores = run_fused(x_returns, x_probs, params,
                                   n_layer=n_layer, n_head=n_head,
                                   num_shards=num_shards)

    attention_weights = jax.nn.sigmoid(att_scores)
    _, top_idx = lax.top_k(attention_weights, n_select)
    n_out = attention_weights.shape[1]
    mask = jax.vmap(
        lambda idx: jnp.zeros((n_out,), attention_weights.dtype).at[idx].set(1.0)
    )(top_idx)

    weights = jax.nn.softmax(scores, axis=-1)
    masked_weights = weights * mask
    normalized = masked_weights / (jnp.sum(masked_weights, axis=1, keepdims=True) + 1e-8)

    final = jax.vmap(lambda w: rebalance_row(w, lb, ub))(normalized)
    final = jnp.round(final * 1000.0) / 1000.0
    return final


# ----------------------------------------------------------------------------
if __name__ == "__main__":
    # Small shapes consistent with the module: n_feature == n_output == n_stocks.
    batch, seq_len, n_feature = 2, 8, 16
    pred_len = 4
    n_layer, n_head = 2, 2
    n_output = n_feature
    n_select = 8
    lb, ub = 0.0, 0.1

    key = jax.random.PRNGKey(0)
    kp, kr, kq = jax.random.split(key, 3)
    params = init_params(kp, n_feature, seq_len, n_layer, n_output)

    x_returns = jax.random.normal(kr, (batch, seq_len, n_feature), jnp.float32) * 0.1
    x_probs = jax.random.uniform(kq, (batch, pred_len, n_feature), jnp.float32)

    # num_shards=1: whole batch in one kernel invocation (single-TC v5e/v6e);
    # on v7x use num_shards=2 (when per-shard block shapes remain tile-legal).
    out = forward(params, x_returns, x_probs,
                  n_layer=n_layer, n_head=n_head,
                  n_select=n_select, lb=lb, ub=ub, num_shards=1)
    out = jax.block_until_ready(out)
    assert out.shape == (batch, n_output)
    print("KERNEL_OK")
</pallas_src>

<mosaic_0001>
module attributes {stable_mosaic.version = 11 : i64} {
  func.func @kernel(%arg0: i32, %arg1: memref<1x16x16xf32, #tpu.memory_space<vmem>>, %arg2: memref<1x8x16xf32, #tpu.memory_space<vmem>>, %arg3: memref<24x16xf32, #tpu.memory_space<vmem>>, %arg4: memref<2x2x16x768xbf16, #tpu.memory_space<vmem>>, %arg5: memref<2x2x512x16xbf16, #tpu.memory_space<vmem>>, %arg6: memref<32x64xf32, #tpu.memory_space<vmem>>, %arg7: memref<40x512xf32, #tpu.memory_space<vmem>>, %arg8: memref<1x2x32xf32, #tpu.memory_space<vmem>>) attributes {dimension_semantics = [#tpu.dimension_semantics<parallel>], iteration_bounds = array<i64: 1>, scalar_prefetch = 0 : i64, scratch_operands = 0 : i64, tpu.core_type = #tpu.core_type<tc>, window_params = [{transform_indices = @transform_0, window_bounds = array<i64: 1, 16, 16>}, {transform_indices = @transform_1, window_bounds = array<i64: 1, 8, 16>}, {pipeline_mode = #tpu.pipeline_mode<synchronous>, transform_indices = @transform_2, window_bounds = array<i64: 24, 16>}, {pipeline_mode = #tpu.pipeline_mode<synchronous>, transform_indices = @transform_3, window_bounds = array<i64: 2, 2, 16, 768>}, {pipeline_mode = #tpu.pipeline_mode<synchronous>, transform_indices = @transform_4, window_bounds = array<i64: 2, 2, 512, 16>}, {pipeline_mode = #tpu.pipeline_mode<synchronous>, transform_indices = @transform_5, window_bounds = array<i64: 32, 64>}, {pipeline_mode = #tpu.pipeline_mode<synchronous>, transform_indices = @transform_6, window_bounds = array<i64: 40, 512>}, {transform_indices = @transform_7, window_bounds = array<i64: 1, 2, 32>}]} {
    %c0 = arith.constant 0 : index
    %c0_0 = arith.constant 0 : index
    %c0_1 = arith.constant 0 : index
    %0 = vector.load %arg1[%c0, %c0_0, %c0_1] : memref<1x16x16xf32, #tpu.memory_space<vmem>>, vector<1x16x16xf32>
    %1 = vector.shape_cast %0 : vector<1x16x16xf32> to vector<16x16xf32>
    %cst = arith.constant 4.000000e+00 : f32
    %2 = vector.broadcast %cst : f32 to vector<16x16xf32>
    %3 = arith.mulf %1, %2 : vector<16x16xf32>
    %c0_2 = arith.constant 0 : index
    %c0_3 = arith.constant 0 : index
    %4 = vector.load %arg3[%c0_2, %c0_3] : memref<24x16xf32, #tpu.memory_space<vmem>>, vector<16x16xf32>
    %5 = arith.addf %3, %4 : vector<16x16xf32>
    %c0_4 = arith.constant 0 : index
    %c0_5 = arith.constant 0 : index
    %c0_6 = arith.constant 0 : index
    %6 = vector.load %arg2[%c0_4, %c0_5, %c0_6] : memref<1x8x16xf32, #tpu.memory_space<vmem>>, vector<1x8x16xf32>
    %7 = vector.shape_cast %6 : vector<1x8x16xf32> to vector<8x16xf32>
    %cst_7 = arith.constant 4.000000e+00 : f32
    %8 = vector.broadcast %cst_7 : f32 to vector<8x16xf32>
    %9 = arith.mulf %7, %8 : vector<8x16xf32>
    %c16 = arith.constant 16 : index
    %c0_8 = arith.constant 0 : index
    %10 = vector.load %arg3[%c16, %c0_8] : memref<24x16xf32, #tpu.memory_space<vmem>>, vector<8x16xf32>
    %11 = arith.addf %9, %10 : vector<8x16xf32>
    %c0_9 = arith.constant 0 : index
    %c0_10 = arith.constant 0 : index
    %c0_11 = arith.constant 0 : index
    %c0_12 = arith.constant 0 : index
    %12 = vector.load %arg4[%c0_9, %c0_10, %c0_11, %c0_12] : memref<2x2x16x768xbf16, #tpu.memory_space<vmem>>, vector<1x1x16x768xbf16>
    %13 = vector.shape_cast %12 : vector<1x1x16x768xbf16> to vector<16x768xbf16>
    %14 = vector.extract_strided_slice %13 {offsets = [0, 0], sizes = [16, 48], strides = [1, 1]} : vector<16x768xbf16> to vector<16x48xbf16>
    %15 = vector.extract_strided_slice %13 {offsets = [0, 128], sizes = [16, 16], strides = [1, 1]} : vector<16x768xbf16> to vector<16x16xbf16>
    %16 = vector.extract_strided_slice %13 {offsets = [0, 256], sizes = [16, 512], strides = [1, 1]} : vector<16x768xbf16> to vector<16x512xbf16>
    %c0_13 = arith.constant 0 : index
    %c0_14 = arith.constant 0 : index
    %c0_15 = arith.constant 0 : index
    %c0_16 = arith.constant 0 : index
    %17 = vector.load %arg5[%c0_13, %c0_14, %c0_15, %c0_16] : memref<2x2x512x16xbf16, #tpu.memory_space<vmem>>, vector<1x1x512x16xbf16>
    %18 = vector.shape_cast %17 : vector<1x1x512x16xbf16> to vector<512x16xbf16>
    %c0_17 = arith.constant 0 : index
    %c0_18 = arith.constant 0 : index
    %19 = vector.load %arg7[%c0_17, %c0_18] : memref<40x512xf32, #tpu.memory_space<vmem>>, vector<1x16xf32>
    %c1 = arith.constant 1 : index
    %c0_19 = arith.constant 0 : index
    %20 = vector.load %arg7[%c1, %c0_19] : memref<40x512xf32, #tpu.memory_space<vmem>>, vector<1x16xf32>
    %cst_20 = arith.constant dense<0.000000e+00> : vector<16xf32>
    %21 = vector.multi_reduction <add>, %5, %cst_20 [1] : vector<16x16xf32> to vector<16xf32>
    %22 = vector.shape_cast %21 : vector<16xf32> to vector<16x1xf32>
    %cst_21 = arith.constant 1.600000e+01 : f32
    %23 = vector.broadcast %cst_21 : f32 to vector<16x1xf32>
    %24 = arith.divf %22, %23 : vector<16x1xf32>
    %25 = vector.broadcast %24 : vector<16x1xf32> to vector<16x16xf32>
    %26 = arith.subf %5, %25 : vector<16x16xf32>
    %27 = arith.mulf %26, %26 : vector<16x16xf32>
    %cst_22 = arith.constant dense<0.000000e+00> : vector<16xf32>
    %28 = vector.multi_reduction <add>, %27, %cst_22 [1] : vector<16x16xf32> to vector<16xf32>
    %29 = vector.shape_cast %28 : vector<16xf32> to vector<16x1xf32>
    %cst_23 = arith.constant 1.500000e+01 : f32
    %30 = vector.broadcast %cst_23 : f32 to vector<16x1xf32>
    %31 = arith.divf %29, %30 : vector<16x1xf32>
    %32 = vector.broadcast %19 : vector<1x16xf32> to vector<16x16xf32>
    %33 = arith.mulf %32, %26 : vector<16x16xf32>
    %34 = math.sqrt %31 : vector<16x1xf32>
    %cst_24 = arith.constant 9.99999997E-7 : f32
    %35 = vector.broadcast %cst_24 : f32 to vector<16x1xf32>
    %36 = arith.addf %34, %35 : vector<16x1xf32>
    %37 = vector.broadcast %36 : vector<16x1xf32> to vector<16x16xf32>
    %38 = arith.divf %33, %37 : vector<16x16xf32>
    %39 = vector.broadcast %20 : vector<1x16xf32> to vector<16x16xf32>
    %40 = arith.addf %38, %39 : vector<16x16xf32>
    %41 = arith.truncf %40 : vector<16x16xf32> to vector<16x16xbf16>
    %cst_25 = arith.constant dense<0.000000e+00> : vector<16x48xf32>
    %42 = tpu.matmul %41, %14, %cst_25 {dimension_numbers = #tpu.dot_dimension_numbers<[1], [0], [0], [1], [0, 0, 1, 1], [], []>} : vector<16x16xbf16>, vector<16x48xbf16>, vector<16x48xf32> -> vector<16x48xf32>
    %c2 = arith.constant 2 : index
    %c0_26 = arith.constant 0 : index
    %43 = vector.load %arg7[%c2, %c0_26] : memref<40x512xf32, #tpu.memory_space<vmem>>, vector<1x48xf32>
    %44 = vector.broadcast %43 : vector<1x48xf32> to vector<16x48xf32>
    %45 = arith.addf %42, %44 : vector<16x48xf32>
    %46 = vector.extract_strided_slice %45 {offsets = [0, 0], sizes = [8, 48], strides = [1, 1]} : vector<16x48xf32> to vector<8x48xf32>
    %47 = vector.extract_strided_slice %45 {offsets = [8, 0], sizes = [8, 48], strides = [1, 1]} : vector<16x48xf32> to vector<8x48xf32>
    %48 = vector.shape_cast %46 : vector<8x48xf32> to vector<1x8x48xf32>
    %49 = vector.shape_cast %47 : vector<8x48xf32> to vector<1x8x48xf32>
    %50 = tpu.concatenate %48, %49 in 0 : vector<1x8x48xf32>, vector<1x8x48xf32> -> vector<2x8x48xf32>
    %51 = vector.extract_strided_slice %50 {offsets = [0, 0, 0], sizes = [2, 8, 8], strides = [1, 1, 1]} : vector<2x8x48xf32> to vector<2x8x8xf32>
    %52 = vector.extract_strided_slice %50 {offsets = [0, 0, 16], sizes = [2, 8, 8], strides = [1, 1, 1]} : vector<2x8x48xf32> to vector<2x8x8xf32>
    %53 = vector.extract_strided_slice %50 {offsets = [0, 0, 32], sizes = [2, 8, 8], strides = [1, 1, 1]} : vector<2x8x48xf32> to vector<2x8x8xf32>
    "tpu.trace_start"() <{level = 10 : i32, message = "bqc,bkc->bqk"}> : () -> ()
    %cst_27 = arith.constant dense<0.000000e+00> : vector<2x8x8xf32>
    %54 = tpu.matmul %51, %52, %cst_27 {dimension_numbers = #tpu.dot_dimension_numbers<[2], [2], [1], [1], [0, 0, 0, 1, 1, 1], [0], [0]>} : vector<2x8x8xf32>, vector<2x8x8xf32>, vector<2x8x8xf32> -> vector<2x8x8xf32>
    "tpu.trace_stop"() : () -> ()
    %cst_28 = arith.constant 0.353553385 : f32
    %55 = vector.broadcast %cst_28 : f32 to vector<2x8x8xf32>
    %56 = arith.mulf %54, %55 : vector<2x8x8xf32>
    %cst_29 = arith.constant dense<0xFF800000> : vector<2x8xf32>
    %57 = vector.multi_reduction <maximumf>, %56, %cst_29 [2] : vector<2x8x8xf32> to vector<2x8xf32>
    %58 = vector.shape_cast %57 : vector<2x8xf32> to vector<2x8x1xf32>
    %59 = vector.broadcast %58 : vector<2x8x1xf32> to vector<2x8x8xf32>
    %60 = arith.subf %56, %59 : vector<2x8x8xf32>
    %61 = math.exp %60 : vector<2x8x8xf32>
    %cst_30 = arith.constant dense<0.000000e+00> : vector<2x8xf32>
    %62 = vector.multi_reduction <add>, %61, %cst_30 [2] : vector<2x8x8xf32> to vector<2x8xf32>
    %63 = vector.shape_cast %62 : vector<2x8xf32> to vector<2x8x1xf32>
    %64 = vector.broadcast %63 : vector<2x8x1xf32> to vector<2x8x8xf32>
    %65 = arith.divf %61, %64 : vector<2x8x8xf32>
    "tpu.trace_start"() <{level = 10 : i32, message = "bqk,bkc->bqc"}> : () -> ()
    %cst_31 = arith.constant dense<0.000000e+00> : vector<2x8x8xf32>
    %66 = tpu.matmul %65, %53, %cst_31 {dimension_numbers = #tpu.dot_dimension_numbers<[2], [1], [1], [2], [0, 0, 0, 1, 1, 2], [0], [0]>} : vector<2x8x8xf32>, vector<2x8x8xf32>, vector<2x8x8xf32> -> vector<2x8x8xf32>
    "tpu.trace_stop"() : () -> ()
    %67 = vector.extract_strided_slice %50 {offsets = [0, 0, 8], sizes = [2, 8, 8], strides = [1, 1, 1]} : vector<2x8x48xf32> to vector<2x8x8xf32>
    %68 = vector.extract_strided_slice %50 {offsets = [0, 0, 24], sizes = [2, 8, 8], strides = [1, 1, 1]} : vector<2x8x48xf32> to vector<2x8x8xf32>
    %69 = vector.extract_strided_slice %50 {offsets = [0, 0, 40], sizes = [2, 8, 8], strides = [1, 1, 1]} : vector<2x8x48xf32> to vector<2x8x8xf32>
    "tpu.trace_start"() <{level = 10 : i32, message = "bqc,bkc->bqk"}> : () -> ()
    %cst_32 = arith.constant dense<0.000000e+00> : vector<2x8x8xf32>
    %70 = tpu.matmul %67, %68, %cst_32 {dimension_numbers = #tpu.dot_dimension_numbers<[2], [2], [1], [1], [0, 0, 0, 1, 1, 1], [0], [0]>} : vector<2x8x8xf32>, vector<2x8x8xf32>, vector<2x8x8xf32> -> vector<2x8x8xf32>
    "tpu.trace_stop"() : () -> ()
    %cst_33 = arith.constant 0.353553385 : f32
    %71 = vector.broadcast %cst_33 : f32 to vector<2x8x8xf32>
    %72 = arith.mulf %70, %71 : vector<2x8x8xf32>
    %cst_34 = arith.constant dense<0xFF800000> : vector<2x8xf32>
    %73 = vector.multi_reduction <maximumf>, %72, %cst_34 [2] : vector<2x8x8xf32> to vector<2x8xf32>
    %74 = vector.shape_cast %73 : vector<2x8xf32> to vector<2x8x1xf32>
    %75 = vector.broadcast %74 : vector<2x8x1xf32> to vector<2x8x8xf32>
    %76 = arith.subf %72, %75 : vector<2x8x8xf32>
    %77 = math.exp %76 : vector<2x8x8xf32>
    %cst_35 = arith.constant dense<0.000000e+00> : vector<2x8xf32>
    %78 = vector.multi_reduction <add>, %77, %cst_35 [2] : vector<2x8x8xf32> to vector<2x8xf32>
    %79 = vector.shape_cast %78 : vector<2x8xf32> to vector<2x8x1xf32>
    %80 = vector.broadcast %79 : vector<2x8x1xf32> to vector<2x8x8xf32>
    %81 = arith.divf %77, %80 : vector<2x8x8xf32>
    "tpu.trace_start"() <{level = 10 : i32, message = "bqk,bkc->bqc"}> : () -> ()
    %cst_36 = arith.constant dense<0.000000e+00> : vector<2x8x8xf32>
    %82 = tpu.matmul %81, %69, %cst_36 {dimension_numbers = #tpu.dot_dimension_numbers<[2], [1], [1], [2], [0, 0, 0, 1, 1, 2], [0], [0]>} : vector<2x8x8xf32>, vector<2x8x8xf32>, vector<2x8x8xf32> -> vector<2x8x8xf32>
    "tpu.trace_stop"() : () -> ()
    %83 = tpu.concatenate %66, %82 in 2 : vector<2x8x8xf32>, vector<2x8x8xf32> -> vector<2x8x16xf32>
    %84 = vector.extract_strided_slice %83 {offsets = [0, 0, 0], sizes = [1, 8, 16], strides = [1, 1, 1]} : vector<2x8x16xf32> to vector<1x8x16xf32>
    %85 = vector.shape_cast %84 : vector<1x8x16xf32> to vector<8x16xf32>
    %86 = vector.extract_strided_slice %83 {offsets = [1, 0, 0], sizes = [1, 8, 16], strides = [1, 1, 1]} : vector<2x8x16xf32> to vector<1x8x16xf32>
    %87 = vector.shape_cast %86 : vector<1x8x16xf32> to vector<8x16xf32>
    %88 = tpu.concatenate %85, %87 in 0 : vector<8x16xf32>, vector<8x16xf32> -> vector<16x16xf32>
    %89 = arith.truncf %88 : vector<16x16xf32> to vector<16x16xbf16>
    %cst_37 = arith.constant dense<0.000000e+00> : vector<16x16xf32>
    %90 = tpu.matmul %89, %15, %cst_37 {dimension_numbers = #tpu.dot_dimension_numbers<[1], [0], [0], [1], [0, 0, 1, 1], [], []>} : vector<16x16xbf16>, vector<16x16xbf16>, vector<16x16xf32> -> vector<16x16xf32>
    %c3 = arith.constant 3 : index
    %c0_38 = arith.constant 0 : index
    %91 = vector.load %arg7[%c3, %c0_38] : memref<40x512xf32, #tpu.memory_space<vmem>>, vector<1x16xf32>
    %92 = vector.broadcast %91 : vector<1x16xf32> to vector<16x16xf32>
    %93 = arith.addf %90, %92 : vector<16x16xf32>
    %94 = arith.addf %5, %93 : vector<16x16xf32>
    %c4 = arith.constant 4 : index
    %c0_39 = arith.constant 0 : index
    %95 = vector.load %arg7[%c4, %c0_39] : memref<40x512xf32, #tpu.memory_space<vmem>>, vector<1x16xf32>
    %c5 = arith.constant 5 : index
    %c0_40 = arith.constant 0 : index
    %96 = vector.load %arg7[%c5, %c0_40] : memref<40x512xf32, #tpu.memory_space<vmem>>, vector<1x16xf32>
    %cst_41 = arith.constant dense<0.000000e+00> : vector<16xf32>
    %97 = vector.multi_reduction <add>, %94, %cst_41 [1] : vector<16x16xf32> to vector<16xf32>
    %98 = vector.shape_cast %97 : vector<16xf32> to vector<16x1xf32>
    %cst_42 = arith.constant 1.600000e+01 : f32
    %99 = vector.broadcast %cst_42 : f32 to vector<16x1xf32>
    %100 = arith.divf %98, %99 : vector<16x1xf32>
    %101 = vector.broadcast %100 : vector<16x1xf32> to vector<16x16xf32>
    %102 = arith.subf %94, %101 : vector<16x16xf32>
    %103 = arith.mulf %102, %102 : vector<16x16xf32>
    %cst_43 = arith.constant dense<0.000000e+00> : vector<16xf32>
    %104 = vector.multi_reduction <add>, %103, %cst_43 [1] : vector<16x16xf32> to vector<16xf32>
    %105 = vector.shape_cast %104 : vector<16xf32> to vector<16x1xf32>
    %cst_44 = arith.constant 1.500000e+01 : f32
    %106 = vector.broadcast %cst_44 : f32 to vector<16x1xf32>
    %107 = arith.divf %105, %106 : vector<16x1xf32>
    %108 = vector.broadcast %95 : vector<1x16xf32> to vector<16x16xf32>
    %109 = arith.mulf %108, %102 : vector<16x16xf32>
    %110 = math.sqrt %107 : vector<16x1xf32>
    %cst_45 = arith.constant 9.99999997E-7 : f32
    %111 = vector.broadcast %cst_45 : f32 to vector<16x1xf32>
    %112 = arith.addf %110, %111 : vector<16x1xf32>
    %113 = vector.broadcast %112 : vector<16x1xf32> to vector<16x16xf32>
    %114 = arith.divf %109, %113 : vector<16x16xf32>
    %115 = vector.broadcast %96 : vector<1x16xf32> to vector<16x16xf32>
    %116 = arith.addf %114, %115 : vector<16x16xf32>
    %117 = arith.truncf %116 : vector<16x16xf32> to vector<16x16xbf16>
    %cst_46 = arith.constant dense<0.000000e+00> : vector<16x512xf32>
    %118 = tpu.matmul %117, %16, %cst_46 {dimension_numbers = #tpu.dot_dimension_numbers<[1], [0], [0], [1], [0, 0, 1, 1], [], []>} : vector<16x16xbf16>, vector<16x512xbf16>, vector<16x512xf32> -> vector<16x512xf32>
    %c6 = arith.constant 6 : index
    %c0_47 = arith.constant 0 : index
    %119 = vector.load %arg7[%c6, %c0_47] : memref<40x512xf32, #tpu.memory_space<vmem>>, vector<1x512xf32>
    %120 = vector.broadcast %119 : vector<1x512xf32> to vector<16x512xf32>
    %121 = arith.addf %118, %120 : vector<16x512xf32>
    %cst_48 = arith.constant 0.000000e+00 : f32
    %122 = vector.broadcast %cst_48 : f32 to vector<16x512xf32>
    %123 = arith.maximumf %121, %122 : vector<16x512xf32>
    %124 = arith.truncf %123 : vector<16x512xf32> to vector<16x512xbf16>
    %cst_49 = arith.constant dense<0.000000e+00> : vector<16x16xf32>
    %125 = tpu.matmul %124, %18, %cst_49 {dimension_numbers = #tpu.dot_dimension_numbers<[1], [0], [0], [1], [0, 0, 1, 1], [], []>} : vector<16x512xbf16>, vector<512x16xbf16>, vector<16x16xf32> -> vector<16x16xf32>
    %c7 = arith.constant 7 : index
    %c0_50 = arith.constant 0 : index
    %126 = vector.load %arg7[%c7, %c0_50] : memref<40x512xf32, #tpu.memory_space<vmem>>, vector<1x16xf32>
    %127 = vector.broadcast %126 : vector<1x16xf32> to vector<16x16xf32>
    %128 = arith.addf %125, %127 : vector<16x16xf32>
    %129 = arith.addf %94, %128 : vector<16x16xf32>
    %c0_51 = arith.constant 0 : index
    %c1_52 = arith.constant 1 : index
    %c0_53 = arith.constant 0 : index
    %c0_54 = arith.constant 0 : index
    %130 = vector.load %arg4[%c0_51, %c1_52, %c0_53, %c0_54] : memref<2x2x16x768xbf16, #tpu.memory_space<vmem>>, vector<1x1x16x768xbf16>
    %131 = vector.shape_cast %130 : vector<1x1x16x768xbf16> to vector<16x768xbf16>
    %132 = vector.extract_strided_slice %131 {offsets = [0, 0], sizes = [16, 48], strides = [1, 1]} : vector<16x768xbf16> to vector<16x48xbf16>
    %133 = vector.extract_strided_slice %131 {offsets = [0, 128], sizes = [16, 16], strides = [1, 1]} : vector<16x768xbf16> to vector<16x16xbf16>
    %134 = vector.extract_strided_slice %131 {offsets = [0, 256], sizes = [16, 512], strides = [1, 1]} : vector<16x768xbf16> to vector<16x512xbf16>
    %c0_55 = arith.constant 0 : index
    %c1_56 = arith.constant 1 : index
    %c0_57 = arith.constant 0 : index
    %c0_58 = arith.constant 0 : index
    %135 = vector.load %arg5[%c0_55, %c1_56, %c0_57, %c0_58] : memref<2x2x512x16xbf16, #tpu.memory_space<vmem>>, vector<1x1x512x16xbf16>
    %136 = vector.shape_cast %135 : vector<1x1x512x16xbf16> to vector<512x16xbf16>
    %c8 = arith.constant 8 : index
    %c0_59 = arith.constant 0 : index
    %137 = vector.load %arg7[%c8, %c0_59] : memref<40x512xf32, #tpu.memory_space<vmem>>, vector<1x16xf32>
    %c9 = arith.constant 9 : index
    %c0_60 = arith.constant 0 : index
    %138 = vector.load %arg7[%c9, %c0_60] : memref<40x512xf32, #tpu.memory_space<vmem>>, vector<1x16xf32>
    %cst_61 = arith.constant dense<0.000000e+00> : vector<16xf32>
    %139 = vector.multi_reduction <add>, %129, %cst_61 [1] : vector<16x16xf32> to vector<16xf32>
    %140 = vector.shape_cast %139 : vector<16xf32> to vector<16x1xf32>
    %cst_62 = arith.constant 1.600000e+01 : f32
    %141 = vector.broadcast %cst_62 : f32 to vector<16x1xf32>
    %142 = arith.divf %140, %141 : vector<16x1xf32>
    %143 = vector.broadcast %142 : vector<16x1xf32> to vector<16x16xf32>
    %144 = arith.subf %129, %143 : vector<16x16xf32>
    %145 = arith.mulf %144, %144 : vector<16x16xf32>
    %cst_63 = arith.constant dense<0.000000e+00> : vector<16xf32>
    %146 = vector.multi_reduction <add>, %145, %cst_63 [1] : vector<16x16xf32> to vector<16xf32>
    %147 = vector.shape_cast %146 : vector<16xf32> to vector<16x1xf32>
    %cst_64 = arith.constant 1.500000e+01 : f32
    %148 = vector.broadcast %cst_64 : f32 to vector<16x1xf32>
    %149 = arith.divf %147, %148 : vector<16x1xf32>
    %150 = vector.broadcast %137 : vector<1x16xf32> to vector<16x16xf32>
    %151 = arith.mulf %150, %144 : vector<16x16xf32>
    %152 = math.sqrt %149 : vector<16x1xf32>
    %cst_65 = arith.constant 9.99999997E-7 : f32
    %153 = vector.broadcast %cst_65 : f32 to vector<16x1xf32>
    %154 = arith.addf %152, %153 : vector<16x1xf32>
    %155 = vector.broadcast %154 : vector<16x1xf32> to vector<16x16xf32>
    %156 = arith.divf %151, %155 : vector<16x16xf32>
    %157 = vector.broadcast %138 : vector<1x16xf32> to vector<16x16xf32>
    %158 = arith.addf %156, %157 : vector<16x16xf32>
    %159 = arith.truncf %158 : vector<16x16xf32> to vector<16x16xbf16>
    %cst_66 = arith.constant dense<0.000000e+00> : vector<16x48xf32>
    %160 = tpu.matmul %159, %132, %cst_66 {dimension_numbers = #tpu.dot_dimension_numbers<[1], [0], [0], [1], [0, 0, 1, 1], [], []>} : vector<16x16xbf16>, vector<16x48xbf16>, vector<16x48xf32> -> vector<16x48xf32>
    %c10 = arith.constant 10 : index
    %c0_67 = arith.constant 0 : index
    %161 = vector.load %arg7[%c10, %c0_67] : memref<40x512xf32, #tpu.memory_space<vmem>>, vector<1x48xf32>
    %162 = vector.broadcast %161 : vector<1x48xf32> to vector<16x48xf32>
    %163 = arith.addf %160, %162 : vector<16x48xf32>
    %164 = vector.extract_strided_slice %163 {offsets = [0, 0], sizes = [8, 48], strides = [1, 1]} : vector<16x48xf32> to vector<8x48xf32>
    %165 = vector.extract_strided_slice %163 {offsets = [8, 0], sizes = [8, 48], strides = [1, 1]} : vector<16x48xf32> to vector<8x48xf32>
    %166 = vector.shape_cast %164 : vector<8x48xf32> to vector<1x8x48xf32>
    %167 = vector.shape_cast %165 : vector<8x48xf32> to vector<1x8x48xf32>
    %168 = tpu.concatenate %166, %167 in 0 : vector<1x8x48xf32>, vector<1x8x48xf32> -> vector<2x8x48xf32>
    %169 = vector.extract_strided_slice %168 {offsets = [0, 0, 0], sizes = [2, 8, 8], strides = [1, 1, 1]} : vector<2x8x48xf32> to vector<2x8x8xf32>
    %170 = vector.extract_strided_slice %168 {offsets = [0, 0, 16], sizes = [2, 8, 8], strides = [1, 1, 1]} : vector<2x8x48xf32> to vector<2x8x8xf32>
    %171 = vector.extract_strided_slice %168 {offsets = [0, 0, 32], sizes = [2, 8, 8], strides = [1, 1, 1]} : vector<2x8x48xf32> to vector<2x8x8xf32>
    "tpu.trace_start"() <{level = 10 : i32, message = "bqc,bkc->bqk"}> : () -> ()
    %cst_68 = arith.constant dense<0.000000e+00> : vector<2x8x8xf32>
    %172 = tpu.matmul %169, %170, %cst_68 {dimension_numbers = #tpu.dot_dimension_numbers<[2], [2], [1], [1], [0, 0, 0, 1, 1, 1], [0], [0]>} : vector<2x8x8xf32>, vector<2x8x8xf32>, vector<2x8x8xf32> -> vector<2x8x8xf32>
    "tpu.trace_stop"() : () -> ()
    %cst_69 = arith.constant 0.353553385 : f32
    %173 = vector.broadcast %cst_69 : f32 to vector<2x8x8xf32>
    %174 = arith.mulf %172, %173 : vector<2x8x8xf32>
    %cst_70 = arith.constant dense<0xFF800000> : vector<2x8xf32>
    %175 = vector.multi_reduction <maximumf>, %174, %cst_70 [2] : vector<2x8x8xf32> to vector<2x8xf32>
    %176 = vector.shape_cast %175 : vector<2x8xf32> to vector<2x8x1xf32>
    %177 = vector.broadcast %176 : vector<2x8x1xf32> to vector<2x8x8xf32>
    %178 = arith.subf %174, %177 : vector<2x8x8xf32>
    %179 = math.exp %178 : vector<2x8x8xf32>
    %cst_71 = arith.constant dense<0.000000e+00> : vector<2x8xf32>
    %180 = vector.multi_reduction <add>, %179, %cst_71 [2] : vector<2x8x8xf32> to vector<2x8xf32>
    %181 = vector.shape_cast %180 : vector<2x8xf32> to vector<2x8x1xf32>
    %182 = vector.broadcast %181 : vector<2x8x1xf32> to vector<2x8x8xf32>
    %183 = arith.divf %179, %182 : vector<2x8x8xf32>
    "tpu.trace_start"() <{level = 10 : i32, message = "bqk,bkc->bqc"}> : () -> ()
    %cst_72 = arith.constant dense<0.000000e+00> : vector<2x8x8xf32>
    %184 = tpu.matmul %183, %171, %cst_72 {dimension_numbers = #tpu.dot_dimension_numbers<[2], [1], [1], [2], [0, 0, 0, 1, 1, 2], [0], [0]>} : vector<2x8x8xf32>, vector<2x8x8xf32>, vector<2x8x8xf32> -> vector<2x8x8xf32>
    "tpu.trace_stop"() : () -> ()
    %185 = vector.extract_strided_slice %168 {offsets = [0, 0, 8], sizes = [2, 8, 8], strides = [1, 1, 1]} : vector<2x8x48xf32> to vector<2x8x8xf32>
    %186 = vector.extract_strided_slice %168 {offsets = [0, 0, 24], sizes = [2, 8, 8], strides = [1, 1, 1]} : vector<2x8x48xf32> to vector<2x8x8xf32>
    %187 = vector.extract_strided_slice %168 {offsets = [0, 0, 40], sizes = [2, 8, 8], strides = [1, 1, 1]} : vector<2x8x48xf32> to vector<2x8x8xf32>
    "tpu.trace_start"() <{level = 10 : i32, message = "bqc,bkc->bqk"}> : () -> ()
    %cst_73 = arith.constant dense<0.000000e+00> : vector<2x8x8xf32>
    %188 = tpu.matmul %185, %186, %cst_73 {dimension_numbers = #tpu.dot_dimension_numbers<[2], [2], [1], [1], [0, 0, 0, 1, 1, 1], [0], [0]>} : vector<2x8x8xf32>, vector<2x8x8xf32>, vector<2x8x8xf32> -> vector<2x8x8xf32>
    "tpu.trace_stop"() : () -> ()
    %cst_74 = arith.constant 0.353553385 : f32
    %189 = vector.broadcast %cst_74 : f32 to vector<2x8x8xf32>
    %190 = arith.mulf %188, %189 : vector<2x8x8xf32>
    %cst_75 = arith.constant dense<0xFF800000> : vector<2x8xf32>
    %191 = vector.multi_reduction <maximumf>, %190, %cst_75 [2] : vector<2x8x8xf32> to vector<2x8xf32>
    %192 = vector.shape_cast %191 : vector<2x8xf32> to vector<2x8x1xf32>
    %193 = vector.broadcast %192 : vector<2x8x1xf32> to vector<2x8x8xf32>
    %194 = arith.subf %190, %193 : vector<2x8x8xf32>
    %195 = math.exp %194 : vector<2x8x8xf32>
    %cst_76 = arith.constant dense<0.000000e+00> : vector<2x8xf32>
    %196 = vector.multi_reduction <add>, %195, %cst_76 [2] : vector<2x8x8xf32> to vector<2x8xf32>
    %197 = vector.shape_cast %196 : vector<2x8xf32> to vector<2x8x1xf32>
    %198 = vector.broadcast %197 : vector<2x8x1xf32> to vector<2x8x8xf32>
    %199 = arith.divf %195, %198 : vector<2x8x8xf32>
    "tpu.trace_start"() <{level = 10 : i32, message = "bqk,bkc->bqc"}> : () -> ()
    %cst_77 = arith.constant dense<0.000000e+00> : vector<2x8x8xf32>
    %200 = tpu.matmul %199, %187, %cst_77 {dimension_numbers = #tpu.dot_dimension_numbers<[2], [1], [1], [2], [0, 0, 0, 1, 1, 2], [0], [0]>} : vector<2x8x8xf32>, vector<2x8x8xf32>, vector<2x8x8xf32> -> vector<2x8x8xf32>
    "tpu.trace_stop"() : () -> ()
    %201 = tpu.concatenate %184, %200 in 2 : vector<2x8x8xf32>, vector<2x8x8xf32> -> vector<2x8x16xf32>
    %202 = vector.extract_strided_slice %201 {offsets = [0, 0, 0], sizes = [1, 8, 16], strides = [1, 1, 1]} : vector<2x8x16xf32> to vector<1x8x16xf32>
    %203 = vector.shape_cast %202 : vector<1x8x16xf32> to vector<8x16xf32>
    %204 = vector.extract_strided_slice %201 {offsets = [1, 0, 0], sizes = [1, 8, 16], strides = [1, 1, 1]} : vector<2x8x16xf32> to vector<1x8x16xf32>
    %205 = vector.shape_cast %204 : vector<1x8x16xf32> to vector<8x16xf32>
    %206 = tpu.concatenate %203, %205 in 0 : vector<8x16xf32>, vector<8x16xf32> -> vector<16x16xf32>
    %207 = arith.truncf %206 : vector<16x16xf32> to vector<16x16xbf16>
    %cst_78 = arith.constant dense<0.000000e+00> : vector<16x16xf32>
    %208 = tpu.matmul %207, %133, %cst_78 {dimension_numbers = #tpu.dot_dimension_numbers<[1], [0], [0], [1], [0, 0, 1, 1], [], []>} : vector<16x16xbf16>, vector<16x16xbf16>, vector<16x16xf32> -> vector<16x16xf32>
    %c11 = arith.constant 11 : index
    %c0_79 = arith.constant 0 : index
    %209 = vector.load %arg7[%c11, %c0_79] : memref<40x512xf32, #tpu.memory_space<vmem>>, vector<1x16xf32>
    %210 = vector.broadcast %209 : vector<1x16xf32> to vector<16x16xf32>
    %211 = arith.addf %208, %210 : vector<16x16xf32>
    %212 = arith.addf %129, %211 : vector<16x16xf32>
    %c12 = arith.constant 12 : index
    %c0_80 = arith.constant 0 : index
    %213 = vector.load %arg7[%c12, %c0_80] : memref<40x512xf32, #tpu.memory_space<vmem>>, vector<1x16xf32>
    %c13 = arith.constant 13 : index
    %c0_81 = arith.constant 0 : index
    %214 = vector.load %arg7[%c13, %c0_81] : memref<40x512xf32, #tpu.memory_space<vmem>>, vector<1x16xf32>
    %cst_82 = arith.constant dense<0.000000e+00> : vector<16xf32>
    %215 = vector.multi_reduction <add>, %212, %cst_82 [1] : vector<16x16xf32> to vector<16xf32>
    %216 = vector.shape_cast %215 : vector<16xf32> to vector<16x1xf32>
    %cst_83 = arith.constant 1.600000e+01 : f32
    %217 = vector.broadcast %cst_83 : f32 to vector<16x1xf32>
    %218 = arith.divf %216, %217 : vector<16x1xf32>
    %219 = vector.broadcast %218 : vector<16x1xf32> to vector<16x16xf32>
    %220 = arith.subf %212, %219 : vector<16x16xf32>
    %221 = arith.mulf %220, %220 : vector<16x16xf32>
    %cst_84 = arith.constant dense<0.000000e+00> : vector<16xf32>
    %222 = vector.multi_reduction <add>, %221, %cst_84 [1] : vector<16x16xf32> to vector<16xf32>
    %223 = vector.shape_cast %222 : vector<16xf32> to vector<16x1xf32>
    %cst_85 = arith.constant 1.500000e+01 : f32
    %224 = vector.broadcast %cst_85 : f32 to vector<16x1xf32>
    %225 = arith.divf %223, %224 : vector<16x1xf32>
    %226 = vector.broadcast %213 : vector<1x16xf32> to vector<16x16xf32>
    %227 = arith.mulf %226, %220 : vector<16x16xf32>
    %228 = math.sqrt %225 : vector<16x1xf32>
    %cst_86 = arith.constant 9.99999997E-7 : f32
    %229 = vector.broadcast %cst_86 : f32 to vector<16x1xf32>
    %230 = arith.addf %228, %229 : vector<16x1xf32>
    %231 = vector.broadcast %230 : vector<16x1xf32> to vector<16x16xf32>
    %232 = arith.divf %227, %231 : vector<16x16xf32>
    %233 = vector.broadcast %214 : vector<1x16xf32> to vector<16x16xf32>
    %234 = arith.addf %232, %233 : vector<16x16xf32>
    %235 = arith.truncf %234 : vector<16x16xf32> to vector<16x16xbf16>
    %cst_87 = arith.constant dense<0.000000e+00> : vector<16x512xf32>
    %236 = tpu.matmul %235, %134, %cst_87 {dimension_numbers = #tpu.dot_dimension_numbers<[1], [0], [0], [1], [0, 0, 1, 1], [], []>} : vector<16x16xbf16>, vector<16x512xbf16>, vector<16x512xf32> -> vector<16x512xf32>
    %c14 = arith.constant 14 : index
    %c0_88 = arith.constant 0 : index
    %237 = vector.load %arg7[%c14, %c0_88] : memref<40x512xf32, #tpu.memory_space<vmem>>, vector<1x512xf32>
    %238 = vector.broadcast %237 : vector<1x512xf32> to vector<16x512xf32>
    %239 = arith.addf %236, %238 : vector<16x512xf32>
    %cst_89 = arith.constant 0.000000e+00 : f32
    %240 = vector.broadcast %cst_89 : f32 to vector<16x512xf32>
    %241 = arith.maximumf %239, %240 : vector<16x512xf32>
    %242 = arith.truncf %241 : vector<16x512xf32> to vector<16x512xbf16>
    %cst_90 = arith.constant dense<0.000000e+00> : vector<16x16xf32>
    %243 = tpu.matmul %242, %136, %cst_90 {dimension_numbers = #tpu.dot_dimension_numbers<[1], [0], [0], [1], [0, 0, 1, 1], [], []>} : vector<16x512xbf16>, vector<512x16xbf16>, vector<16x16xf32> -> vector<16x16xf32>
    %c15 = arith.constant 15 : index
    %c0_91 = arith.constant 0 : index
    %244 = vector.load %arg7[%c15, %c0_91] : memref<40x512xf32, #tpu.memory_space<vmem>>, vector<1x16xf32>
    %245 = vector.broadcast %244 : vector<1x16xf32> to vector<16x16xf32>
    %246 = arith.addf %243, %245 : vector<16x16xf32>
    %247 = arith.addf %212, %246 : vector<16x16xf32>
    %248 = vector.extract_strided_slice %247 {offsets = [7, 0], sizes = [1, 16], strides = [1, 1]} : vector<16x16xf32> to vector<1x16xf32>
    %249 = vector.extract_strided_slice %247 {offsets = [15, 0], sizes = [1, 16], strides = [1, 1]} : vector<16x16xf32> to vector<1x16xf32>
    %250 = tpu.concatenate %248, %249 in 0 : vector<1x16xf32>, vector<1x16xf32> -> vector<2x16xf32>
    %c16_92 = arith.constant 16 : index
    %c0_93 = arith.constant 0 : index
    %251 = vector.load %arg7[%c16_92, %c0_93] : memref<40x512xf32, #tpu.memory_space<vmem>>, vector<1x16xf32>
    %c17 = arith.constant 17 : index
    %c0_94 = arith.constant 0 : index
    %252 = vector.load %arg7[%c17, %c0_94] : memref<40x512xf32, #tpu.memory_space<vmem>>, vector<1x16xf32>
    %cst_95 = arith.constant dense<0.000000e+00> : vector<2xf32>
    %253 = vector.multi_reduction <add>, %250, %cst_95 [1] : vector<2x16xf32> to vector<2xf32>
    %254 = vector.shape_cast %253 : vector<2xf32> to vector<2x1xf32>
    %cst_96 = arith.constant 1.600000e+01 : f32
    %255 = vector.broadcast %cst_96 : f32 to vector<2x1xf32>
    %256 = arith.divf %254, %255 : vector<2x1xf32>
    %257 = vector.broadcast %256 : vector<2x1xf32> to vector<2x16xf32>
    %258 = arith.subf %250, %257 : vector<2x16xf32>
    %259 = arith.mulf %258, %258 : vector<2x16xf32>
    %cst_97 = arith.constant dense<0.000000e+00> : vector<2xf32>
    %260 = vector.multi_reduction <add>, %259, %cst_97 [1] : vector<2x16xf32> to vector<2xf32>
    %261 = vector.shape_cast %260 : vector<2xf32> to vector<2x1xf32>
    %cst_98 = arith.constant 1.500000e+01 : f32
    %262 = vector.broadcast %cst_98 : f32 to vector<2x1xf32>
    %263 = arith.divf %261, %262 : vector<2x1xf32>
    %264 = vector.broadcast %251 : vector<1x16xf32> to vector<2x16xf32>
    %265 = arith.mulf %264, %258 : vector<2x16xf32>
    %266 = math.sqrt %263 : vector<2x1xf32>
    %cst_99 = arith.constant 9.99999997E-7 : f32
    %267 = vector.broadcast %cst_99 : f32 to vector<2x1xf32>
    %268 = arith.addf %266, %267 : vector<2x1xf32>
    %269 = vector.broadcast %268 : vector<2x1xf32> to vector<2x16xf32>
    %270 = arith.divf %265, %269 : vector<2x16xf32>
    %271 = vector.broadcast %252 : vector<1x16xf32> to vector<2x16xf32>
    %272 = arith.addf %270, %271 : vector<2x16xf32>
    %c1_100 = arith.constant 1 : index
    %c0_101 = arith.constant 0 : index
    %c0_102 = arith.constant 0 : index
    %c0_103 = arith.constant 0 : index
    %273 = vector.load %arg4[%c1_100, %c0_101, %c0_102, %c0_103] : memref<2x2x16x768xbf16, #tpu.memory_space<vmem>>, vector<1x1x16x768xbf16>
    %274 = vector.shape_cast %273 : vector<1x1x16x768xbf16> to vector<16x768xbf16>
    %275 = vector.extract_strided_slice %274 {offsets = [0, 0], sizes = [16, 48], strides = [1, 1]} : vector<16x768xbf16> to vector<16x48xbf16>
    %276 = vector.extract_strided_slice %274 {offsets = [0, 128], sizes = [16, 16], strides = [1, 1]} : vector<16x768xbf16> to vector<16x16xbf16>
    %277 = vector.extract_strided_slice %274 {offsets = [0, 256], sizes = [16, 512], strides = [1, 1]} : vector<16x768xbf16> to vector<16x512xbf16>
    %c1_104 = arith.constant 1 : index
    %c0_105 = arith.constant 0 : index
    %c0_106 = arith.constant 0 : index
    %c0_107 = arith.constant 0 : index
    %278 = vector.load %arg5[%c1_104, %c0_105, %c0_106, %c0_107] : memref<2x2x512x16xbf16, #tpu.memory_space<vmem>>, vector<1x1x512x16xbf16>
    %279 = vector.shape_cast %278 : vector<1x1x512x16xbf16> to vector<512x16xbf16>
    %c18 = arith.constant 18 : index
    %c0_108 = arith.constant 0 : index
    %280 = vector.load %arg7[%c18, %c0_108] : memref<40x512xf32, #tpu.memory_space<vmem>>, vector<1x16xf32>
    %c19 = arith.constant 19 : index
    %c0_109 = arith.constant 0 : index
    %281 = vector.load %arg7[%c19, %c0_109] : memref<40x512xf32, #tpu.memory_space<vmem>>, vector<1x16xf32>
    %cst_110 = arith.constant dense<0.000000e+00> : vector<8xf32>
    %282 = vector.multi_reduction <add>, %11, %cst_110 [1] : vector<8x16xf32> to vector<8xf32>
    %283 = vector.shape_cast %282 : vector<8xf32> to vector<8x1xf32>
    %cst_111 = arith.constant 1.600000e+01 : f32
    %284 = vector.broadcast %cst_111 : f32 to vector<8x1xf32>
    %285 = arith.divf %283, %284 : vector<8x1xf32>
    %286 = vector.broadcast %285 : vector<8x1xf32> to vector<8x16xf32>
    %287 = arith.subf %11, %286 : vector<8x16xf32>
    %288 = arith.mulf %287, %287 : vector<8x16xf32>
    %cst_112 = arith.constant dense<0.000000e+00> : vector<8xf32>
    %289 = vector.multi_reduction <add>, %288, %cst_112 [1] : vector<8x16xf32> to vector<8xf32>
    %290 = vector.shape_cast %289 : vector<8xf32> to vector<8x1xf32>
    %cst_113 = arith.constant 1.500000e+01 : f32
    %291 = vector.broadcast %cst_113 : f32 to vector<8x1xf32>
    %292 = arith.divf %290, %291 : vector<8x1xf32>
    %293 = vector.broadcast %280 : vector<1x16xf32> to vector<8x16xf32>
    %294 = arith.mulf %293, %287 : vector<8x16xf32>
    %295 = math.sqrt %292 : vector<8x1xf32>
    %cst_114 = arith.constant 9.99999997E-7 : f32
    %296 = vector.broadcast %cst_114 : f32 to vector<8x1xf32>
    %297 = arith.addf %295, %296 : vector<8x1xf32>
    %298 = vector.broadcast %297 : vector<8x1xf32> to vector<8x16xf32>
    %299 = arith.divf %294, %298 : vector<8x16xf32>
    %300 = vector.broadcast %281 : vector<1x16xf32> to vector<8x16xf32>
    %301 = arith.addf %299, %300 : vector<8x16xf32>
    %302 = arith.truncf %301 : vector<8x16xf32> to vector<8x16xbf16>
    %cst_115 = arith.constant dense<0.000000e+00> : vector<8x48xf32>
    %303 = tpu.matmul %302, %275, %cst_115 {dimension_numbers = #tpu.dot_dimension_numbers<[1], [0], [0], [1], [0, 0, 1, 1], [], []>} : vector<8x16xbf16>, vector<16x48xbf16>, vector<8x48xf32> -> vector<8x48xf32>
    %c20 = arith.constant 20 : index
    %c0_116 = arith.constant 0 : index
    %304 = vector.load %arg7[%c20, %c0_116] : memref<40x512xf32, #tpu.memory_space<vmem>>, vector<1x48xf32>
    %305 = vector.broadcast %304 : vector<1x48xf32> to vector<8x48xf32>
    %306 = arith.addf %303, %305 : vector<8x48xf32>
    %307 = vector.extract_strided_slice %306 {offsets = [0, 0], sizes = [4, 48], strides = [1, 1]} : vector<8x48xf32> to vector<4x48xf32>
    %308 = vector.extract_strided_slice %306 {offsets = [4, 0], sizes = [4, 48], strides = [1, 1]} : vector<8x48xf32> to vector<4x48xf32>
    %309 = vector.shape_cast %307 : vector<4x48xf32> to vector<1x4x48xf32>
    %310 = vector.shape_cast %308 : vector<4x48xf32> to vector<1x4x48xf32>
    %311 = tpu.concatenate %309, %310 in 0 : vector<1x4x48xf32>, vector<1x4x48xf32> -> vector<2x4x48xf32>
    %312 = vector.extract_strided_slice %311 {offsets = [0, 0, 0], sizes = [2, 4, 8], strides = [1, 1, 1]} : vector<2x4x48xf32> to vector<2x4x8xf32>
    %313 = vector.extract_strided_slice %311 {offsets = [0, 0, 16], sizes = [2, 4, 8], strides = [1, 1, 1]} : vector<2x4x48xf32> to vector<2x4x8xf32>
    %314 = vector.extract_strided_slice %311 {offsets = [0, 0, 32], sizes = [2, 4, 8], strides = [1, 1, 1]} : vector<2x4x48xf32> to vector<2x4x8xf32>
    "tpu.trace_start"() <{level = 10 : i32, message = "bqc,bkc->bqk"}> : () -> ()
    %cst_117 = arith.constant dense<0.000000e+00> : vector<2x4x4xf32>
    %315 = tpu.matmul %312, %313, %cst_117 {dimension_numbers = #tpu.dot_dimension_numbers<[2], [2], [1], [1], [0, 0, 0, 1, 1, 1], [0], [0]>} : vector<2x4x8xf32>, vector<2x4x8xf32>, vector<2x4x4xf32> -> vector<2x4x4xf32>
    "tpu.trace_stop"() : () -> ()
    %cst_118 = arith.constant 0.353553385 : f32
    %316 = vector.broadcast %cst_118 : f32 to vector<2x4x4xf32>
    %317 = arith.mulf %315, %316 : vector<2x4x4xf32>
    %cst_119 = arith.constant dense<0xFF800000> : vector<2x4xf32>
    %318 = vector.multi_reduction <maximumf>, %317, %cst_119 [2] : vector<2x4x4xf32> to vector<2x4xf32>
    %319 = vector.shape_cast %318 : vector<2x4xf32> to vector<2x4x1xf32>
    %320 = vector.broadcast %319 : vector<2x4x1xf32> to vector<2x4x4xf32>
    %321 = arith.subf %317, %320 : vector<2x4x4xf32>
    %322 = math.exp %321 : vector<2x4x4xf32>
    %cst_120 = arith.constant dense<0.000000e+00> : vector<2x4xf32>
    %323 = vector.multi_reduction <add>, %322, %cst_120 [2] : vector<2x4x4xf32> to vector<2x4xf32>
    %324 = vector.shape_cast %323 : vector<2x4xf32> to vector<2x4x1xf32>
    %325 = vector.broadcast %324 : vector<2x4x1xf32> to vector<2x4x4xf32>
    %326 = arith.divf %322, %325 : vector<2x4x4xf32>
    "tpu.trace_start"() <{level = 10 : i32, message = "bqk,bkc->bqc"}> : () -> ()
    %cst_121 = arith.constant dense<0.000000e+00> : vector<2x4x8xf32>
    %327 = tpu.matmul %326, %314, %cst_121 {dimension_numbers = #tpu.dot_dimension_numbers<[2], [1], [1], [2], [0, 0, 0, 1, 1, 2], [0], [0]>} : vector<2x4x4xf32>, vector<2x4x8xf32>, vector<2x4x8xf32> -> vector<2x4x8xf32>
    "tpu.trace_stop"() : () -> ()
    %328 = vector.extract_strided_slice %311 {offsets = [0, 0, 8], sizes = [2, 4, 8], strides = [1, 1, 1]} : vector<2x4x48xf32> to vector<2x4x8xf32>
    %329 = vector.extract_strided_slice %311 {offsets = [0, 0, 24], sizes = [2, 4, 8], strides = [1, 1, 1]} : vector<2x4x48xf32> to vector<2x4x8xf32>
    %330 = vector.extract_strided_slice %311 {offsets = [0, 0, 40], sizes = [2, 4, 8], strides = [1, 1, 1]} : vector<2x4x48xf32> to vector<2x4x8xf32>
    "tpu.trace_start"() <{level = 10 : i32, message = "bqc,bkc->bqk"}> : () -> ()
    %cst_122 = arith.constant dense<0.000000e+00> : vector<2x4x4xf32>
    %331 = tpu.matmul %328, %329, %cst_122 {dimension_numbers = #tpu.dot_dimension_numbers<[2], [2], [1], [1], [0, 0, 0, 1, 1, 1], [0], [0]>} : vector<2x4x8xf32>, vector<2x4x8xf32>, vector<2x4x4xf32> -> vector<2x4x4xf32>
    "tpu.trace_stop"() : () -> ()
    %cst_123 = arith.constant 0.353553385 : f32
    %332 = vector.broadcast %cst_123 : f32 to vector<2x4x4xf32>
    %333 = arith.mulf %331, %332 : vector<2x4x4xf32>
    %cst_124 = arith.constant dense<0xFF800000> : vector<2x4xf32>
    %334 = vector.multi_reduction <maximumf>, %333, %cst_124 [2] : vector<2x4x4xf32> to vector<2x4xf32>
    %335 = vector.shape_cast %334 : vector<2x4xf32> to vector<2x4x1xf32>
    %336 = vector.broadcast %335 : vector<2x4x1xf32> to vector<2x4x4xf32>
    %337 = arith.subf %333, %336 : vector<2x4x4xf32>
    %338 = math.exp %337 : vector<2x4x4xf32>
    %cst_125 = arith.constant dense<0.000000e+00> : vector<2x4xf32>
    %339 = vector.multi_reduction <add>, %338, %cst_125 [2] : vector<2x4x4xf32> to vector<2x4xf32>
    %340 = vector.shape_cast %339 : vector<2x4xf32> to vector<2x4x1xf32>
    %341 = vector.broadcast %340 : vector<2x4x1xf32> to vector<2x4x4xf32>
    %342 = arith.divf %338, %341 : vector<2x4x4xf32>
    "tpu.trace_start"() <{level = 10 : i32, message = "bqk,bkc->bqc"}> : () -> ()
    %cst_126 = arith.constant dense<0.000000e+00> : vector<2x4x8xf32>
    %343 = tpu.matmul %342, %330, %cst_126 {dimension_numbers = #tpu.dot_dimension_numbers<[2], [1], [1], [2], [0, 0, 0, 1, 1, 2], [0], [0]>} : vector<2x4x4xf32>, vector<2x4x8xf32>, vector<2x4x8xf32> -> vector<2x4x8xf32>
    "tpu.trace_stop"() : () -> ()
    %344 = tpu.concatenate %327, %343 in 2 : vector<2x4x8xf32>, vector<2x4x8xf32> -> vector<2x4x16xf32>
    %345 = vector.extract_strided_slice %344 {offsets = [0, 0, 0], sizes = [1, 4, 16], strides = [1, 1, 1]} : vector<2x4x16xf32> to vector<1x4x16xf32>
    %346 = vector.shape_cast %345 : vector<1x4x16xf32> to vector<4x16xf32>
    %347 = vector.extract_strided_slice %344 {offsets = [1, 0, 0], sizes = [1, 4, 16], strides = [1, 1, 1]} : vector<2x4x16xf32> to vector<1x4x16xf32>
    %348 = vector.shape_cast %347 : vector<1x4x16xf32> to vector<4x16xf32>
    %349 = tpu.concatenate %346, %348 in 0 : vector<4x16xf32>, vector<4x16xf32> -> vector<8x16xf32>
    %350 = arith.truncf %349 : vector<8x16xf32> to vector<8x16xbf16>
    %cst_127 = arith.constant dense<0.000000e+00> : vector<8x16xf32>
    %351 = tpu.matmul %350, %276, %cst_127 {dimension_numbers = #tpu.dot_dimension_numbers<[1], [0], [0], [1], [0, 0, 1, 1], [], []>} : vector<8x16xbf16>, vector<16x16xbf16>, vector<8x16xf32> -> vector<8x16xf32>
    %c21 = arith.constant 21 : index
    %c0_128 = arith.constant 0 : index
    %352 = vector.load %arg7[%c21, %c0_128] : memref<40x512xf32, #tpu.memory_space<vmem>>, vector<1x16xf32>
    %353 = vector.broadcast %352 : vector<1x16xf32> to vector<8x16xf32>
    %354 = arith.addf %351, %353 : vector<8x16xf32>
    %355 = arith.addf %11, %354 : vector<8x16xf32>
    %c22 = arith.constant 22 : index
    %c0_129 = arith.constant 0 : index
    %356 = vector.load %arg7[%c22, %c0_129] : memref<40x512xf32, #tpu.memory_space<vmem>>, vector<1x16xf32>
    %c23 = arith.constant 23 : index
    %c0_130 = arith.constant 0 : index
    %357 = vector.load %arg7[%c23, %c0_130] : memref<40x512xf32, #tpu.memory_space<vmem>>, vector<1x16xf32>
    %cst_131 = arith.constant dense<0.000000e+00> : vector<8xf32>
    %358 = vector.multi_reduction <add>, %355, %cst_131 [1] : vector<8x16xf32> to vector<8xf32>
    %359 = vector.shape_cast %358 : vector<8xf32> to vector<8x1xf32>
    %cst_132 = arith.constant 1.600000e+01 : f32
    %360 = vector.broadcast %cst_132 : f32 to vector<8x1xf32>
    %361 = arith.divf %359, %360 : vector<8x1xf32>
    %362 = vector.broadcast %361 : vector<8x1xf32> to vector<8x16xf32>
    %363 = arith.subf %355, %362 : vector<8x16xf32>
    %364 = arith.mulf %363, %363 : vector<8x16xf32>
    %cst_133 = arith.constant dense<0.000000e+00> : vector<8xf32>
    %365 = vector.multi_reduction <add>, %364, %cst_133 [1] : vector<8x16xf32> to vector<8xf32>
    %366 = vector.shape_cast %365 : vector<8xf32> to vector<8x1xf32>
    %cst_134 = arith.constant 1.500000e+01 : f32
    %367 = vector.broadcast %cst_134 : f32 to vector<8x1xf32>
    %368 = arith.divf %366, %367 : vector<8x1xf32>
    %369 = vector.broadcast %356 : vector<1x16xf32> to vector<8x16xf32>
    %370 = arith.mulf %369, %363 : vector<8x16xf32>
    %371 = math.sqrt %368 : vector<8x1xf32>
    %cst_135 = arith.constant 9.99999997E-7 : f32
    %372 = vector.broadcast %cst_135 : f32 to vector<8x1xf32>
    %373 = arith.addf %371, %372 : vector<8x1xf32>
    %374 = vector.broadcast %373 : vector<8x1xf32> to vector<8x16xf32>
    %375 = arith.divf %370, %374 : vector<8x16xf32>
    %376 = vector.broadcast %357 : vector<1x16xf32> to vector<8x16xf32>
    %377 = arith.addf %375, %376 : vector<8x16xf32>
    %378 = arith.truncf %377 : vector<8x16xf32> to vector<8x16xbf16>
    %cst_136 = arith.constant dense<0.000000e+00> : vector<8x512xf32>
    %379 = tpu.matmul %378, %277, %cst_136 {dimension_numbers = #tpu.dot_dimension_numbers<[1], [0], [0], [1], [0, 0, 1, 1], [], []>} : vector<8x16xbf16>, vector<16x512xbf16>, vector<8x512xf32> -> vector<8x512xf32>
    %c24 = arith.constant 24 : index
    %c0_137 = arith.constant 0 : index
    %380 = vector.load %arg7[%c24, %c0_137] : memref<40x512xf32, #tpu.memory_space<vmem>>, vector<1x512xf32>
    %381 = vector.broadcast %380 : vector<1x512xf32> to vector<8x512xf32>
    %382 = arith.addf %379, %381 : vector<8x512xf32>
    %cst_138 = arith.constant 0.000000e+00 : f32
    %383 = vector.broadcast %cst_138 : f32 to vector<8x512xf32>
    %384 = arith.maximumf %382, %383 : vector<8x512xf32>
    %385 = arith.truncf %384 : vector<8x512xf32> to vector<8x512xbf16>
    %cst_139 = arith.constant dense<0.000000e+00> : vector<8x16xf32>
    %386 = tpu.matmul %385, %279, %cst_139 {dimension_numbers = #tpu.dot_dimension_numbers<[1], [0], [0], [1], [0, 0, 1, 1], [], []>} : vector<8x512xbf16>, vector<512x16xbf16>, vector<8x16xf32> -> vector<8x16xf32>
    %c25 = arith.constant 25 : index
    %c0_140 = arith.constant 0 : index
    %387 = vector.load %arg7[%c25, %c0_140] : memref<40x512xf32, #tpu.memory_space<vmem>>, vector<1x16xf32>
    %388 = vector.broadcast %387 : vector<1x16xf32> to vector<8x16xf32>
    %389 = arith.addf %386, %388 : vector<8x16xf32>
    %390 = arith.addf %355, %389 : vector<8x16xf32>
    %c1_141 = arith.constant 1 : index
    %c1_142 = arith.constant 1 : index
    %c0_143 = arith.constant 0 : index
    %c0_144 = arith.constant 0 : index
    %391 = vector.load %arg4[%c1_141, %c1_142, %c0_143, %c0_144] : memref<2x2x16x768xbf16, #tpu.memory_space<vmem>>, vector<1x1x16x768xbf16>
    %392 = vector.shape_cast %391 : vector<1x1x16x768xbf16> to vector<16x768xbf16>
    %393 = vector.extract_strided_slice %392 {offsets = [0, 0], sizes = [16, 48], strides = [1, 1]} : vector<16x768xbf16> to vector<16x48xbf16>
    %394 = vector.extract_strided_slice %392 {offsets = [0, 128], sizes = [16, 16], strides = [1, 1]} : vector<16x768xbf16> to vector<16x16xbf16>
    %395 = vector.extract_strided_slice %392 {offsets = [0, 256], sizes = [16, 512], strides = [1, 1]} : vector<16x768xbf16> to vector<16x512xbf16>
    %c1_145 = arith.constant 1 : index
    %c1_146 = arith.constant 1 : index
    %c0_147 = arith.constant 0 : index
    %c0_148 = arith.constant 0 : index
    %396 = vector.load %arg5[%c1_145, %c1_146, %c0_147, %c0_148] : memref<2x2x512x16xbf16, #tpu.memory_space<vmem>>, vector<1x1x512x16xbf16>
    %397 = vector.shape_cast %396 : vector<1x1x512x16xbf16> to vector<512x16xbf16>
    %c26 = arith.constant 26 : index
    %c0_149 = arith.constant 0 : index
    %398 = vector.load %arg7[%c26, %c0_149] : memref<40x512xf32, #tpu.memory_space<vmem>>, vector<1x16xf32>
    %c27 = arith.constant 27 : index
    %c0_150 = arith.constant 0 : index
    %399 = vector.load %arg7[%c27, %c0_150] : memref<40x512xf32, #tpu.memory_space<vmem>>, vector<1x16xf32>
    %cst_151 = arith.constant dense<0.000000e+00> : vector<8xf32>
    %400 = vector.multi_reduction <add>, %390, %cst_151 [1] : vector<8x16xf32> to vector<8xf32>
    %401 = vector.shape_cast %400 : vector<8xf32> to vector<8x1xf32>
    %cst_152 = arith.constant 1.600000e+01 : f32
    %402 = vector.broadcast %cst_152 : f32 to vector<8x1xf32>
    %403 = arith.divf %401, %402 : vector<8x1xf32>
    %404 = vector.broadcast %403 : vector<8x1xf32> to vector<8x16xf32>
    %405 = arith.subf %390, %404 : vector<8x16xf32>
    %406 = arith.mulf %405, %405 : vector<8x16xf32>
    %cst_153 = arith.constant dense<0.000000e+00> : vector<8xf32>
    %407 = vector.multi_reduction <add>, %406, %cst_153 [1] : vector<8x16xf32> to vector<8xf32>
    %408 = vector.shape_cast %407 : vector<8xf32> to vector<8x1xf32>
    %cst_154 = arith.constant 1.500000e+01 : f32
    %409 = vector.broadcast %cst_154 : f32 to vector<8x1xf32>
    %410 = arith.divf %408, %409 : vector<8x1xf32>
    %411 = vector.broadcast %398 : vector<1x16xf32> to vector<8x16xf32>
    %412 = arith.mulf %411, %405 : vector<8x16xf32>
    %413 = math.sqrt %410 : vector<8x1xf32>
    %cst_155 = arith.constant 9.99999997E-7 : f32
    %414 = vector.broadcast %cst_155 : f32 to vector<8x1xf32>
    %415 = arith.addf %413, %414 : vector<8x1xf32>
    %416 = vector.broadcast %415 : vector<8x1xf32> to vector<8x16xf32>
    %417 = arith.divf %412, %416 : vector<8x16xf32>
    %418 = vector.broadcast %399 : vector<1x16xf32> to vector<8x16xf32>
    %419 = arith.addf %417, %418 : vector<8x16xf32>
    %420 = arith.truncf %419 : vector<8x16xf32> to vector<8x16xbf16>
    %cst_156 = arith.constant dense<0.000000e+00> : vector<8x48xf32>
    %421 = tpu.matmul %420, %393, %cst_156 {dimension_numbers = #tpu.dot_dimension_numbers<[1], [0], [0], [1], [0, 0, 1, 1], [], []>} : vector<8x16xbf16>, vector<16x48xbf16>, vector<8x48xf32> -> vector<8x48xf32>
    %c28 = arith.constant 28 : index
    %c0_157 = arith.constant 0 : index
    %422 = vector.load %arg7[%c28, %c0_157] : memref<40x512xf32, #tpu.memory_space<vmem>>, vector<1x48xf32>
    %423 = vector.broadcast %422 : vector<1x48xf32> to vector<8x48xf32>
    %424 = arith.addf %421, %423 : vector<8x48xf32>
    %425 = vector.extract_strided_slice %424 {offsets = [0, 0], sizes = [4, 48], strides = [1, 1]} : vector<8x48xf32> to vector<4x48xf32>
    %426 = vector.extract_strided_slice %424 {offsets = [4, 0], sizes = [4, 48], strides = [1, 1]} : vector<8x48xf32> to vector<4x48xf32>
    %427 = vector.shape_cast %425 : vector<4x48xf32> to vector<1x4x48xf32>
    %428 = vector.shape_cast %426 : vector<4x48xf32> to vector<1x4x48xf32>
    %429 = tpu.concatenate %427, %428 in 0 : vector<1x4x48xf32>, vector<1x4x48xf32> -> vector<2x4x48xf32>
    %430 = vector.extract_strided_slice %429 {offsets = [0, 0, 0], sizes = [2, 4, 8], strides = [1, 1, 1]} : vector<2x4x48xf32> to vector<2x4x8xf32>
    %431 = vector.extract_strided_slice %429 {offsets = [0, 0, 16], sizes = [2, 4, 8], strides = [1, 1, 1]} : vector<2x4x48xf32> to vector<2x4x8xf32>
    %432 = vector.extract_strided_slice %429 {offsets = [0, 0, 32], sizes = [2, 4, 8], strides = [1, 1, 1]} : vector<2x4x48xf32> to vector<2x4x8xf32>
    "tpu.trace_start"() <{level = 10 : i32, message = "bqc,bkc->bqk"}> : () -> ()
    %cst_158 = arith.constant dense<0.000000e+00> : vector<2x4x4xf32>
    %433 = tpu.matmul %430, %431, %cst_158 {dimension_numbers = #tpu.dot_dimension_numbers<[2], [2], [1], [1], [0, 0, 0, 1, 1, 1], [0], [0]>} : vector<2x4x8xf32>, vector<2x4x8xf32>, vector<2x4x4xf32> -> vector<2x4x4xf32>
    "tpu.trace_stop"() : () -> ()
    %cst_159 = arith.constant 0.353553385 : f32
    %434 = vector.broadcast %cst_159 : f32 to vector<2x4x4xf32>
    %435 = arith.mulf %433, %434 : vector<2x4x4xf32>
    %cst_160 = arith.constant dense<0xFF800000> : vector<2x4xf32>
    %436 = vector.multi_reduction <maximumf>, %435, %cst_160 [2] : vector<2x4x4xf32> to vector<2x4xf32>
    %437 = vector.shape_cast %436 : vector<2x4xf32> to vector<2x4x1xf32>
    %438 = vector.broadcast %437 : vector<2x4x1xf32> to vector<2x4x4xf32>
    %439 = arith.subf %435, %438 : vector<2x4x4xf32>
    %440 = math.exp %439 : vector<2x4x4xf32>
    %cst_161 = arith.constant dense<0.000000e+00> : vector<2x4xf32>
    %441 = vector.multi_reduction <add>, %440, %cst_161 [2] : vector<2x4x4xf32> to vector<2x4xf32>
    %442 = vector.shape_cast %441 : vector<2x4xf32> to vector<2x4x1xf32>
    %443 = vector.broadcast %442 : vector<2x4x1xf32> to vector<2x4x4xf32>
    %444 = arith.divf %440, %443 : vector<2x4x4xf32>
    "tpu.trace_start"() <{level = 10 : i32, message = "bqk,bkc->bqc"}> : () -> ()
    %cst_162 = arith.constant dense<0.000000e+00> : vector<2x4x8xf32>
    %445 = tpu.matmul %444, %432, %cst_162 {dimension_numbers = #tpu.dot_dimension_numbers<[2], [1], [1], [2], [0, 0, 0, 1, 1, 2], [0], [0]>} : vector<2x4x4xf32>, vector<2x4x8xf32>, vector<2x4x8xf32> -> vector<2x4x8xf32>
    "tpu.trace_stop"() : () -> ()
    %446 = vector.extract_strided_slice %429 {offsets = [0, 0, 8], sizes = [2, 4, 8], strides = [1, 1, 1]} : vector<2x4x48xf32> to vector<2x4x8xf32>
    %447 = vector.extract_strided_slice %429 {offsets = [0, 0, 24], sizes = [2, 4, 8], strides = [1, 1, 1]} : vector<2x4x48xf32> to vector<2x4x8xf32>
    %448 = vector.extract_strided_slice %429 {offsets = [0, 0, 40], sizes = [2, 4, 8], strides = [1, 1, 1]} : vector<2x4x48xf32> to vector<2x4x8xf32>
    "tpu.trace_start"() <{level = 10 : i32, message = "bqc,bkc->bqk"}> : () -> ()
    %cst_163 = arith.constant dense<0.000000e+00> : vector<2x4x4xf32>
    %449 = tpu.matmul %446, %447, %cst_163 {dimension_numbers = #tpu.dot_dimension_numbers<[2], [2], [1], [1], [0, 0, 0, 1, 1, 1], [0], [0]>} : vector<2x4x8xf32>, vector<2x4x8xf32>, vector<2x4x4xf32> -> vector<2x4x4xf32>
    "tpu.trace_stop"() : () -> ()
    %cst_164 = arith.constant 0.353553385 : f32
    %450 = vector.broadcast %cst_164 : f32 to vector<2x4x4xf32>
    %451 = arith.mulf %449, %450 : vector<2x4x4xf32>
    %cst_165 = arith.constant dense<0xFF800000> : vector<2x4xf32>
    %452 = vector.multi_reduction <maximumf>, %451, %cst_165 [2] : vector<2x4x4xf32> to vector<2x4xf32>
    %453 = vector.shape_cast %452 : vector<2x4xf32> to vector<2x4x1xf32>
    %454 = vector.broadcast %453 : vector<2x4x1xf32> to vector<2x4x4xf32>
    %455 = arith.subf %451, %454 : vector<2x4x4xf32>
    %456 = math.exp %455 : vector<2x4x4xf32>
    %cst_166 = arith.constant dense<0.000000e+00> : vector<2x4xf32>
    %457 = vector.multi_reduction <add>, %456, %cst_166 [2] : vector<2x4x4xf32> to vector<2x4xf32>
    %458 = vector.shape_cast %457 : vector<2x4xf32> to vector<2x4x1xf32>
    %459 = vector.broadcast %458 : vector<2x4x1xf32> to vector<2x4x4xf32>
    %460 = arith.divf %456, %459 : vector<2x4x4xf32>
    "tpu.trace_start"() <{level = 10 : i32, message = "bqk,bkc->bqc"}> : () -> ()
    %cst_167 = arith.constant dense<0.000000e+00> : vector<2x4x8xf32>
    %461 = tpu.matmul %460, %448, %cst_167 {dimension_numbers = #tpu.dot_dimension_numbers<[2], [1], [1], [2], [0, 0, 0, 1, 1, 2], [0], [0]>} : vector<2x4x4xf32>, vector<2x4x8xf32>, vector<2x4x8xf32> -> vector<2x4x8xf32>
    "tpu.trace_stop"() : () -> ()
    %462 = tpu.concatenate %445, %461 in 2 : vector<2x4x8xf32>, vector<2x4x8xf32> -> vector<2x4x16xf32>
    %463 = vector.extract_strided_slice %462 {offsets = [0, 0, 0], sizes = [1, 4, 16], strides = [1, 1, 1]} : vector<2x4x16xf32> to vector<1x4x16xf32>
    %464 = vector.shape_cast %463 : vector<1x4x16xf32> to vector<4x16xf32>
    %465 = vector.extract_strided_slice %462 {offsets = [1, 0, 0], sizes = [1, 4, 16], strides = [1, 1, 1]} : vector<2x4x16xf32> to vector<1x4x16xf32>
    %466 = vector.shape_cast %465 : vector<1x4x16xf32> to vector<4x16xf32>
    %467 = tpu.concatenate %464, %466 in 0 : vector<4x16xf32>, vector<4x16xf32> -> vector<8x16xf32>
    %468 = arith.truncf %467 : vector<8x16xf32> to vector<8x16xbf16>
    %cst_168 = arith.constant dense<0.000000e+00> : vector<8x16xf32>
    %469 = tpu.matmul %468, %394, %cst_168 {dimension_numbers = #tpu.dot_dimension_numbers<[1], [0], [0], [1], [0, 0, 1, 1], [], []>} : vector<8x16xbf16>, vector<16x16xbf16>, vector<8x16xf32> -> vector<8x16xf32>
    %c29 = arith.constant 29 : index
    %c0_169 = arith.constant 0 : index
    %470 = vector.load %arg7[%c29, %c0_169] : memref<40x512xf32, #tpu.memory_space<vmem>>, vector<1x16xf32>
    %471 = vector.broadcast %470 : vector<1x16xf32> to vector<8x16xf32>
    %472 = arith.addf %469, %471 : vector<8x16xf32>
    %473 = arith.addf %390, %472 : vector<8x16xf32>
    %c30 = arith.constant 30 : index
    %c0_170 = arith.constant 0 : index
    %474 = vector.load %arg7[%c30, %c0_170] : memref<40x512xf32, #tpu.memory_space<vmem>>, vector<1x16xf32>
    %c31 = arith.constant 31 : index
    %c0_171 = arith.constant 0 : index
    %475 = vector.load %arg7[%c31, %c0_171] : memref<40x512xf32, #tpu.memory_space<vmem>>, vector<1x16xf32>
    %cst_172 = arith.constant dense<0.000000e+00> : vector<8xf32>
    %476 = vector.multi_reduction <add>, %473, %cst_172 [1] : vector<8x16xf32> to vector<8xf32>
    %477 = vector.shape_cast %476 : vector<8xf32> to vector<8x1xf32>
    %cst_173 = arith.constant 1.600000e+01 : f32
    %478 = vector.broadcast %cst_173 : f32 to vector<8x1xf32>
    %479 = arith.divf %477, %478 : vector<8x1xf32>
    %480 = vector.broadcast %479 : vector<8x1xf32> to vector<8x16xf32>
    %481 = arith.subf %473, %480 : vector<8x16xf32>
    %482 = arith.mulf %481, %481 : vector<8x16xf32>
    %cst_174 = arith.constant dense<0.000000e+00> : vector<8xf32>
    %483 = vector.multi_reduction <add>, %482, %cst_174 [1] : vector<8x16xf32> to vector<8xf32>
    %484 = vector.shape_cast %483 : vector<8xf32> to vector<8x1xf32>
    %cst_175 = arith.constant 1.500000e+01 : f32
    %485 = vector.broadcast %cst_175 : f32 to vector<8x1xf32>
    %486 = arith.divf %484, %485 : vector<8x1xf32>
    %487 = vector.broadcast %474 : vector<1x16xf32> to vector<8x16xf32>
    %488 = arith.mulf %487, %481 : vector<8x16xf32>
    %489 = math.sqrt %486 : vector<8x1xf32>
    %cst_176 = arith.constant 9.99999997E-7 : f32
    %490 = vector.broadcast %cst_176 : f32 to vector<8x1xf32>
    %491 = arith.addf %489, %490 : vector<8x1xf32>
    %492 = vector.broadcast %491 : vector<8x1xf32> to vector<8x16xf32>
    %493 = arith.divf %488, %492 : vector<8x16xf32>
    %494 = vector.broadcast %475 : vector<1x16xf32> to vector<8x16xf32>
    %495 = arith.addf %493, %494 : vector<8x16xf32>
    %496 = arith.truncf %495 : vector<8x16xf32> to vector<8x16xbf16>
    %cst_177 = arith.constant dense<0.000000e+00> : vector<8x512xf32>
    %497 = tpu.matmul %496, %395, %cst_177 {dimension_numbers = #tpu.dot_dimension_numbers<[1], [0], [0], [1], [0, 0, 1, 1], [], []>} : vector<8x16xbf16>, vector<16x512xbf16>, vector<8x512xf32> -> vector<8x512xf32>
    %c32 = arith.constant 32 : index
    %c0_178 = arith.constant 0 : index
    %498 = vector.load %arg7[%c32, %c0_178] : memref<40x512xf32, #tpu.memory_space<vmem>>, vector<1x512xf32>
    %499 = vector.broadcast %498 : vector<1x512xf32> to vector<8x512xf32>
    %500 = arith.addf %497, %499 : vector<8x512xf32>
    %cst_179 = arith.constant 0.000000e+00 : f32
    %501 = vector.broadcast %cst_179 : f32 to vector<8x512xf32>
    %502 = arith.maximumf %500, %501 : vector<8x512xf32>
    %503 = arith.truncf %502 : vector<8x512xf32> to vector<8x512xbf16>
    %cst_180 = arith.constant dense<0.000000e+00> : vector<8x16xf32>
    %504 = tpu.matmul %503, %397, %cst_180 {dimension_numbers = #tpu.dot_dimension_numbers<[1], [0], [0], [1], [0, 0, 1, 1], [], []>} : vector<8x512xbf16>, vector<512x16xbf16>, vector<8x16xf32> -> vector<8x16xf32>
    %c33 = arith.constant 33 : index
    %c0_181 = arith.constant 0 : index
    %505 = vector.load %arg7[%c33, %c0_181] : memref<40x512xf32, #tpu.memory_space<vmem>>, vector<1x16xf32>
    %506 = vector.broadcast %505 : vector<1x16xf32> to vector<8x16xf32>
    %507 = arith.addf %504, %506 : vector<8x16xf32>
    %508 = arith.addf %473, %507 : vector<8x16xf32>
    %509 = vector.extract_strided_slice %508 {offsets = [3, 0], sizes = [1, 16], strides = [1, 1]} : vector<8x16xf32> to vector<1x16xf32>
    %510 = vector.extract_strided_slice %508 {offsets = [7, 0], sizes = [1, 16], strides = [1, 1]} : vector<8x16xf32> to vector<1x16xf32>
    %511 = tpu.concatenate %509, %510 in 0 : vector<1x16xf32>, vector<1x16xf32> -> vector<2x16xf32>
    %c34 = arith.constant 34 : index
    %c0_182 = arith.constant 0 : index
    %512 = vector.load %arg7[%c34, %c0_182] : memref<40x512xf32, #tpu.memory_space<vmem>>, vector<1x16xf32>
    %c35 = arith.constant 35 : index
    %c0_183 = arith.constant 0 : index
    %513 = vector.load %arg7[%c35, %c0_183] : memref<40x512xf32, #tpu.memory_space<vmem>>, vector<1x16xf32>
    %cst_184 = arith.constant dense<0.000000e+00> : vector<2xf32>
    %514 = vector.multi_reduction <add>, %511, %cst_184 [1] : vector<2x16xf32> to vector<2xf32>
    %515 = vector.shape_cast %514 : vector<2xf32> to vector<2x1xf32>
    %cst_185 = arith.constant 1.600000e+01 : f32
    %516 = vector.broadcast %cst_185 : f32 to vector<2x1xf32>
    %517 = arith.divf %515, %516 : vector<2x1xf32>
    %518 = vector.broadcast %517 : vector<2x1xf32> to vector<2x16xf32>
    %519 = arith.subf %511, %518 : vector<2x16xf32>
    %520 = arith.mulf %519, %519 : vector<2x16xf32>
    %cst_186 = arith.constant dense<0.000000e+00> : vector<2xf32>
    %521 = vector.multi_reduction <add>, %520, %cst_186 [1] : vector<2x16xf32> to vector<2xf32>
    %522 = vector.shape_cast %521 : vector<2xf32> to vector<2x1xf32>
    %cst_187 = arith.constant 1.500000e+01 : f32
    %523 = vector.broadcast %cst_187 : f32 to vector<2x1xf32>
    %524 = arith.divf %522, %523 : vector<2x1xf32>
    %525 = vector.broadcast %512 : vector<1x16xf32> to vector<2x16xf32>
    %526 = arith.mulf %525, %519 : vector<2x16xf32>
    %527 = math.sqrt %524 : vector<2x1xf32>
    %cst_188 = arith.constant 9.99999997E-7 : f32
    %528 = vector.broadcast %cst_188 : f32 to vector<2x1xf32>
    %529 = arith.addf %527, %528 : vector<2x1xf32>
    %530 = vector.broadcast %529 : vector<2x1xf32> to vector<2x16xf32>
    %531 = arith.divf %526, %530 : vector<2x16xf32>
    %532 = vector.broadcast %513 : vector<1x16xf32> to vector<2x16xf32>
    %533 = arith.addf %531, %532 : vector<2x16xf32>
    %c0_189 = arith.constant 0 : index
    %c0_190 = arith.constant 0 : index
    %534 = vector.load %arg6[%c0_189, %c0_190] : memref<32x64xf32, #tpu.memory_space<vmem>>, vector<32x64xf32>
    %535 = vector.extract_strided_slice %534 {offsets = [0, 0], sizes = [32, 32], strides = [1, 1]} : vector<32x64xf32> to vector<32x32xf32>
    %536 = vector.extract_strided_slice %534 {offsets = [0, 32], sizes = [32, 32], strides = [1, 1]} : vector<32x64xf32> to vector<32x32xf32>
    %537 = tpu.concatenate %272, %533 in 1 : vector<2x16xf32>, vector<2x16xf32> -> vector<2x32xf32>
    %cst_191 = arith.constant dense<0.000000e+00> : vector<2x32xf32>
    %538 = tpu.matmul %537, %535, %cst_191 {dimension_numbers = #tpu.dot_dimension_numbers<[1], [0], [0], [1], [0, 0, 1, 1], [], []>} : vector<2x32xf32>, vector<32x32xf32>, vector<2x32xf32> -> vector<2x32xf32>
    %c36 = arith.constant 36 : index
    %c0_192 = arith.constant 0 : index
    %539 = vector.load %arg7[%c36, %c0_192] : memref<40x512xf32, #tpu.memory_space<vmem>>, vector<1x32xf32>
    %540 = vector.broadcast %539 : vector<1x32xf32> to vector<2x32xf32>
    %541 = arith.addf %538, %540 : vector<2x32xf32>
    %c37 = arith.constant 37 : index
    %c0_193 = arith.constant 0 : index
    %542 = vector.load %arg7[%c37, %c0_193] : memref<40x512xf32, #tpu.memory_space<vmem>>, vector<1x32xf32>
    %c38 = arith.constant 38 : index
    %c0_194 = arith.constant 0 : index
    %543 = vector.load %arg7[%c38, %c0_194] : memref<40x512xf32, #tpu.memory_space<vmem>>, vector<1x32xf32>
    %544 = vector.extract_strided_slice %541 {offsets = [0, 0], sizes = [2, 16], strides = [1, 1]} : vector<2x32xf32> to vector<2x16xf32>
    %545 = vector.extract_strided_slice %542 {offsets = [0, 0], sizes = [1, 16], strides = [1, 1]} : vector<1x32xf32> to vector<1x16xf32>
    %546 = vector.extract_strided_slice %543 {offsets = [0, 0], sizes = [1, 16], strides = [1, 1]} : vector<1x32xf32> to vector<1x16xf32>
    %cst_195 = arith.constant dense<0.000000e+00> : vector<2xf32>
    %547 = vector.multi_reduction <add>, %544, %cst_195 [1] : vector<2x16xf32> to vector<2xf32>
    %548 = vector.shape_cast %547 : vector<2xf32> to vector<2x1xf32>
    %cst_196 = arith.constant 1.600000e+01 : f32
    %549 = vector.broadcast %cst_196 : f32 to vector<2x1xf32>
    %550 = arith.divf %548, %549 : vector<2x1xf32>
    %551 = vector.broadcast %550 : vector<2x1xf32> to vector<2x16xf32>
    %552 = arith.subf %544, %551 : vector<2x16xf32>
    %553 = arith.mulf %552, %552 : vector<2x16xf32>
    %cst_197 = arith.constant dense<0.000000e+00> : vector<2xf32>
    %554 = vector.multi_reduction <add>, %553, %cst_197 [1] : vector<2x16xf32> to vector<2xf32>
    %555 = vector.shape_cast %554 : vector<2xf32> to vector<2x1xf32>
    %cst_198 = arith.constant 1.600000e+01 : f32
    %556 = vector.broadcast %cst_198 : f32 to vector<2x1xf32>
    %557 = arith.divf %555, %556 : vector<2x1xf32>
    %558 = vector.broadcast %550 : vector<2x1xf32> to vector<2x16xf32>
    %559 = arith.subf %544, %558 : vector<2x16xf32>
    %cst_199 = arith.constant 9.99999974E-6 : f32
    %560 = vector.broadcast %cst_199 : f32 to vector<2x1xf32>
    %561 = arith.addf %557, %560 : vector<2x1xf32>
    %562 = math.rsqrt %561 : vector<2x1xf32>
    %563 = vector.broadcast %562 : vector<2x1xf32> to vector<2x16xf32>
    %564 = arith.mulf %559, %563 : vector<2x16xf32>
    %565 = vector.broadcast %545 : vector<1x16xf32> to vector<2x16xf32>
    %566 = arith.mulf %564, %565 : vector<2x16xf32>
    %567 = vector.broadcast %546 : vector<1x16xf32> to vector<2x16xf32>
    %568 = arith.addf %566, %567 : vector<2x16xf32>
    %569 = vector.extract_strided_slice %541 {offsets = [0, 16], sizes = [2, 16], strides = [1, 1]} : vector<2x32xf32> to vector<2x16xf32>
    %570 = vector.extract_strided_slice %542 {offsets = [0, 16], sizes = [1, 16], strides = [1, 1]} : vector<1x32xf32> to vector<1x16xf32>
    %571 = vector.extract_strided_slice %543 {offsets = [0, 16], sizes = [1, 16], strides = [1, 1]} : vector<1x32xf32> to vector<1x16xf32>
    %cst_200 = arith.constant dense<0.000000e+00> : vector<2xf32>
    %572 = vector.multi_reduction <add>, %569, %cst_200 [1] : vector<2x16xf32> to vector<2xf32>
    %573 = vector.shape_cast %572 : vector<2xf32> to vector<2x1xf32>
    %cst_201 = arith.constant 1.600000e+01 : f32
    %574 = vector.broadcast %cst_201 : f32 to vector<2x1xf32>
    %575 = arith.divf %573, %574 : vector<2x1xf32>
    %576 = vector.broadcast %575 : vector<2x1xf32> to vector<2x16xf32>
    %577 = arith.subf %569, %576 : vector<2x16xf32>
    %578 = arith.mulf %577, %577 : vector<2x16xf32>
    %cst_202 = arith.constant dense<0.000000e+00> : vector<2xf32>
    %579 = vector.multi_reduction <add>, %578, %cst_202 [1] : vector<2x16xf32> to vector<2xf32>
    %580 = vector.shape_cast %579 : vector<2xf32> to vector<2x1xf32>
    %cst_203 = arith.constant 1.600000e+01 : f32
    %581 = vector.broadcast %cst_203 : f32 to vector<2x1xf32>
    %582 = arith.divf %580, %581 : vector<2x1xf32>
    %583 = vector.broadcast %575 : vector<2x1xf32> to vector<2x16xf32>
    %584 = arith.subf %569, %583 : vector<2x16xf32>
    %cst_204 = arith.constant 9.99999974E-6 : f32
    %585 = vector.broadcast %cst_204 : f32 to vector<2x1xf32>
    %586 = arith.addf %582, %585 : vector<2x1xf32>
    %587 = math.rsqrt %586 : vector<2x1xf32>
    %588 = vector.broadcast %587 : vector<2x1xf32> to vector<2x16xf32>
    %589 = arith.mulf %584, %588 : vector<2x16xf32>
    %590 = vector.broadcast %570 : vector<1x16xf32> to vector<2x16xf32>
    %591 = arith.mulf %589, %590 : vector<2x16xf32>
    %592 = vector.broadcast %571 : vector<1x16xf32> to vector<2x16xf32>
    %593 = arith.addf %591, %592 : vector<2x16xf32>
    %594 = tpu.concatenate %568, %593 in 1 : vector<2x16xf32>, vector<2x16xf32> -> vector<2x32xf32>
    %cst_205 = arith.constant 0.000000e+00 : f32
    %595 = vector.broadcast %cst_205 : f32 to vector<2x32xf32>
    %596 = arith.subf %595, %594 : vector<2x32xf32>
    %597 = math.exp %596 : vector<2x32xf32>
    %cst_206 = arith.constant 1.000000e+00 : f32
    %598 = vector.broadcast %cst_206 : f32 to vector<2x32xf32>
    %599 = arith.addf %598, %597 : vector<2x32xf32>
    %600 = arith.divf %594, %599 : vector<2x32xf32>
    %cst_207 = arith.constant dense<0.000000e+00> : vector<2x32xf32>
    %601 = tpu.matmul %600, %536, %cst_207 {dimension_numbers = #tpu.dot_dimension_numbers<[1], [0], [0], [1], [0, 0, 1, 1], [], []>} : vector<2x32xf32>, vector<32x32xf32>, vector<2x32xf32> -> vector<2x32xf32>
    %c39 = arith.constant 39 : index
    %c0_208 = arith.constant 0 : index
    %602 = vector.load %arg7[%c39, %c0_208] : memref<40x512xf32, #tpu.memory_space<vmem>>, vector<1x32xf32>
    %603 = vector.broadcast %602 : vector<1x32xf32> to vector<2x32xf32>
    %604 = arith.addf %601, %603 : vector<2x32xf32>
    %c0_209 = arith.constant 0 : index
    %c0_210 = arith.constant 0 : index
    %c0_211 = arith.constant 0 : index
    %605 = vector.load %arg8[%c0_209, %c0_210, %c0_211] : memref<1x2x32xf32, #tpu.memory_space<vmem>>, vector<1x2x32xf32>
    %606 = vector.shape_cast %605 : vector<1x2x32xf32> to vector<2x32xf32>
    %607 = vector.shape_cast %604 : vector<2x32xf32> to vector<1x2x32xf32>
    tpu.vector_store %arg8[%c0_209, %c0_210, %c0_211], %607 {strides = array<i32>} : memref<1x2x32xf32, #tpu.memory_space<vmem>>, vector<1x2x32xf32>,
    return
  }
  func.func @transform_0(%arg0: i32) -> (i32, i32, i32) {
    %c0_i32 = arith.constant 0 : i32
    %c0_i32_0 = arith.constant 0 : i32
    %c0_i32_1 = arith.constant 0 : i32
    return %arg0, %c0_i32, %c0_i32_0 : i32, i32, i32
  }
  func.func @transform_1(%arg0: i32) -> (i32, i32, i32) {
    %c0_i32 = arith.constant 0 : i32
    %c0_i32_0 = arith.constant 0 : i32
    %c0_i32_1 = arith.constant 0 : i32
    return %arg0, %c0_i32, %c0_i32_0 : i32, i32, i32
  }
  func.func @transform_2(%arg0: i32) -> (i32, i32) {
    %c0_i32 = arith.constant 0 : i32
    %c0_i32_0 = arith.constant 0 : i32
    %c0_i32_1 = arith.constant 0 : i32
    return %c0_i32, %c0_i32_0 : i32, i32
  }
  func.func @transform_3(%arg0: i32) -> (i32, i32, i32, i32) {
    %c0_i32 = arith.constant 0 : i32
    %c0_i32_0 = arith.constant 0 : i32
    %c0_i32_1 = arith.constant 0 : i32
    %c0_i32_2 = arith.constant 0 : i32
    %c0_i32_3 = arith.constant 0 : i32
    return %c0_i32, %c0_i32_0, %c0_i32_1, %c0_i32_2 : i32, i32, i32, i32
  }
  func.func @transform_4(%arg0: i32) -> (i32, i32, i32, i32) {
    %c0_i32 = arith.constant 0 : i32
    %c0_i32_0 = arith.constant 0 : i32
    %c0_i32_1 = arith.constant 0 : i32
    %c0_i32_2 = arith.constant 0 : i32
    %c0_i32_3 = arith.constant 0 : i32
    return %c0_i32, %c0_i32_0, %c0_i32_1, %c0_i32_2 : i32, i32, i32, i32
  }
  func.func @transform_5(%arg0: i32) -> (i32, i32) {
    %c0_i32 = arith.constant 0 : i32
    %c0_i32_0 = arith.constant 0 : i32
    %c0_i32_1 = arith.constant 0 : i32
    return %c0_i32, %c0_i32_0 : i32, i32
  }
  func.func @transform_6(%arg0: i32) -> (i32, i32) {
    %c0_i32 = arith.constant 0 : i32
    %c0_i32_0 = arith.constant 0 : i32
    %c0_i32_1 = arith.constant 0 : i32
    return %c0_i32, %c0_i32_0 : i32, i32
  }
  func.func @transform_7(%arg0: i32) -> (i32, i32, i32) {
    %c0_i32 = arith.constant 0 : i32
    %c0_i32_0 = arith.constant 0 : i32
    %c0_i32_1 = arith.constant 0 : i32
    return %arg0, %c0_i32, %c0_i32_0 : i32, i32, i32
  }
}

</mosaic_0001>

<bundles_post_ra>
// kernel: tpu_custom_call.1
= control target key start
LH: loop header
LB: loop body
LE: loop exit
PB: predicated region body
PF: predicated region fallthrough
CT: control target
= control target key end

     0   :  { %vm112_vm0 = vcmask 130048   ;;  %s6511_s0 = inlined_call_operand.vmem [shape: f32[1,16,16], index: 0, kind: input, shape index: {}]   ;;  %s6512_s1 = inlined_call_operand.vmem [shape: f32[1,8,16], index: 1, kind: input, shape index: {}]   ;;  %s6513_s2 = inlined_call_operand.vmem [shape: f32[24,16], index: 2, kind: input, shape index: {}]   ;;  %s6514_s3 = inlined_call_operand.vmem [shape: bf16[2,2,16,768], index: 3, kind: input, shape index: {}]   ;;  %s6515_s4 = inlined_call_operand.vmem [shape: bf16[2,2,512,16], index: 4, kind: input, shape index: {}]   ;;  %s6516_s5 = inlined_call_operand.vmem [shape: f32[32,64], index: 5, kind: input, shape index: {}]   ;;  %s6517_s6 = inlined_call_operand.vmem [shape: f32[40,512], index: 6, kind: input, shape index: {}]   ;;  %s6518_s7 = inlined_call_operand.hbm [shape: f32[1,2,32], index: 7, kind: output, shape index: {}]  }
   0x1   :  { %v28_v0 = vld [vmem:[%s6511_s0] sm:$0xff]  ;;  %v29_v2 = vld [vmem:[%s6511_s0 + $0x8] sm:$0xff] }
   0x2   :  { %v32_v1 = vld [vmem:[%s6513_s2] sm:$0xff]  ;;  %v30_v3 = vmul.f32 4.0, %v28_v0 }
   0x3   :  { %12 = vsyncpa [#allocation3], 0  ;;  %v31_v5 = vmul.f32 4.0, %v29_v2  ;;  %v33_v6 = vld [vmem:[%s6513_s2 + $0x8] sm:$0xff]  ;;  %v5260_v10 = vmov 16.0   ;;  %v5261_v27 = vmov 15.0  }
   0x4   :  { %v5319_v4 = vadd.f32 %v32_v1, %v30_v3  ;;  %5102 = vrcp.f32 %v5260_v10  ;;  %v4008_v34 = vld [vmem:[%s6514_s3] sm:$0xf]  ;;  %v4913_v35 = vld [vmem:[%s6514_s3 + $0x14] sm:$0xf0]  ;;  %s5262_s18 = smov 104   ;;  %s5263_s19 = smov 112  }
   0x5   :  { %v5326_v8 = vadd.f32 %v33_v6, %v31_v5  ;;  %5104 = vrcp.f32 %v5261_v27  ;;  %v4009_v36 = vor.u32 %v4913_v35, %v4008_v34  ;;  %v111_v27 = vld [vmem:[%s6517_s6 + $0x1] ss:$0 sm:$0xff]  ;;  %s5264_s20 = smov 120   ;;  %vm235_vm15 = vcmask 64512   ;;  %s5265_s21 = smov 96  }
   0x6   :  { %v113_v7 = vsel %vm112_vm0, %v5319_v4, 0.0  ;;  %s5266_s22 = smov 88   ;;  %s5267_s23 = smov 8  }
   0x7   :  { %114 = vadd.xlane.f32.xlu0 %v113_v7  ;;  %v116_v9 = vsel %vm112_vm0, %v5326_v8, 0.0  ;;  %225 = vmatpush.bf16.msra.mxu0 %v4009_v36  ;;  %s5268_s30 = smov 16   ;;  %s5269_s17 = smov [#allocation2]  }
   0x8   :  { %s3995_s24 = sshll.u32 %s5269_s17, 4  ;;  %s3997_s26 = sshll.u32 %s6518_s7, 4  ;;  %s3996_s24 = int_to_ptr.vmem [resolvable:$true] %s3995_s24  ;;  %s3998_s26 = int_to_ptr.hbm [resolvable:$true] %s3997_s26 }
   0xa   :  { %v5103_v11 = vpop.eup %5102 }
   0xb   :  { %v120_v12 = vmul.f32 16.0, %v5103_v11  ;;  %vm124_vm1 = vweird.f32 %v5103_v11  ;;  %v5105_v28 = vpop.eup %5104 }
   0xc   :  { %v139_v29 = vmul.f32 15.0, %v5105_v28  ;;  %vm143_vm2 = vweird.f32 %v5105_v28 }
   0xd   :  { %v121_v13 = vsub.f32 1.0, %v120_v12  ;;  %v110_v12 = vld [vmem:[%s6517_s6] ss:$0 sm:$0xff] }
   0xe   :  { %v140_v30 = vsub.f32 1.0, %v139_v29 }
   0xf   :  { %117 = vadd.xlane.f32.xlu0 %v116_v9  ;;  %v122_v14 = vmul.f32 %v5103_v11, %v121_v13 }
  0x10   :  { %v141_v31 = vmul.f32 %v5105_v28, %v140_v30 }
  0x11   :  { %v123_v15 = vadd.f32 %v5103_v11, %v122_v14 }
  0x12   :  { %v142_v32 = vadd.f32 %v5105_v28, %v141_v31 }
  0x13   :  { %v5330_v16 = vsel %vm124_vm1, %v5103_v11, %v123_v15 }
  0x14   :  { %v5346_v33 = vsel %vm143_vm2, %v5105_v28, %v142_v32 }
  0x7a   :  { %v115_v17 = vpop.xlane.xlu0 %114 }
  0x7b   :  { %v126_v18 = vmul.f32 %v5330_v16, %v115_v17 }
  0x7d   :  { %v5334_v19 = vsub.f32 %v5319_v4, %v126_v18 }
  0x7f   :  { %v130_v20 = vmul.f32 %v5334_v19, %v5334_v19 }
  0x81   :  { %v132_v21 = vsel %vm112_vm0, %v130_v20, 0.0  ;;  %v147_v20 = vmul.f32 %v5334_v19, %v110_v12  ;;  %v208_v19 = vld [vmem:[%s6517_s6 + $0x2] ss:$0 sm:$0xff] }
  0x82   :  { %133 = vadd.xlane.f32.xlu1 %v132_v21  ;;  %v118_v22 = vpop.xlane.xlu0 %117 }
  0x83   :  { %v127_v23 = vmul.f32 %v5330_v16, %v118_v22 }
  0x85   :  { %v5341_v24 = vsub.f32 %v5326_v8, %v127_v23 }
  0x87   :  { %v131_v25 = vmul.f32 %v5341_v24, %v5341_v24  ;;  %v148_v23 = vmul.f32 %v5341_v24, %v110_v12 }
  0x89   :  { %v135_v26 = vsel %vm112_vm0, %v131_v25, 0.0 }
  0x8a   :  { %136 = vadd.xlane.f32.xlu1 %v135_v26 }
  0xf5   :  { %v134_v37 = vpop.xlane.xlu1 %133 }
  0xf6   :  { %v145_v38 = vmul.f32 %v5346_v33, %v134_v37 }
  0xf8   :  { %5106 = vrsqrt.f32 %v145_v38  ;;  %vm156_vm3 = vcmp.eq.f32.partialorder %v145_v38, inf  ;;  %v159_v51 = vand.u32 2147483648, %v145_v38  ;;  %vm158_vm4 = vcmp.eq.f32.partialorder %v145_v38, 0.0 }
  0xfd   :  { %v137_v39 = vpop.xlane.xlu1 %136 }
  0xfe   :  { %v5107_v40 = vpop.eup %5106  ;;  %v146_v41 = vmul.f32 %v5346_v33, %v137_v39 }
  0xff   :  { %v150_v42 = vmul.f32 %v5107_v40, %v145_v38 }
 0x100   :  { %5108 = vrsqrt.f32 %v146_v41  ;;  %vm168_vm5 = vcmp.eq.f32.partialorder %v146_v41, inf  ;;  %v171_v59 = vand.u32 2147483648, %v146_v41  ;;  %vm170_vm6 = vcmp.eq.f32.partialorder %v146_v41, 0.0 }
 0x101   :  { %v151_v43 = vmul.f32 %v5107_v40, %v150_v42 }
 0x103   :  { %v152_v44 = vmul.f32 0.5, %v151_v43 }
 0x105   :  { %v153_v45 = vsub.f32 1.5, %v152_v44 }
 0x106   :  { %v5109_v46 = vpop.eup %5108 }
 0x107   :  { %v154_v47 = vmul.f32 %v5107_v40, %v153_v45  ;;  %v162_v48 = vmul.f32 %v5109_v46, %v146_v41 }
 0x109   :  { %v155_v49 = vmul.f32 %v154_v47, %v145_v38  ;;  %v163_v50 = vmul.f32 %v5109_v46, %v162_v48 }
 0x10b   :  { %v157_v52 = vsel %vm156_vm3, %v145_v38, %v155_v49  ;;  %v164_v53 = vmul.f32 0.5, %v163_v50 }
 0x10c   :  { %v160_v54 = vsel %vm158_vm4, %v159_v51, %v157_v52 }
 0x10d   :  { %v165_v55 = vsub.f32 1.5, %v164_v53  ;;  %v173_v56 = vadd.f32 1e-06, %v160_v54 }
 0x10f   :  { %v166_v57 = vmul.f32 %v5109_v46, %v165_v55  ;;  %5110 = vrcp.f32 %v173_v56  ;;  %v186_v6 = vand.u32 2147483648, %v173_v56  ;;  %vm180_vm8 = vweird.f32 %v173_v56 }
 0x110   :  { %v184_v7 = vand.u32 2147483647, %v173_v56 }
 0x111   :  { %v167_v58 = vmul.f32 %v166_v57, %v146_v41  ;;  %v187_v13 = vor.u32 1.1754944e-38, %v186_v6 }
 0x112   :  { %vm185_vm10 = vcmp.eq.f32.partialorder %v184_v7, 8.507059e+37 }
 0x113   :  { %v169_v60 = vsel %vm168_vm5, %v146_v41, %v167_v58 }
 0x114   :  { %v172_v61 = vsel %vm170_vm6, %v171_v59, %v169_v60 }
 0x115   :  { %v5111_v62 = vpop.eup %5110  ;;  %v174_v63 = vadd.f32 1e-06, %v172_v61 }
 0x116   :  { %v176_v0 = vmul.f32 %v5111_v62, %v173_v56  ;;  %vm181_vm7 = vweird.f32 %v5111_v62 }
 0x117   :  { %5112 = vrcp.f32 %v174_v63  ;;  %vm182_vm9 = vmor %vm180_vm8, %vm181_vm7  ;;  %v201_v14 = vand.u32 2147483648, %v174_v63  ;;  %v199_v17 = vand.u32 2147483647, %v174_v63  ;;  %vm195_vm12 = vweird.f32 %v174_v63 }
 0x118   :  { %v177_v1 = vsub.f32 1.0, %v176_v0 }
 0x119   :  { %v202_v22 = vor.u32 1.1754944e-38, %v201_v14  ;;  %vm200_vm14 = vcmp.eq.f32.partialorder %v199_v17, 8.507059e+37 }
 0x11a   :  { %v178_v2 = vmul.f32 %v5111_v62, %v177_v1 }
 0x11c   :  { %v179_v3 = vadd.f32 %v5111_v62, %v178_v2 }
 0x11d   :  { %v5113_v5 = vpop.eup %5112 }
 0x11e   :  { %v191_v9 = vmul.f32 %v5113_v5, %v174_v63  ;;  %v183_v10 = vsel %vm182_vm9, %v5111_v62, %v179_v3  ;;  %vm196_vm11 = vweird.f32 %v5113_v5 }
 0x11f   :  { %v188_v18 = vsel %vm185_vm10, %v187_v13, %v183_v10  ;;  %vm197_vm13 = vmor %vm195_vm12, %vm196_vm11 }
 0x120   :  { %v192_v11 = vsub.f32 1.0, %v191_v9  ;;  %v189_v25 = vmul.f32 %v188_v18, %v147_v20 }
 0x122   :  { %v193_v15 = vmul.f32 %v5113_v5, %v192_v11  ;;  %v205_v30 = vadd.f32 %v189_v25, %v111_v27 }
 0x124   :  { %v194_v21 = vadd.f32 %v5113_v5, %v193_v15 }
 0x126   :  { %v198_v26 = vsel %vm197_vm13, %v5113_v5, %v194_v21 }
 0x127   :  { %v203_v28 = vsel %vm200_vm14, %v202_v22, %v198_v26 }
 0x128   :  { %v204_v29 = vmul.f32 %v203_v28, %v148_v23 }
 0x12a   :  { %v206_v31 = vadd.f32 %v204_v29, %v111_v27 }
 0x12c   :  { %v207_v32 = vpack.c.bf16 %v206_v31, %v205_v30 }
 0x12e   :  { %4010 = vmatmul.msk.bf16.vlgmr.msra.gmra.mxu0 %vm112_vm0, %v207_v32 }
 0x1ab   :  { %v227_v34 = vpop.f32.mrf.mxu0 }
 0x1ac   :  { %v5368_v24 = vadd.f32 %v227_v34, %v208_v19 }
 0x1ae   :  { %391 = vrot.lane.b32.xlu0 %v5368_v24, %s5262_s18  ;;  %233 = vrot.lane.b32.xlu2 %v5368_v24, %s5263_s19 }
 0x1b3   :  { %v229_v35 = vpop.f32.mrf.mxu0 }
 0x1b4   :  { %v5374_v36 = vadd.f32 %v229_v35, %v208_v19 }
 0x1b6   :  { %419 = vrot.lane.b32.xlu1 %v5374_v36, %s5262_s18  ;;  %261 = vrot.lane.b32.xlu2 %v5374_v36, %s5263_s19 }
 0x1be   :  { %389 = vrot.lane.b32.xlu2 %v5368_v24, %s5264_s20 }
 0x1c6   :  { %417 = vrot.lane.b32.xlu2 %v5374_v36, %s5264_s20 }
 0x208   :  { %v234_v37 = vpop.permute.xlu2 %233 }
 0x209   :  { %4011 = vmatpush.xpose.msk.msra.mxu1 %vm235_vm15, %v234_v37 }
 0x20c   :  { %4012 = vmatmul.msk.f32.vlgmr.msra.gmra.mxu1 %vm235_vm15, %v5368_v24 }
 0x210   :  { %v262_v38 = vpop.permute.xlu2 %261 }
 0x211   :  { %4013 = vmatpush.xpose.msk.msra.mxu2 %vm235_vm15, %v262_v38 }
 0x214   :  { %4014 = vmatmul.msk.f32.vlgmr.msra.gmra.mxu2 %vm235_vm15, %v5374_v36 }
 0x218   :  { %v390_v40 = vpop.permute.xlu2 %389 }
 0x220   :  { %v392_v39 = vpop.permute.xlu0 %391  ;;  %v418_v42 = vpop.permute.xlu2 %417 }
 0x221   :  { %4017 = vmatpush.xpose.msk.msrb.mxu1 %vm235_vm15, %v392_v39 }
 0x224   :  { %4018 = vmatmul.msk.f32.vlgmr.msrb.gmra.mxu1 %vm235_vm15, %v390_v40 }
 0x228   :  { %v420_v41 = vpop.permute.xlu1 %419 }
 0x229   :  { %4019 = vmatpush.xpose.msk.msrb.mxu2 %vm235_vm15, %v420_v41 }
 0x22c   :  { %4020 = vmatmul.msk.f32.vlgmr.msrb.gmra.mxu2 %vm235_vm15, %v418_v42 }
 0x289   :  { %v257_v43 = vpop.f32.mrf.mxu1 }
 0x28a   :  { %v287_v44 = vmul.f32 0.35355338, %v257_v43 }
 0x28c   :  { %v289_v45 = vsel %vm235_vm15, %v287_v44, -inf }
 0x28d   :  { %290 = vmax.xlane.f32.xlu2 %v289_v45 }
 0x297   :  { %v284_v46 = vpop.f32.mrf.mxu2 }
 0x298   :  { %v288_v47 = vmul.f32 0.35355338, %v284_v46 }
 0x29a   :  { %v292_v48 = vsel %vm235_vm15, %v288_v47, -inf }
 0x29b   :  { %293 = vmax.xlane.f32.xlu0 %v292_v48 }
 0x2a1   :  { %v414_v49 = vpop.f32.mrf.mxu1 }
 0x2a2   :  { %v445_v50 = vmul.f32 0.35355338, %v414_v49 }
 0x2a4   :  { %v447_v51 = vsel %vm235_vm15, %v445_v50, -inf }
 0x2a5   :  { %448 = vmax.xlane.f32.xlu1 %v447_v51 }
 0x2af   :  { %337 = vrot.lane.b32.xlu0 %v5368_v24, %s5265_s21  ;;  %v442_v52 = vpop.f32.mrf.mxu2 }
 0x2b0   :  { %v446_v53 = vmul.f32 0.35355338, %v442_v52 }
 0x2b2   :  { %v450_v54 = vsel %vm235_vm15, %v446_v53, -inf }
 0x2b3   :  { %451 = vmax.xlane.f32.xlu2 %v450_v54 }
 0x300   :  { %v291_v55 = vpop.xlane.xlu2 %290 }
 0x301   :  { %v295_v56 = vsub.f32 %v287_v44, %v291_v55 }
 0x303   :  { %v297_v57 = vmul.f32 1.442695, %v295_v56 }
 0x305   :  { %5114 = vpow2.f32 %v297_v57 }
 0x30b   :  { %v5115_v58 = vpop.eup %5114 }
 0x30c   :  { %v301_v59 = vsel %vm235_vm15, %v5115_v58, 0.0 }
 0x30d   :  { %302 = vadd.xlane.f32.xlu0 %v301_v59 }
 0x30e   :  { %v294_v60 = vpop.xlane.xlu0 %293 }
 0x30f   :  { %v296_v61 = vsub.f32 %v288_v47, %v294_v60 }
 0x311   :  { %v299_v62 = vmul.f32 1.442695, %v296_v61 }
 0x313   :  { %5116 = vpow2.f32 %v299_v62 }
 0x318   :  { %v449_v63 = vpop.xlane.xlu1 %448 }
 0x319   :  { %v5401_v0 = vpop.eup %5116  ;;  %v453_v1 = vsub.f32 %v445_v50, %v449_v63 }
 0x31a   :  { %v304_v2 = vsel %vm235_vm15, %v5401_v0, 0.0 }
 0x31b   :  { %v455_v3 = vmul.f32 1.442695, %v453_v1  ;;  %305 = vadd.xlane.f32.xlu2 %v304_v2 }
 0x31d   :  { %5118 = vpow2.f32 %v455_v3 }
 0x321   :  { %v338_v5 = vpop.permute.xlu0 %337  ;;  %521 = vrot.lane.b32.xlu0 %v5374_v36, %s5266_s22 }
 0x322   :  { %358 = vmatpush.msra.mxu3 %v338_v5 }
 0x323   :  { %v5407_v6 = vpop.eup %5118 }
 0x324   :  { %v459_v7 = vsel %vm235_vm15, %v5407_v6, 0.0 }
 0x325   :  { %460 = vadd.xlane.f32.xlu1 %v459_v7 }
 0x326   :  { %v452_v9 = vpop.xlane.xlu2 %451 }
 0x327   :  { %v454_v10 = vsub.f32 %v446_v53, %v452_v9 }
 0x329   :  { %v457_v11 = vmul.f32 1.442695, %v454_v10 }
 0x32b   :  { %5120 = vpow2.f32 %v457_v11  ;;  %v4910_v11 = vld [vmem:[%s6514_s3 + $0x4] sm:$0xf] }
 0x331   :  { %v5411_v12 = vpop.eup %5120 }
 0x332   :  { %v462_v13 = vsel %vm235_vm15, %v5411_v12, 0.0 }
 0x333   :  { %463 = vadd.xlane.f32.xlu2 %v462_v13 }
 0x33e   :  { %363 = vrot.lane.b32.xlu1 %v5374_v36, %s5265_s21 }
 0x34b   :  { %495 = vrot.lane.b32.xlu2 %v5368_v24, %s5266_s22 }
 0x380   :  { %v303_v14 = vpop.xlane.xlu0 %302 }
 0x381   :  { %5122 = vrcp.f32 %v303_v14  ;;  %v318_v20 = vand.u32 2147483648, %v303_v14  ;;  %v316_v22 = vand.u32 2147483647, %v303_v14  ;;  %vm312_vm2 = vweird.f32 %v303_v14 }
 0x383   :  { %v319_v26 = vor.u32 1.1754944e-38, %v318_v20  ;;  %vm317_vm4 = vcmp.eq.f32.partialorder %v316_v22, 8.507059e+37 }
 0x387   :  { %v5123_v15 = vpop.eup %5122 }
 0x388   :  { %v308_v17 = vmul.f32 %v5123_v15, %v303_v14  ;;  %vm313_vm1 = vweird.f32 %v5123_v15 }
 0x389   :  { %vm314_vm3 = vmor %vm312_vm2, %vm313_vm1 }
 0x38a   :  { %v309_v18 = vsub.f32 1.0, %v308_v17 }
 0x38c   :  { %v310_v21 = vmul.f32 %v5123_v15, %v309_v18 }
 0x38e   :  { %v306_v23 = vpop.xlane.xlu2 %305  ;;  %v311_v25 = vadd.f32 %v5123_v15, %v310_v21  ;;  %v558_v21 = vld [vmem:[%s6517_s6 + $0x3] ss:$0 sm:$0xff] }
 0x38f   :  { %5124 = vrcp.f32 %v306_v23  ;;  %v333_v40 = vand.u32 2147483648, %v306_v23  ;;  %vm327_vm6 = vweird.f32 %v306_v23  ;;  %v331_v41 = vand.u32 2147483647, %v306_v23 }
 0x390   :  { %v315_v27 = vsel %vm314_vm3, %v5123_v15, %v311_v25 }
 0x391   :  { %v320_v28 = vsel %vm317_vm4, %v319_v26, %v315_v27  ;;  %v334_v44 = vor.u32 1.1754944e-38, %v333_v40  ;;  %vm332_vm8 = vcmp.eq.f32.partialorder %v331_v41, 8.507059e+37  ;;  %v4031_v40 = vld [vmem:[%s6514_s3 + $0x8] sm:$0xf]  ;;  %v4914_v41 = vld [vmem:[%s6514_s3 + $0x1c] sm:$0xf0] }
 0x392   :  { %v321_v29 = vmul.f32 %v5115_v58, %v320_v28 }
 0x393   :  { %v522_v30 = vpop.permute.xlu0 %521 }
 0x394   :  { %4015 = vmatmul.msk.f32.vlgmr.msra.gmra.mxu3 %vm235_vm15, %v321_v29  ;;  %542 = vmatpush.msrb.mxu0 %v522_v30 }
 0x395   :  { %v5125_v31 = vpop.eup %5124 }
 0x396   :  { %v323_v19 = vmul.f32 %v5125_v31, %v306_v23  ;;  %vm328_vm5 = vweird.f32 %v5125_v31 }
 0x397   :  { %vm329_vm7 = vmor %vm327_vm6, %vm328_vm5 }
 0x398   :  { %v461_v32 = vpop.xlane.xlu1 %460  ;;  %v324_v34 = vsub.f32 1.0, %v323_v19 }
 0x399   :  { %5126 = vrcp.f32 %v461_v32  ;;  %v476_v49 = vand.u32 2147483648, %v461_v32  ;;  %vm470_vm10 = vweird.f32 %v461_v32  ;;  %v474_v50 = vand.u32 2147483647, %v461_v32 }
 0x39a   :  { %v325_v35 = vmul.f32 %v5125_v31, %v324_v34 }
 0x39b   :  { %v477_v59 = vor.u32 1.1754944e-38, %v476_v49  ;;  %vm475_vm13 = vcmp.eq.f32.partialorder %v474_v50, 8.507059e+37  ;;  %v4041_v50 = vld [vmem:[%s6514_s3 + $0x28] sm:$0xf0] }
 0x39c   :  { %v326_v37 = vadd.f32 %v5125_v31, %v325_v35 }
 0x39e   :  { %v330_v43 = vsel %vm329_vm7, %v5125_v31, %v326_v37 }
 0x39f   :  { %v5127_v24 = vpop.eup %5126  ;;  %v335_v46 = vsel %vm332_vm8, %v334_v44, %v330_v43  ;;  %v4033_v43 = vld [vmem:[%s6514_s3 + $0x20] sm:$0xf0]  ;;  %v4032_v44 = vor.u32 %v4914_v41, %v4031_v40 }
 0x3a0   :  { %v466_v36 = vmul.f32 %v5127_v24, %v461_v32  ;;  %vm471_vm9 = vweird.f32 %v5127_v24  ;;  %v336_v53 = vmul.f32 %v5401_v0, %v335_v46  ;;  %v4039_v46 = vld [vmem:[%s6514_s3 + $0x10] sm:$0xf] }
 0x3a1   :  { %vm472_vm11 = vmor %vm470_vm10, %vm471_vm9  ;;  %706 = vmatpush.bf16.msra.mxu2 %v4032_v44 }
 0x3a2   :  { %v467_v38 = vsub.f32 1.0, %v466_v36 }
 0x3a4   :  { %v468_v42 = vmul.f32 %v5127_v24, %v467_v38 }
 0x3a6   :  { %v464_v39 = vpop.xlane.xlu2 %463  ;;  %v469_v47 = vadd.f32 %v5127_v24, %v468_v42  ;;  %v4911_v42 = vld [vmem:[%s6514_s3 + $0xc] sm:$0xf] }
 0x3a7   :  { %5128 = vrcp.f32 %v464_v39  ;;  %v491_v54 = vand.u32 2147483648, %v464_v39  ;;  %v489_v57 = vand.u32 2147483647, %v464_v39  ;;  %vm485_vm14 = vweird.f32 %v464_v39 }
 0x3a8   :  { %v473_v55 = vsel %vm472_vm11, %v5127_v24, %v469_v47  ;;  %v4915_v47 = vld [vmem:[%s6514_s3 + $0x24] sm:$0xf0] }
 0x3a9   :  { %v478_v61 = vsel %vm475_vm13, %v477_v59, %v473_v55  ;;  %v492_v62 = vor.u32 1.1754944e-38, %v491_v54  ;;  %vm490_vm2 = vcmp.eq.f32.partialorder %v489_v57, 8.507059e+37  ;;  %v4040_v49 = vor.u32 %v4915_v47, %v4039_v46 }
 0x3aa   :  { %v479_v1 = vmul.f32 %v5407_v6, %v478_v61  ;;  %v4023_v6 = vld [vmem:[%s6514_s3 + $0x18] sm:$0xf0] }
 0x3ab   :  { %734 = vmatpush.bf16.msra.mxu0 %v4040_v49 }
 0x3ad   :  { %v5129_v45 = vpop.eup %5128 }
 0x3ae   :  { %v481_v48 = vmul.f32 %v5129_v45, %v464_v39  ;;  %vm486_vm12 = vweird.f32 %v5129_v45  ;;  %v496_v58 = vpop.permute.xlu2 %495 }
 0x3af   :  { %vm487_vm1 = vmor %vm485_vm14, %vm486_vm12 }
 0x3b0   :  { %v482_v51 = vsub.f32 1.0, %v481_v48  ;;  %v364_v52 = vpop.permute.xlu1 %363  ;;  %v4912_v48 = vld [vmem:[%s6514_s3 + $0x14] sm:$0xf] }
 0x3b1   :  { %384 = vmatpush.msrb.mxu3 %v364_v52 }
 0x3b2   :  { %v483_v56 = vmul.f32 %v5129_v45, %v482_v51  ;;  %4016 = vmatmul.msk.f32.vlgmr.msrb.gmra.mxu3 %vm235_vm15, %v336_v53  ;;  %v4044_v51 = vor.u32 %v4912_v48, %v4041_v50 }
 0x3b3   :  { %516 = vmatpush.msra.mxu3 %v496_v58 }
 0x3b4   :  { %v484_v60 = vadd.f32 %v5129_v45, %v483_v56 }
 0x3b6   :  { %v488_v63 = vsel %vm487_vm1, %v5129_v45, %v484_v60  ;;  %v4036_v45 = vor.u32 %v4911_v42, %v4033_v43  ;;  %v582_v43 = vld [vmem:[%s6517_s6 + $0x4] ss:$0 sm:$0xff] }
 0x3b7   :  { %v493_v0 = vsel %vm490_vm2, %v492_v62, %v488_v63 }
 0x3b8   :  { %v494_v2 = vmul.f32 %v5411_v12, %v493_v0  ;;  %v4026_v12 = vor.u32 %v4910_v11, %v4023_v6  ;;  %720 = vmatpush.bf16.msrb.mxu3 %v4036_v45  ;;  %v4947_v11 = vld [vmem:[%s6515_s4 + $0xf8] sm:$0xff] }
 0x3b9   :  { %v4923_v6 = vld [vmem:[%s6515_s4 + $0x38] sm:$0xff] }
 0x3ba   :  { %4021 = vmatmul.msk.f32.vlgmr.msra.gmra.mxu3 %vm235_vm15, %v479_v1  ;;  %4022 = vmatmul.msk.f32.vlgmr.msrb.gmra.mxu0 %vm235_vm15, %v494_v2 }
 0x3bb   :  { %573 = vmatpush.bf16.msra.mxu1 %v4026_v12  ;;  %v4931_v12 = vld [vmem:[%s6515_s4 + $0x78] sm:$0xff]  ;;  %960 = vmatpush.bf16.msrb.mxu2 %v4923_v6  ;;  %v4917_v6 = vld [vmem:[%s6515_s4 + $0x8] sm:$0xff] }
 0x3bc   :  { %974 = vmatpush.bf16.msra.mxu3 %v4931_v12  ;;  %v4925_v12 = vld [vmem:[%s6515_s4 + $0x48] sm:$0xff] }
 0x3bf   :  { %748 = vmatpush.bf16.msrb.mxu1 %v4044_v51 }
 0x417   :  { %v360_v3 = vpop.f32.mrf.mxu3 }
 0x435   :  { %v386_v5 = vpop.f32.mrf.mxu3 }
 0x437   :  { %v544_v7 = vpop.f32.mrf.mxu0 }
 0x43d   :  { %v518_v9 = vpop.f32.mrf.mxu3 }
 0x43e   :  { %v5072_v10 = vpack.i.bf16 %v544_v7, %v518_v9 }
 0x440   :  { %5073 = vrot.lane.b32.xlu0 %v5072_v10, %s5267_s23  ;;  %v4939_v10 = vld [vmem:[%s6515_s4 + $0xb8] sm:$0xff] }
 0x441   :  { %988 = vmatpush.bf16.msrb.mxu0 %v4939_v10  ;;  %v4932_v10 = vld [vmem:[%s6515_s4 + $0x80] sm:$0xff] }
 0x4b2   :  { %v5074_v13 = vpop.permute.xlu0 %5073 }
 0x4b3   :  { %v5076_v14 = vunpack.i.h.bf16 %v5074_v13  ;;  %v5075_v15 = vunpack.i.l.bf16 %v5074_v13 }
 0x4b5   :  { %v556_v17 = vsel %vm235_vm15, %v386_v5, %v5076_v14  ;;  %v555_v18 = vsel %vm235_vm15, %v360_v3, %v5075_v15  ;;  %v4938_v14 = vld [vmem:[%s6515_s4 + $0xb0] sm:$0xff] }
 0x4b6   :  { %v557_v20 = vpack.c.bf16 %v556_v17, %v555_v18  ;;  %v4946_v15 = vld [vmem:[%s6515_s4 + $0xf0] sm:$0xff]  ;;  %989 = vmatpush.bf16.msrb.mxu0 %v4938_v14  ;;  %v4924_v14 = vld [vmem:[%s6515_s4 + $0x40] sm:$0xff] }
 0x4b7   :  { %v4922_v18 = vld [vmem:[%s6515_s4 + $0x30] sm:$0xff] }
 0x4b8   :  { %4027 = vmatmul.msk.bf16.vlgmr.msra.gmra.mxu1 %vm112_vm0, %v557_v20  ;;  %v4930_v20 = vld [vmem:[%s6515_s4 + $0x70] sm:$0xff]  ;;  %961 = vmatpush.bf16.msrb.mxu2 %v4922_v18 }
 0x4b9   :  { %1002 = vmatpush.bf16.msra.mxu1 %v4947_v11  ;;  %975 = vmatpush.bf16.msra.mxu3 %v4930_v20  ;;  %v4940_v11 = vld [vmem:[%s6515_s4 + $0xc0] sm:$0xff] }
 0x4bd   :  { %1003 = vmatpush.bf16.msra.mxu1 %v4946_v15  ;;  %v4028_v15 = vld [vmem:[%s6517_s6 + $0x6] ss:$8 sm:$0xf] }
 0x4be   :  { %v670_v20 = vperm.slane %v4028_v15, 2 }
 0x535   :  { %v575_v22 = vpop.f32.mrf.mxu1 }
 0x536   :  { %v576_v23 = vadd.f32 %v575_v22, %v558_v21 }
 0x538   :  { %v5440_v25 = vadd.f32 %v576_v23, %v5319_v4 }
 0x53a   :  { %v584_v26 = vsel %vm112_vm0, %v5440_v25, 0.0 }
 0x53b   :  { %585 = vadd.xlane.f32.xlu1 %v584_v26 }
 0x53d   :  { %v577_v27 = vpop.f32.mrf.mxu1 }
 0x53e   :  { %v578_v28 = vadd.f32 %v577_v27, %v558_v21  ;;  %v4937_v27 = vld [vmem:[%s6515_s4 + $0xa8] sm:$0xff] }
 0x53f   :  { %990 = vmatpush.bf16.msrb.mxu0 %v4937_v27 }
 0x540   :  { %v5445_v29 = vadd.f32 %v578_v28, %v5326_v8  ;;  %v4945_v28 = vld [vmem:[%s6515_s4 + $0xe8] sm:$0xff] }
 0x541   :  { %1004 = vmatpush.bf16.msra.mxu1 %v4945_v28  ;;  %v668_v28 = vperm.slane %v4028_v15, 0 }
 0x542   :  { %v587_v30 = vsel %vm112_vm0, %v5445_v29, 0.0 }
 0x543   :  { %588 = vadd.xlane.f32.xlu2 %v587_v30 }
 0x5ae   :  { %v586_v31 = vpop.xlane.xlu1 %585 }
 0x5af   :  { %v590_v32 = vmul.f32 %v586_v31, %v5330_v16  ;;  %v4921_v31 = vld [vmem:[%s6515_s4 + $0x28] sm:$0xff] }
 0x5b0   :  { %962 = vmatpush.bf16.msrb.mxu2 %v4921_v31 }
 0x5b1   :  { %v5451_v19 = vsub.f32 %v5440_v25, %v590_v32  ;;  %v4929_v32 = vld [vmem:[%s6515_s4 + $0x68] sm:$0xff] }
 0x5b2   :  { %976 = vmatpush.bf16.msra.mxu3 %v4929_v32 }
 0x5b3   :  { %v594_v4 = vmul.f32 %v5451_v19, %v5451_v19  ;;  %v604_v49 = vmul.f32 %v5451_v19, %v582_v43  ;;  %v4935_v19 = vld [vmem:[%s6515_s4 + $0x98] sm:$0xff] }
 0x5b5   :  { %v596_v34 = vsel %vm112_vm0, %v594_v4, 0.0 }
 0x5b6   :  { %v589_v24 = vpop.xlane.xlu2 %588  ;;  %597 = vadd.xlane.f32.xlu0 %v596_v34  ;;  %v4936_v34 = vld [vmem:[%s6515_s4 + $0xa0] sm:$0xff] }
 0x5b7   :  { %v591_v8 = vmul.f32 %v589_v24, %v5330_v16  ;;  %v4944_v24 = vld [vmem:[%s6515_s4 + $0xe0] sm:$0xff]  ;;  %991 = vmatpush.bf16.msrb.mxu0 %v4936_v34 }
 0x5b8   :  { %1005 = vmatpush.bf16.msra.mxu1 %v4944_v24 }
 0x5b9   :  { %v5458_v35 = vsub.f32 %v5445_v29, %v591_v8 }
 0x5bb   :  { %v595_v36 = vmul.f32 %v5458_v35, %v5458_v35  ;;  %992 = vmatpush.bf16.msrb.mxu0 %v4935_v19 }
 0x5bd   :  { %v599_v37 = vsel %vm112_vm0, %v595_v36, 0.0 }
 0x5be   :  { %600 = vadd.xlane.f32.xlu1 %v599_v37 }
 0x629   :  { %v598_v38 = vpop.xlane.xlu0 %597 }
 0x62a   :  { %v602_v39 = vmul.f32 %v598_v38, %v5346_v33 }
 0x62c   :  { %5130 = vrsqrt.f32 %v602_v39  ;;  %vm613_vm3 = vcmp.eq.f32.partialorder %v602_v39, inf  ;;  %v616_v0 = vand.u32 2147483648, %v602_v39  ;;  %vm615_vm4 = vcmp.eq.f32.partialorder %v602_v39, 0.0 }
 0x631   :  { %v601_v52 = vpop.xlane.xlu1 %600 }
 0x632   :  { %v5131_v53 = vpop.eup %5130  ;;  %v603_v54 = vmul.f32 %v601_v52, %v5346_v33  ;;  %v605_v52 = vmul.f32 %v5458_v35, %v582_v43  ;;  %v4943_v35 = vld [vmem:[%s6515_s4 + $0xd8] sm:$0xff] }
 0x633   :  { %v607_v55 = vmul.f32 %v5131_v53, %v602_v39  ;;  %1006 = vmatpush.bf16.msra.mxu1 %v4943_v35 }
 0x634   :  { %5132 = vrsqrt.f32 %v603_v54  ;;  %vm625_vm5 = vcmp.eq.f32.partialorder %v603_v54, inf  ;;  %v628_v17 = vand.u32 2147483648, %v603_v54  ;;  %vm627_vm6 = vcmp.eq.f32.partialorder %v603_v54, 0.0 }
 0x635   :  { %v608_v56 = vmul.f32 %v5131_v53, %v607_v55  ;;  %v583_v55 = vld [vmem:[%s6517_s6 + $0x5] ss:$0 sm:$0xff] }
 0x637   :  { %v609_v57 = vmul.f32 0.5, %v608_v56 }
 0x639   :  { %v610_v58 = vsub.f32 1.5, %v609_v57 }
 0x63a   :  { %v5133_v59 = vpop.eup %5132 }
 0x63b   :  { %v611_v60 = vmul.f32 %v5131_v53, %v610_v58  ;;  %v619_v61 = vmul.f32 %v5133_v59, %v603_v54 }
 0x63d   :  { %v612_v62 = vmul.f32 %v611_v60, %v602_v39  ;;  %v620_v63 = vmul.f32 %v5133_v59, %v619_v61  ;;  %v4920_v61 = vld [vmem:[%s6515_s4 + $0x20] sm:$0xff] }
 0x63e   :  { %963 = vmatpush.bf16.msrb.mxu2 %v4920_v61 }
 0x63f   :  { %v614_v1 = vsel %vm613_vm3, %v602_v39, %v612_v62  ;;  %v621_v2 = vmul.f32 0.5, %v620_v63  ;;  %v4928_v62 = vld [vmem:[%s6515_s4 + $0x60] sm:$0xff]  ;;  %v4934_v63 = vld [vmem:[%s6515_s4 + $0x90] sm:$0xff] }
 0x640   :  { %v617_v3 = vsel %vm615_vm4, %v616_v0, %v614_v1  ;;  %977 = vmatpush.bf16.msra.mxu3 %v4928_v62  ;;  %v4942_v0 = vld [vmem:[%s6515_s4 + $0xd0] sm:$0xff]  ;;  %993 = vmatpush.bf16.msrb.mxu0 %v4934_v63  ;;  %v4919_v1 = vld [vmem:[%s6515_s4 + $0x18] sm:$0xff] }
 0x641   :  { %v630_v5 = vadd.f32 1e-06, %v617_v3  ;;  %v622_v7 = vsub.f32 1.5, %v621_v2  ;;  %1007 = vmatpush.bf16.msra.mxu1 %v4942_v0  ;;  %v4927_v2 = vld [vmem:[%s6515_s4 + $0x58] sm:$0xff]  ;;  %v4933_v3 = vld [vmem:[%s6515_s4 + $0x88] sm:$0xff] }
 0x642   :  { %964 = vmatpush.bf16.msrb.mxu2 %v4919_v1 }
 0x643   :  { %5134 = vrcp.f32 %v630_v5  ;;  %v623_v9 = vmul.f32 %v5133_v59, %v622_v7  ;;  %v643_v38 = vand.u32 2147483648, %v630_v5  ;;  %vm637_vm8 = vweird.f32 %v630_v5  ;;  %v4918_v7 = vld [vmem:[%s6515_s4 + $0x10] sm:$0xff] }
 0x644   :  { %v641_v39 = vand.u32 2147483647, %v630_v5  ;;  %978 = vmatpush.bf16.msra.mxu3 %v4927_v2  ;;  %994 = vmatpush.bf16.msrb.mxu0 %v4933_v3 }
 0x645   :  { %v624_v13 = vmul.f32 %v623_v9, %v603_v54  ;;  %v644_v44 = vor.u32 1.1754944e-38, %v643_v38  ;;  %v4926_v9 = vld [vmem:[%s6515_s4 + $0x50] sm:$0xff] }
 0x646   :  { %vm642_vm10 = vcmp.eq.f32.partialorder %v641_v39, 8.507059e+37  ;;  %965 = vmatpush.bf16.msrb.mxu2 %v4918_v7 }
 0x647   :  { %v626_v21 = vsel %vm625_vm5, %v603_v54, %v624_v13  ;;  %v4916_v13 = vld [vmem:[%s6515_s4] sm:$0xff] }
 0x648   :  { %v629_v22 = vsel %vm627_vm6, %v628_v17, %v626_v21  ;;  %979 = vmatpush.bf16.msra.mxu3 %v4926_v9  ;;  %995 = vmatpush.bf16.msrb.mxu0 %v4932_v10  ;;  %v671_v21 = vperm.slane %v4028_v15, 3 }
 0x649   :  { %v5135_v23 = vpop.eup %5134  ;;  %v631_v26 = vadd.f32 1e-06, %v629_v22 }
 0x64a   :  { %v633_v30 = vmul.f32 %v5135_v23, %v630_v5  ;;  %vm638_vm7 = vweird.f32 %v5135_v23  ;;  %v4941_v5 = vld [vmem:[%s6515_s4 + $0xc8] sm:$0xff]  ;;  %966 = vmatpush.bf16.msrb.mxu2 %v4917_v6 }
 0x64b   :  { %5136 = vrcp.f32 %v631_v26  ;;  %vm639_vm9 = vmor %vm637_vm8, %vm638_vm7  ;;  %v658_v45 = vand.u32 2147483648, %v631_v26  ;;  %v656_v47 = vand.u32 2147483647, %v631_v26  ;;  %vm652_vm12 = vweird.f32 %v631_v26  ;;  %1008 = vmatpush.bf16.msra.mxu1 %v4941_v5 }
 0x64c   :  { %v634_v4 = vsub.f32 1.0, %v633_v30  ;;  %980 = vmatpush.bf16.msra.mxu3 %v4925_v12  ;;  %v669_v30 = vperm.slane %v4028_v15, 1 }
 0x64d   :  { %v659_v51 = vor.u32 1.1754944e-38, %v658_v45  ;;  %vm657_vm14 = vcmp.eq.f32.partialorder %v656_v47, 8.507059e+37 }
 0x64e   :  { %v635_v8 = vmul.f32 %v5135_v23, %v634_v4  ;;  %967 = vmatpush.bf16.msrb.mxu2 %v4916_v13 }
 0x64f   :  { %1009 = vmatpush.bf16.msra.mxu1 %v4940_v11 }
 0x650   :  { %v636_v36 = vadd.f32 %v5135_v23, %v635_v8  ;;  %981 = vmatpush.bf16.msra.mxu3 %v4924_v14 }
 0x651   :  { %v5137_v37 = vpop.eup %5136 }
 0x652   :  { %v648_v40 = vmul.f32 %v5137_v37, %v631_v26  ;;  %v640_v41 = vsel %vm639_vm9, %v5135_v23, %v636_v36  ;;  %vm653_vm11 = vweird.f32 %v5137_v37 }
 0x653   :  { %v645_v48 = vsel %vm642_vm10, %v644_v44, %v640_v41  ;;  %vm654_vm13 = vmor %vm652_vm12, %vm653_vm11 }
 0x654   :  { %v649_v42 = vsub.f32 1.0, %v648_v40  ;;  %v646_v53 = vmul.f32 %v645_v48, %v604_v49 }
 0x656   :  { %v650_v46 = vmul.f32 %v5137_v37, %v649_v42  ;;  %v662_v58 = vadd.f32 %v646_v53, %v583_v55 }
 0x658   :  { %v651_v50 = vadd.f32 %v5137_v37, %v650_v46 }
 0x65a   :  { %v655_v54 = vsel %vm654_vm13, %v5137_v37, %v651_v50 }
 0x65b   :  { %v660_v56 = vsel %vm657_vm14, %v659_v51, %v655_v54 }
 0x65c   :  { %v661_v57 = vmul.f32 %v660_v56, %v605_v52  ;;  %v767_v52 = vld [vmem:[%s6517_s6 + $0x7] ss:$0 sm:$0xff] }
 0x65e   :  { %v663_v59 = vadd.f32 %v661_v57, %v583_v55 }
 0x660   :  { %v664_v60 = vpack.c.bf16 %v663_v59, %v662_v58 }
 0x662   :  { %4045 = vmatmul.msk.bf16.vlgmr.msra.gmra.mxu2 %vm112_vm0, %v664_v60  ;;  %4046 = vmatmul.msk.bf16.vlgmr.msrb.gmra.mxu3 %vm112_vm0, %v664_v60 }
 0x663   :  { %4047 = vmatmul.msk.bf16.vlgmr.msra.gmra.mxu0 %vm112_vm0, %v664_v60  ;;  %4048 = vmatmul.msk.bf16.vlgmr.msrb.gmra.mxu1 %vm112_vm0, %v664_v60 }
 0x6e0   :  { %v736_v17 = vpop.f32.mrf.mxu0  ;;  %v750_v18 = vpop.f32.mrf.mxu1 }
 0x6e1   :  { %v737_v26 = vadd.f32 %v736_v17, %v670_v20  ;;  %v751_v27 = vadd.f32 %v750_v18, %v671_v21 }
 0x6e3   :  { %v757_v24 = vmax.f32 %v737_v26, 0.0  ;;  %v758_v8 = vmax.f32 %v751_v27, 0.0 }
 0x6e5   :  { %v708_v22 = vpop.f32.mrf.mxu2  ;;  %v722_v23 = vpop.f32.mrf.mxu3 }
 0x6e6   :  { %v709_v38 = vadd.f32 %v708_v22, %v668_v28  ;;  %v723_v39 = vadd.f32 %v722_v23, %v669_v30  ;;  %v4951_v22 = vld [vmem:[%s6514_s3 + $0x44] sm:$0xf0] }
 0x6e8   :  { %v738_v31 = vpop.f32.mrf.mxu0  ;;  %v752_v32 = vpop.f32.mrf.mxu1  ;;  %v755_v46 = vmax.f32 %v709_v38, 0.0  ;;  %v756_v47 = vmax.f32 %v723_v39, 0.0 }
 0x6e9   :  { %v739_v4 = vadd.f32 %v738_v31, %v670_v20  ;;  %v753_v34 = vadd.f32 %v752_v32, %v671_v21  ;;  %v4249_v21 = vld [vmem:[%s6514_s3 + $0x30] sm:$0xf] }
 0x6ea   :  { %v4250_v23 = vor.u32 %v4951_v22, %v4249_v21 }
 0x6eb   :  { %v761_v36 = vmax.f32 %v739_v4, 0.0  ;;  %v762_v37 = vmax.f32 %v753_v34, 0.0 }
 0x6ec   :  { %1190 = vmatpush.bf16.msra.mxu2 %v4250_v23 }
 0x6ed   :  { %v765_v40 = vpack.c.bf16 %v761_v36, %v757_v24  ;;  %v766_v41 = vpack.c.bf16 %v762_v37, %v758_v8  ;;  %v710_v42 = vpop.f32.mrf.mxu2  ;;  %v724_v43 = vpop.f32.mrf.mxu3 }
 0x6ee   :  { %v711_v44 = vadd.f32 %v710_v42, %v668_v28  ;;  %v725_v45 = vadd.f32 %v724_v43, %v669_v30 }
 0x6ef   :  { %996 = vmatmul.bf16.vlgmr.msrb.gmra.mxu0 %v765_v40  ;;  %1010 = vmatmul.bf16.vlgmr.msra.gmra.mxu1 %v766_v41 }
 0x6f0   :  { %v759_v48 = vmax.f32 %v711_v44, 0.0  ;;  %v760_v49 = vmax.f32 %v725_v45, 0.0 }
 0x6f2   :  { %v763_v50 = vpack.c.bf16 %v759_v48, %v755_v46  ;;  %v764_v51 = vpack.c.bf16 %v760_v49, %v756_v47 }
 0x6f4   :  { %968 = vmatmul.bf16.vlgmr.msrb.gmra.mxu2 %v763_v50  ;;  %982 = vmatmul.bf16.vlgmr.msra.gmra.mxu3 %v764_v51 }
 0x76c   :  { %v997_v56 = vpop.f32.mrf.mxu0  ;;  %v1011_v58 = vpop.f32.mrf.mxu1 }
 0x774   :  { %v999_v1 = vpop.f32.mrf.mxu0  ;;  %v1013_v3 = vpop.f32.mrf.mxu1 }
 0x777   :  { %v969_v53 = vpop.f32.mrf.mxu2  ;;  %v983_v54 = vpop.f32.mrf.mxu3 }
 0x778   :  { %v970_v55 = vadd.f32 %v969_v53, %v767_v52 }
 0x77a   :  { %v984_v57 = vadd.f32 %v983_v54, %v970_v55 }
 0x77c   :  { %v998_v59 = vadd.f32 %v997_v56, %v984_v57 }
 0x77e   :  { %v1012_v60 = vadd.f32 %v1011_v58, %v998_v59 }
 0x77f   :  { %v971_v19 = vpop.f32.mrf.mxu2  ;;  %v985_v62 = vpop.f32.mrf.mxu3 }
 0x780   :  { %v972_v35 = vadd.f32 %v971_v19, %v767_v52  ;;  %v5604_v61 = vadd.f32 %v1012_v60, %v5440_v25  ;;  %v1090_v19 = vld [vmem:[%s6517_s6 + $0x20] ss:$0 sm:$0xff] }
 0x782   :  { %v986_v63 = vadd.f32 %v985_v62, %v972_v35  ;;  %v1092_v0 = vsel %vm112_vm0, %v5604_v61, 0.0 }
 0x783   :  { %1093 = vadd.xlane.f32.xlu2 %v1092_v0 }
 0x784   :  { %v1000_v2 = vadd.f32 %v999_v1, %v986_v63 }
 0x786   :  { %v1014_v5 = vadd.f32 %v1013_v3, %v1000_v2 }
 0x788   :  { %v5609_v7 = vadd.f32 %v1014_v5, %v5445_v29 }
 0x78a   :  { %v1095_v9 = vsel %vm112_vm0, %v5609_v7, 0.0 }
 0x78b   :  { %1096 = vadd.xlane.f32.xlu0 %v1095_v9 }
 0x7f6   :  { %v1094_v10 = vpop.xlane.xlu2 %1093 }
 0x7f7   :  { %v1098_v25 = vmul.f32 %v1094_v10, %v5330_v16 }
 0x7f9   :  { %v5615_v11 = vsub.f32 %v5604_v61, %v1098_v25 }
 0x7fb   :  { %v1102_v6 = vmul.f32 %v5615_v11, %v5615_v11  ;;  %v1112_v2 = vmul.f32 %v5615_v11, %v1090_v19  ;;  %v1173_v11 = vld [vmem:[%s6517_s6 + $0x22] ss:$0 sm:$0xff] }
 0x7fd   :  { %v1104_v12 = vsel %vm112_vm0, %v1102_v6, 0.0  ;;  %v1091_v6 = vld [vmem:[%s6517_s6 + $0x21] ss:$0 sm:$0xff] }
 0x7fe   :  { %v1097_v13 = vpop.xlane.xlu0 %1096  ;;  %1105 = vadd.xlane.f32.xlu1 %v1104_v12 }
 0x7ff   :  { %v1099_v29 = vmul.f32 %v1097_v13, %v5330_v16 }
 0x801   :  { %v5622_v14 = vsub.f32 %v5609_v7, %v1099_v29 }
 0x803   :  { %v1103_v15 = vmul.f32 %v5622_v14, %v5622_v14  ;;  %v1113_v9 = vmul.f32 %v5622_v14, %v1090_v19 }
 0x805   :  { %v1107_v17 = vsel %vm112_vm0, %v1103_v15, 0.0 }
 0x806   :  { %1108 = vadd.xlane.f32.xlu2 %v1107_v17 }
 0x871   :  { %v1106_v18 = vpop.xlane.xlu1 %1105 }
 0x872   :  { %v1110_v20 = vmul.f32 %v1106_v18, %v5346_v33 }
 0x874   :  { %5138 = vrsqrt.f32 %v1110_v20  ;;  %vm1121_vm1 = vcmp.eq.f32.partialorder %v1110_v20, inf  ;;  %v1124_v38 = vand.u32 2147483648, %v1110_v20  ;;  %vm1123_vm2 = vcmp.eq.f32.partialorder %v1110_v20, 0.0 }
 0x879   :  { %v1109_v26 = vpop.xlane.xlu2 %1108 }
 0x87a   :  { %v5139_v27 = vpop.eup %5138  ;;  %v1111_v28 = vmul.f32 %v1109_v26, %v5346_v33 }
 0x87b   :  { %v1115_v30 = vmul.f32 %v5139_v27, %v1110_v20 }
 0x87c   :  { %5140 = vrsqrt.f32 %v1111_v28  ;;  %vm1133_vm3 = vcmp.eq.f32.partialorder %v1111_v28, inf  ;;  %v1136_v46 = vand.u32 2147483648, %v1111_v28  ;;  %vm1135_vm4 = vcmp.eq.f32.partialorder %v1111_v28, 0.0 }
 0x87d   :  { %v1116_v31 = vmul.f32 %v5139_v27, %v1115_v30 }
 0x87f   :  { %v1117_v32 = vmul.f32 0.5, %v1116_v31 }
 0x881   :  { %v1118_v4 = vsub.f32 1.5, %v1117_v32 }
 0x882   :  { %v5141_v34 = vpop.eup %5140 }
 0x883   :  { %v1119_v24 = vmul.f32 %v5139_v27, %v1118_v4  ;;  %v1127_v8 = vmul.f32 %v5141_v34, %v1111_v28 }
 0x885   :  { %v1120_v36 = vmul.f32 %v1119_v24, %v1110_v20  ;;  %v1128_v37 = vmul.f32 %v5141_v34, %v1127_v8 }
 0x887   :  { %v1122_v39 = vsel %vm1121_vm1, %v1110_v20, %v1120_v36  ;;  %v1129_v40 = vmul.f32 0.5, %v1128_v37 }
 0x888   :  { %v1125_v41 = vsel %vm1123_vm2, %v1124_v38, %v1122_v39 }
 0x889   :  { %v1138_v42 = vadd.f32 1e-06, %v1125_v41  ;;  %v1130_v43 = vsub.f32 1.5, %v1129_v40 }
 0x88b   :  { %5142 = vrcp.f32 %v1138_v42  ;;  %v1131_v44 = vmul.f32 %v5141_v34, %v1130_v43  ;;  %v1151_v56 = vand.u32 2147483648, %v1138_v42  ;;  %vm1145_vm6 = vweird.f32 %v1138_v42 }
 0x88c   :  { %v1149_v57 = vand.u32 2147483647, %v1138_v42 }
 0x88d   :  { %v1132_v45 = vmul.f32 %v1131_v44, %v1111_v28  ;;  %v1152_v35 = vor.u32 1.1754944e-38, %v1151_v56 }
 0x88e   :  { %vm1150_vm8 = vcmp.eq.f32.partialorder %v1149_v57, 8.507059e+37 }
 0x88f   :  { %v1134_v47 = vsel %vm1133_vm3, %v1111_v28, %v1132_v45 }
 0x890   :  { %v1137_v48 = vsel %vm1135_vm4, %v1136_v46, %v1134_v47 }
 0x891   :  { %v5143_v49 = vpop.eup %5142  ;;  %v1139_v50 = vadd.f32 1e-06, %v1137_v48 }
 0x892   :  { %v1141_v51 = vmul.f32 %v5143_v49, %v1138_v42  ;;  %vm1146_vm5 = vweird.f32 %v5143_v49 }
 0x893   :  { %5144 = vrcp.f32 %v1139_v50  ;;  %vm1147_vm7 = vmor %vm1145_vm6, %vm1146_vm5  ;;  %v1166_v62 = vand.u32 2147483648, %v1139_v50  ;;  %v1164_v0 = vand.u32 2147483647, %v1139_v50  ;;  %vm1160_vm10 = vweird.f32 %v1139_v50 }
 0x894   :  { %v1142_v52 = vsub.f32 1.0, %v1141_v51 }
 0x895   :  { %v1167_v5 = vor.u32 1.1754944e-38, %v1166_v62  ;;  %vm1165_vm12 = vcmp.eq.f32.partialorder %v1164_v0, 8.507059e+37 }
 0x896   :  { %v1143_v53 = vmul.f32 %v5143_v49, %v1142_v52 }
 0x898   :  { %v1144_v54 = vadd.f32 %v5143_v49, %v1143_v53 }
 0x899   :  { %v5145_v55 = vpop.eup %5144 }
 0x89a   :  { %v1156_v58 = vmul.f32 %v5145_v55, %v1139_v50  ;;  %v1148_v59 = vsel %vm1147_vm7, %v5143_v49, %v1144_v54  ;;  %vm1161_vm9 = vweird.f32 %v5145_v55 }
 0x89b   :  { %v1153_v1 = vsel %vm1150_vm8, %v1152_v35, %v1148_v59  ;;  %vm1162_vm11 = vmor %vm1160_vm10, %vm1161_vm9 }
 0x89c   :  { %v1157_v60 = vsub.f32 1.0, %v1156_v58  ;;  %v1154_v10 = vmul.f32 %v1153_v1, %v1112_v2 }
 0x89e   :  { %v1158_v63 = vmul.f32 %v5145_v55, %v1157_v60  ;;  %v1170_v29 = vadd.f32 %v1154_v10, %v1091_v6 }
 0x8a0   :  { %v1159_v3 = vadd.f32 %v5145_v55, %v1158_v63 }
 0x8a2   :  { %v1163_v25 = vsel %vm1162_vm11, %v5145_v55, %v1159_v3 }
 0x8a3   :  { %v1168_v12 = vsel %vm1165_vm12, %v1167_v5, %v1163_v25 }
 0x8a4   :  { %v1169_v13 = vmul.f32 %v1168_v12, %v1113_v9 }
 0x8a6   :  { %v1171_v15 = vadd.f32 %v1169_v13, %v1091_v6 }
 0x8a8   :  { %v1172_v17 = vpack.c.bf16 %v1171_v15, %v1170_v29 }
 0x8aa   :  { %4251 = vmatmul.msk.bf16.vlgmr.msra.gmra.mxu2 %vm112_vm0, %v1172_v17 }
 0x92d   :  { %v1192_v18 = vpop.f32.mrf.mxu2 }
 0x92e   :  { %v5647_v14 = vadd.f32 %v1192_v18, %v1173_v11 }
 0x930   :  { %1355 = vrot.lane.b32.xlu2 %v5647_v14, %s5262_s18  ;;  %1198 = vrot.lane.b32.xlu0 %v5647_v14, %s5263_s19 }
 0x935   :  { %v1194_v20 = vpop.f32.mrf.mxu2 }
 0x936   :  { %v5653_v21 = vadd.f32 %v1194_v20, %v1173_v11 }
 0x938   :  { %1225 = vrot.lane.b32.xlu1 %v5653_v21, %s5263_s19  ;;  %1383 = vrot.lane.b32.xlu0 %v5653_v21, %s5262_s18 }
 0x940   :  { %1353 = vrot.lane.b32.xlu1 %v5647_v14, %s5264_s20  ;;  %1381 = vrot.lane.b32.xlu0 %v5653_v21, %s5264_s20 }
 0x98a   :  { %v1356_v22 = vpop.permute.xlu2 %1355 }
 0x98b   :  { %4258 = vmatpush.xpose.msk.msrb.mxu1 %vm235_vm15, %v1356_v22 }
 0x9a2   :  { %v1199_v23 = vpop.permute.xlu0 %1198 }
 0x9a3   :  { %4252 = vmatpush.xpose.msk.msrb.mxu3 %vm235_vm15, %v1199_v23 }
 0x9a6   :  { %4253 = vmatmul.msk.f32.vlgmr.msrb.gmra.mxu3 %vm235_vm15, %v5647_v14 }
 0x9aa   :  { %v1226_v26 = vpop.permute.xlu1 %1225  ;;  %v1384_v27 = vpop.permute.xlu0 %1383 }
 0x9ab   :  { %4254 = vmatpush.xpose.msk.msra.mxu0 %vm235_vm15, %v1226_v26  ;;  %4260 = vmatpush.xpose.msk.msrb.mxu2 %vm235_vm15, %v1384_v27 }
 0x9ae   :  { %4255 = vmatmul.msk.f32.vlgmr.msra.gmra.mxu0 %vm235_vm15, %v5653_v21 }
 0x9b2   :  { %v1354_v28 = vpop.permute.xlu1 %1353  ;;  %v1382_v30 = vpop.permute.xlu0 %1381 }
 0x9b3   :  { %4259 = vmatmul.msk.f32.vlgmr.msrb.gmra.mxu1 %vm235_vm15, %v1354_v28  ;;  %4261 = vmatmul.msk.f32.vlgmr.msrb.gmra.mxu2 %vm235_vm15, %v1382_v30 }
 0xa29   :  { %v1221_v31 = vpop.f32.mrf.mxu3 }
 0xa2a   :  { %v1251_v32 = vmul.f32 0.35355338, %v1221_v31 }
 0xa2b   :  { %v1248_v4 = vpop.f32.mrf.mxu0 }
 0xa2c   :  { %v1252_v34 = vmul.f32 0.35355338, %v1248_v4  ;;  %v1253_v24 = vsel %vm235_vm15, %v1251_v32, -inf }
 0xa2d   :  { %1254 = vmax.xlane.f32.xlu2 %v1253_v24 }
 0xa2e   :  { %v1256_v8 = vsel %vm235_vm15, %v1252_v34, -inf }
 0xa2f   :  { %1257 = vmax.xlane.f32.xlu1 %v1256_v8 }
 0xa30   :  { %v1378_v36 = vpop.f32.mrf.mxu1 }
 0xa31   :  { %v1409_v37 = vmul.f32 0.35355338, %v1378_v36 }
 0xa33   :  { %v1411_v38 = vsel %vm235_vm15, %v1409_v37, -inf }
 0xa34   :  { %1412 = vmax.xlane.f32.xlu0 %v1411_v38 }
 0xa36   :  { %v1406_v39 = vpop.f32.mrf.mxu2 }
 0xa37   :  { %v1410_v40 = vmul.f32 0.35355338, %v1406_v39 }
 0xa39   :  { %v1414_v41 = vsel %vm235_vm15, %v1410_v40, -inf }
 0xa3a   :  { %1415 = vmax.xlane.f32.xlu2 %v1414_v41 }
 0xa48   :  { %1301 = vrot.lane.b32.xlu0 %v5647_v14, %s5265_s21 }
 0xaa0   :  { %v1255_v42 = vpop.xlane.xlu2 %1254 }
 0xaa1   :  { %v1259_v43 = vsub.f32 %v1251_v32, %v1255_v42 }
 0xaa2   :  { %v1258_v44 = vpop.xlane.xlu1 %1257 }
 0xaa3   :  { %v1261_v45 = vmul.f32 1.442695, %v1259_v43  ;;  %v1260_v46 = vsub.f32 %v1252_v34, %v1258_v44 }
 0xaa5   :  { %5146 = vpow2.f32 %v1261_v45  ;;  %v1263_v47 = vmul.f32 1.442695, %v1260_v46 }
 0xaa7   :  { %5148 = vpow2.f32 %v1263_v47  ;;  %v1413_v48 = vpop.xlane.xlu0 %1412 }
 0xaa8   :  { %v1417_v49 = vsub.f32 %v1409_v37, %v1413_v48 }
 0xaaa   :  { %v1419_v50 = vmul.f32 1.442695, %v1417_v49 }
 0xaab   :  { %v5147_v51 = vpop.eup %5146 }
 0xaac   :  { %5150 = vpow2.f32 %v1419_v50  ;;  %v1265_v52 = vsel %vm235_vm15, %v5147_v51, 0.0 }
 0xaad   :  { %v5680_v53 = vpop.eup %5148  ;;  %1266 = vadd.xlane.f32.xlu1 %v1265_v52  ;;  %v1416_v54 = vpop.xlane.xlu2 %1415 }
 0xaae   :  { %v1418_v55 = vsub.f32 %v1410_v40, %v1416_v54  ;;  %v1268_v56 = vsel %vm235_vm15, %v5680_v53, 0.0 }
 0xaaf   :  { %1269 = vadd.xlane.f32.xlu0 %v1268_v56 }
 0xab0   :  { %v1421_v57 = vmul.f32 1.442695, %v1418_v55 }
 0xab2   :  { %v5684_v58 = vpop.eup %5150  ;;  %5152 = vpow2.f32 %v1421_v57 }
 0xab3   :  { %v1423_v59 = vsel %vm235_vm15, %v5684_v58, 0.0 }
 0xab4   :  { %1424 = vadd.xlane.f32.xlu2 %v1423_v59 }
 0xab8   :  { %v5688_v60 = vpop.eup %5152 }
 0xab9   :  { %v1426_v19 = vsel %vm235_vm15, %v5688_v60, 0.0 }
 0xaba   :  { %1427 = vadd.xlane.f32.xlu1 %v1426_v19  ;;  %v1302_v35 = vpop.permute.xlu0 %1301  ;;  %v4264_v19 = vld [vmem:[%s6514_s3 + $0x48] sm:$0xf0] }
 0xabb   :  { %1322 = vmatpush.msra.mxu3 %v1302_v35 }
 0xac3   :  { %1485 = vrot.lane.b32.xlu0 %v5653_v21, %s5266_s22 }
 0xacc   :  { %1327 = vrot.lane.b32.xlu2 %v5653_v21, %s5265_s21 }
 0xad3   :  { %1459 = vrot.lane.b32.xlu1 %v5647_v14, %s5266_s22 }
 0xb20   :  { %v1267_v62 = vpop.xlane.xlu1 %1266 }
 0xb21   :  { %5154 = vrcp.f32 %v1267_v62  ;;  %v1282_v10 = vand.u32 2147483648, %v1267_v62  ;;  %v1280_v6 = vand.u32 2147483647, %v1267_v62  ;;  %vm1276_vm14 = vweird.f32 %v1267_v62 }
 0xb22   :  { %v1270_v63 = vpop.xlane.xlu0 %1269 }
 0xb23   :  { %5156 = vrcp.f32 %v1270_v63  ;;  %v1295_v13 = vand.u32 2147483647, %v1270_v63  ;;  %v1297_v29 = vand.u32 2147483648, %v1270_v63  ;;  %v1283_v14 = vor.u32 1.1754944e-38, %v1282_v10 }
 0xb24   :  { %vm1281_vm3 = vcmp.eq.f32.partialorder %v1280_v6, 8.507059e+37  ;;  %vm1291_vm4 = vweird.f32 %v1270_v63 }
 0xb25   :  { %v1298_v27 = vor.u32 1.1754944e-38, %v1297_v29  ;;  %vm1296_vm6 = vcmp.eq.f32.partialorder %v1295_v13, 8.507059e+37 }
 0xb27   :  { %v5155_v0 = vpop.eup %5154  ;;  %v5698_v1 = vpop.xlane.xlu2 %1424 }
 0xb28   :  { %v1272_v2 = vmul.f32 %v5155_v0, %v1267_v62  ;;  %5158 = vrcp.f32 %v5698_v1  ;;  %vm1277_vm13 = vweird.f32 %v5155_v0  ;;  %v1440_v43 = vand.u32 2147483648, %v5698_v1 }
 0xb29   :  { %v5157_v3 = vpop.eup %5156  ;;  %vm1278_vm2 = vmor %vm1276_vm14, %vm1277_vm13  ;;  %vm1434_vm11 = vweird.f32 %v5698_v1  ;;  %v1438_v45 = vand.u32 2147483647, %v5698_v1 }
 0xb2a   :  { %v1273_v5 = vsub.f32 1.0, %v1272_v2  ;;  %v1287_v9 = vmul.f32 %v5157_v3, %v1270_v63  ;;  %vm1292_vm1 = vweird.f32 %v5157_v3  ;;  %v1441_v50 = vor.u32 1.1754944e-38, %v1440_v43  ;;  %v4949_v43 = vld [vmem:[%s6514_s3 + $0x3c] sm:$0xf] }
 0xb2b   :  { %vm1293_vm5 = vmor %vm1291_vm4, %vm1292_vm1  ;;  %vm1439_vm14 = vcmp.eq.f32.partialorder %v1438_v45, 8.507059e+37 }
 0xb2c   :  { %v1274_v25 = vmul.f32 %v5155_v0, %v1273_v5  ;;  %v1288_v12 = vsub.f32 1.0, %v1287_v9 }
 0xb2d   :  { %v1428_v15 = vpop.xlane.xlu1 %1427 }
 0xb2e   :  { %v5159_v17 = vpop.eup %5158  ;;  %v1275_v11 = vadd.f32 %v5155_v0, %v1274_v25  ;;  %v1289_v18 = vmul.f32 %v5157_v3, %v1288_v12  ;;  %5160 = vrcp.f32 %v1428_v15  ;;  %v1455_v38 = vand.u32 2147483648, %v1428_v15  ;;  %v36_v12 = vld [vmem:[%s6512_s1] sm:$0xff] }
 0xb2f   :  { %v1430_v20 = vmul.f32 %v5159_v17, %v5698_v1  ;;  %v1328_v21 = vpop.permute.xlu2 %1327  ;;  %v1453_v40 = vand.u32 2147483647, %v1428_v15  ;;  %vm1435_vm8 = vweird.f32 %v5159_v17  ;;  %vm1449_vm9 = vweird.f32 %v1428_v15 }
 0xb30   :  { %v1279_v22 = vsel %vm1278_vm2, %v5155_v0, %v1275_v11  ;;  %v1290_v23 = vadd.f32 %v5157_v3, %v1289_v18  ;;  %1348 = vmatpush.msrb.mxu0 %v1328_v21  ;;  %v1456_v44 = vor.u32 1.1754944e-38, %v1455_v38  ;;  %vm1436_vm13 = vmor %vm1434_vm11, %vm1435_vm8 }
 0xb31   :  { %v1284_v26 = vsel %vm1281_vm3, %v1283_v14, %v1279_v22  ;;  %v1431_v32 = vsub.f32 1.0, %v1430_v20  ;;  %vm1454_vm12 = vcmp.eq.f32.partialorder %v1453_v40, 8.507059e+37 }
 0xb32   :  { %v1294_v28 = vsel %vm1293_vm5, %v5157_v3, %v1290_v23  ;;  %v1285_v30 = vmul.f32 %v5147_v51, %v1284_v26  ;;  %v1522_v3 = vld [vmem:[%s6517_s6 + $0x23] ss:$0 sm:$0xff] }
 0xb33   :  { %v1299_v31 = vsel %vm1296_vm6, %v1298_v27, %v1294_v28  ;;  %v1432_v36 = vmul.f32 %v5159_v17, %v1431_v32 }
 0xb34   :  { %v5161_v4 = vpop.eup %5160  ;;  %4256 = vmatmul.msk.f32.vlgmr.msra.gmra.mxu3 %vm235_vm15, %v1285_v30  ;;  %v1300_v34 = vmul.f32 %v5680_v53, %v1299_v31 }
 0xb35   :  { %v1445_v24 = vmul.f32 %v5161_v4, %v1428_v15  ;;  %v1486_v8 = vpop.permute.xlu0 %1485  ;;  %vm1450_vm7 = vweird.f32 %v5161_v4  ;;  %v1433_v41 = vadd.f32 %v5159_v17, %v1432_v36  ;;  %v37_v15 = vmul.f32 4.0, %v36_v12  ;;  %v4976_v12 = vld [vmem:[%s6515_s4 + $0x1b0] sm:$0xff] }
 0xb36   :  { %4257 = vmatmul.msk.f32.vlgmr.msrb.gmra.mxu0 %vm235_vm15, %v1300_v34  ;;  %vm1451_vm10 = vmor %vm1449_vm9, %vm1450_vm7 }
 0xb37   :  { %v1446_v37 = vsub.f32 1.0, %v1445_v24  ;;  %1506 = vmatpush.msra.mxu0 %v1486_v8  ;;  %v1437_v48 = vsel %vm1436_vm13, %v5159_v17, %v1433_v41  ;;  %v38_v17 = vld [vmem:[%s6513_s2 + $0x10] sm:$0xff]  ;;  %v4272_v41 = vld [vmem:[%s6514_s3 + $0x38] sm:$0xf] }
 0xb38   :  { %v1442_v51 = vsel %vm1439_vm14, %v1441_v50, %v1437_v48  ;;  %v5741_v11 = vadd.f32 %v38_v17, %v37_v15  ;;  %v4280_v48 = vld [vmem:[%s6514_s3 + $0x40] sm:$0xf]  ;;  %v4950_v50 = vld [vmem:[%s6514_s3 + $0x44] sm:$0xf]  ;;  %v4960_v17 = vld [vmem:[%s6515_s4 + $0x130] sm:$0xff] }
 0xb39   :  { %v1447_v39 = vmul.f32 %v5161_v4, %v1446_v37  ;;  %v1443_v53 = vmul.f32 %v5684_v58, %v1442_v51 }
 0xb3a   :  { %v2107_v18 = vsel %vm112_vm0, %v5741_v11, 0.0 }
 0xb3b   :  { %v1448_v42 = vadd.f32 %v5161_v4, %v1447_v39 }
 0xb3d   :  { %v1452_v46 = vsel %vm1451_vm10, %v5161_v4, %v1448_v42  ;;  %v4952_v42 = vld [vmem:[%s6514_s3 + $0x4c] sm:$0xf0] }
 0xb3e   :  { %v1457_v47 = vsel %vm1454_vm12, %v1456_v44, %v1452_v46  ;;  %v4274_v44 = vld [vmem:[%s6514_s3 + $0x50] sm:$0xf0]  ;;  %v4273_v46 = vor.u32 %v4952_v42, %v4272_v41  ;;  %v1546_v42 = vld [vmem:[%s6517_s6 + $0x24] ss:$0 sm:$0xff] }
 0xb3f   :  { %v1458_v49 = vmul.f32 %v5688_v60, %v1457_v47  ;;  %v4948_v60 = vld [vmem:[%s6514_s3 + $0x34] sm:$0xf]  ;;  %v4277_v47 = vor.u32 %v4949_v43, %v4274_v44 }
 0xb40   :  { %v4267_v35 = vor.u32 %v4948_v60, %v4264_v19  ;;  %1670 = vmatpush.bf16.msra.mxu2 %v4273_v46 }
 0xb41   :  { %4263 = vmatmul.msk.f32.vlgmr.msra.gmra.mxu0 %vm235_vm15, %v1458_v49  ;;  %v4953_v49 = vld [vmem:[%s6514_s3 + $0x54] sm:$0xf0] }
 0xb42   :  { %1537 = vmatpush.bf16.msra.mxu1 %v4267_v35  ;;  %v4281_v51 = vor.u32 %v4953_v49, %v4280_v48 }
 0xb44   :  { %1698 = vmatpush.bf16.msrb.mxu0 %v4281_v51 }
 0xb45   :  { %v1460_v52 = vpop.permute.xlu1 %1459 }
 0xb46   :  { %1480 = vmatpush.msrb.mxu3 %v1460_v52  ;;  %v4282_v52 = vld [vmem:[%s6514_s3 + $0x58] sm:$0xf0] }
 0xb47   :  { %4262 = vmatmul.msk.f32.vlgmr.msrb.gmra.mxu3 %vm235_vm15, %v1443_v53 }
 0xb48   :  { %1684 = vmatpush.bf16.msra.mxu3 %v4277_v47 }
 0xbb3   :  { %v1350_v54 = vpop.f32.mrf.mxu0 }
 0xbb7   :  { %v1324_v55 = vpop.f32.mrf.mxu3 }
 0xbbe   :  { %v1508_v56 = vpop.f32.mrf.mxu0 }
 0xbca   :  { %v1482_v57 = vpop.f32.mrf.mxu3 }
 0xbcb   :  { %v5077_v59 = vpack.i.bf16 %v1508_v56, %v1482_v57 }
 0xbcd   :  { %5078 = vrot.lane.b32.xlu2 %v5077_v59, %s5267_s23 }
 0xc27   :  { %v5079_v58 = vpop.permute.xlu2 %5078 }
 0xc28   :  { %v5081_v62 = vunpack.i.h.bf16 %v5079_v58  ;;  %v5080_v63 = vunpack.i.l.bf16 %v5079_v58 }
 0xc2a   :  { %v1520_v0 = vsel %vm235_vm15, %v1350_v54, %v5081_v62  ;;  %v1519_v1 = vsel %vm235_vm15, %v1324_v55, %v5080_v63  ;;  %v4285_v54 = vor.u32 %v4950_v50, %v4282_v52 }
 0xc2b   :  { %v1521_v2 = vpack.c.bf16 %v1520_v0, %v1519_v1 }
 0xc2c   :  { %1712 = vmatpush.bf16.msrb.mxu1 %v4285_v54  ;;  %v1547_v54 = vld [vmem:[%s6517_s6 + $0x25] ss:$0 sm:$0xff] }
 0xc2d   :  { %4268 = vmatmul.msk.bf16.vlgmr.msra.gmra.mxu1 %vm112_vm0, %v1521_v2 }
 0xcaa   :  { %v1539_v5 = vpop.f32.mrf.mxu1 }
 0xcab   :  { %v1540_v9 = vadd.f32 %v1539_v5, %v1522_v3  ;;  %v4985_v5 = vld [vmem:[%s6515_s4 + $0x1f8] sm:$0xff] }
 0xcac   :  { %1966 = vmatpush.bf16.msra.mxu1 %v4985_v5  ;;  %v4980_v5 = vld [vmem:[%s6515_s4 + $0x1d0] sm:$0xff] }
 0xcad   :  { %v5726_v10 = vadd.f32 %v1540_v9, %v5604_v61  ;;  %v4961_v9 = vld [vmem:[%s6515_s4 + $0x138] sm:$0xff] }
 0xcae   :  { %1924 = vmatpush.bf16.msrb.mxu2 %v4961_v9 }
 0xcaf   :  { %v1548_v25 = vsel %vm112_vm0, %v5726_v10, 0.0 }
 0xcb0   :  { %1549 = vadd.xlane.f32.xlu0 %v1548_v25  ;;  %v4969_v25 = vld [vmem:[%s6515_s4 + $0x178] sm:$0xff] }
 0xcb1   :  { %1938 = vmatpush.bf16.msrb.mxu3 %v4969_v25  ;;  %v4957_v25 = vld [vmem:[%s6515_s4 + $0x118] sm:$0xff] }
 0xcb2   :  { %v1541_v6 = vpop.f32.mrf.mxu1  ;;  %1925 = vmatpush.bf16.msrb.mxu2 %v4960_v17  ;;  %v4956_v17 = vld [vmem:[%s6515_s4 + $0x110] sm:$0xff] }
 0xcb3   :  { %v1542_v13 = vadd.f32 %v1541_v6, %v1522_v3  ;;  %v4977_v3 = vld [vmem:[%s6515_s4 + $0x1b8] sm:$0xff] }
 0xcb4   :  { %1952 = vmatpush.bf16.msra.mxu0 %v4977_v3  ;;  %v4972_v3 = vld [vmem:[%s6515_s4 + $0x190] sm:$0xff] }
 0xcb5   :  { %v5734_v29 = vadd.f32 %v1542_v13, %v5609_v7  ;;  %v4984_v13 = vld [vmem:[%s6515_s4 + $0x1f0] sm:$0xff] }
 0xcb6   :  { %1967 = vmatpush.bf16.msra.mxu1 %v4984_v13  ;;  %v4979_v13 = vld [vmem:[%s6515_s4 + $0x1c8] sm:$0xff] }
 0xcb7   :  { %v1551_v61 = vsel %vm112_vm0, %v5734_v29, 0.0 }
 0xcb8   :  { %1552 = vadd.xlane.f32.xlu1 %v1551_v61  ;;  %v4968_v61 = vld [vmem:[%s6515_s4 + $0x170] sm:$0xff]  ;;  %1953 = vmatpush.bf16.msra.mxu0 %v4976_v12  ;;  %v4971_v12 = vld [vmem:[%s6515_s4 + $0x188] sm:$0xff] }
 0xcb9   :  { %1939 = vmatpush.bf16.msrb.mxu3 %v4968_v61  ;;  %v4964_v61 = vld [vmem:[%s6515_s4 + $0x150] sm:$0xff] }
 0xcc0   :  { %2108 = vadd.xlane.f32.xlu1 %v2107_v18 }
 0xd23   :  { %v1550_v14 = vpop.xlane.xlu0 %1549 }
 0xd24   :  { %v1554_v20 = vmul.f32 %v1550_v14, %v5330_v16 }
 0xd26   :  { %v5747_v7 = vsub.f32 %v5726_v10, %v1554_v20 }
 0xd28   :  { %v1558_v21 = vmul.f32 %v5747_v7, %v5747_v7  ;;  %v1568_v48 = vmul.f32 %v5747_v7, %v1546_v42 }
 0xd2a   :  { %v1560_v22 = vsel %vm112_vm0, %v1558_v21, 0.0 }
 0xd2b   :  { %v1553_v23 = vpop.xlane.xlu1 %1552  ;;  %1561 = vadd.xlane.f32.xlu2 %v1560_v22  ;;  %v4975_v22 = vld [vmem:[%s6515_s4 + $0x1a8] sm:$0xff] }
 0xd2c   :  { %v1555_v26 = vmul.f32 %v1553_v23, %v5330_v16  ;;  %v4983_v23 = vld [vmem:[%s6515_s4 + $0x1e8] sm:$0xff]  ;;  %1954 = vmatpush.bf16.msra.mxu0 %v4975_v22 }
 0xd2d   :  { %1968 = vmatpush.bf16.msra.mxu1 %v4983_v23  ;;  %v4963_v22 = vld [vmem:[%s6515_s4 + $0x148] sm:$0xff] }
 0xd2e   :  { %v5754_v27 = vsub.f32 %v5734_v29, %v1555_v26 }
 0xd30   :  { %v1559_v28 = vmul.f32 %v5754_v27, %v5754_v27  ;;  %v1569_v51 = vmul.f32 %v5754_v27, %v1546_v42 }
 0xd32   :  { %v1563_v30 = vsel %vm112_vm0, %v1559_v28, 0.0  ;;  %v4959_v28 = vld [vmem:[%s6515_s4 + $0x128] sm:$0xff] }
 0xd33   :  { %v2109_v31 = vpop.xlane.xlu1 %2108  ;;  %1564 = vadd.xlane.f32.xlu0 %v1563_v30  ;;  %v4967_v30 = vld [vmem:[%s6515_s4 + $0x168] sm:$0xff]  ;;  %1926 = vmatpush.bf16.msrb.mxu2 %v4959_v28  ;;  %v4954_v28 = vld [vmem:[%s6515_s4 + $0x100] sm:$0xff] }
 0xd34   :  { %v2110_v32 = vmul.f32 %v2109_v31, %v5330_v16  ;;  %1940 = vmatpush.bf16.msrb.mxu3 %v4967_v30  ;;  %v4962_v30 = vld [vmem:[%s6515_s4 + $0x140] sm:$0xff] }
 0xd36   :  { %v5761_v4 = vsub.f32 %v5741_v11, %v2110_v32  ;;  %v4974_v32 = vld [vmem:[%s6515_s4 + $0x1a0] sm:$0xff] }
 0xd37   :  { %1955 = vmatpush.bf16.msra.mxu0 %v4974_v32  ;;  %v4490_v32 = vld [vmem:[%s6514_s3 + $0x60] sm:$0xf] }
 0xd38   :  { %v2112_v34 = vmul.f32 %v5761_v4, %v5761_v4 }
 0xd3a   :  { %v2113_v24 = vsel %vm112_vm0, %v2112_v34, 0.0  ;;  %v4982_v34 = vld [vmem:[%s6515_s4 + $0x1e0] sm:$0xff] }
 0xd3b   :  { %2114 = vadd.xlane.f32.xlu2 %v2113_v24  ;;  %1969 = vmatpush.bf16.msra.mxu1 %v4982_v34  ;;  %v4989_v34 = vld [vmem:[%s6514_s3 + $0x74] sm:$0xf0] }
 0xd9e   :  { %v1562_v8 = vpop.xlane.xlu2 %1561 }
 0xd9f   :  { %v1566_v36 = vmul.f32 %v1562_v8, %v5346_v33 }
 0xda1   :  { %5162 = vrsqrt.f32 %v1566_v36  ;;  %vm1577_vm1 = vcmp.eq.f32.partialorder %v1566_v36, inf  ;;  %v1580_v35 = vand.u32 2147483648, %v1566_v36  ;;  %vm1579_vm2 = vcmp.eq.f32.partialorder %v1566_v36, 0.0 }
 0xda6   :  { %v1565_v37 = vpop.xlane.xlu0 %1564 }
 0xda7   :  { %v5163_v38 = vpop.eup %5162  ;;  %v1567_v39 = vmul.f32 %v1565_v37, %v5346_v33 }
 0xda8   :  { %v1571_v40 = vmul.f32 %v5163_v38, %v1566_v36 }
 0xda9   :  { %5164 = vrsqrt.f32 %v1567_v39  ;;  %vm1589_vm3 = vcmp.eq.f32.partialorder %v1567_v39, inf  ;;  %v1592_v15 = vand.u32 2147483648, %v1567_v39  ;;  %vm1591_vm4 = vcmp.eq.f32.partialorder %v1567_v39, 0.0 }
 0xdaa   :  { %v1572_v45 = vmul.f32 %v5163_v38, %v1571_v40 }
 0xdac   :  { %v1573_v53 = vmul.f32 0.5, %v1572_v45 }
 0xdae   :  { %v1574_v55 = vsub.f32 1.5, %v1573_v53  ;;  %v2115_v7 = vpop.xlane.xlu2 %2114 }
 0xdaf   :  { %v5165_v56 = vpop.eup %5164  ;;  %v2116_v27 = vmul.f32 %v2115_v7, %v5346_v33 }
 0xdb0   :  { %v1575_v57 = vmul.f32 %v5163_v38, %v1574_v55  ;;  %v1583_v59 = vmul.f32 %v5165_v56, %v1567_v39 }
 0xdb1   :  { %vm2125_vm13 = vcmp.eq.f32.partialorder %v2116_v27, inf  ;;  %v2128_v23 = vand.u32 2147483648, %v2116_v27  ;;  %vm2127_vm14 = vcmp.eq.f32.partialorder %v2116_v27, 0.0 }
 0xdb2   :  { %v1576_v60 = vmul.f32 %v1575_v57, %v1566_v36  ;;  %v1584_v19 = vmul.f32 %v5165_v56, %v1583_v59 }
 0xdb4   :  { %v1578_v58 = vsel %vm1577_vm1, %v1566_v36, %v1576_v60  ;;  %v1585_v62 = vmul.f32 0.5, %v1584_v19 }
 0xdb5   :  { %v1581_v63 = vsel %vm1579_vm2, %v1580_v35, %v1578_v58 }
 0xdb6   :  { %v1594_v0 = vadd.f32 1e-06, %v1581_v63  ;;  %v1586_v1 = vsub.f32 1.5, %v1585_v62  ;;  %v4973_v62 = vld [vmem:[%s6515_s4 + $0x198] sm:$0xff] }
 0xdb7   :  { %v4981_v63 = vld [vmem:[%s6515_s4 + $0x1d8] sm:$0xff]  ;;  %1956 = vmatpush.bf16.msra.mxu0 %v4973_v62 }
 0xdb8   :  { %5166 = vrcp.f32 %v1594_v0  ;;  %v1587_v2 = vmul.f32 %v5165_v56, %v1586_v1  ;;  %v1607_v37 = vand.u32 2147483648, %v1594_v0  ;;  %vm1601_vm6 = vweird.f32 %v1594_v0  ;;  %1970 = vmatpush.bf16.msra.mxu1 %v4981_v63  ;;  %v4958_v1 = vld [vmem:[%s6515_s4 + $0x120] sm:$0xff] }
 0xdb9   :  { %v1605_v38 = vand.u32 2147483647, %v1594_v0  ;;  %1927 = vmatpush.bf16.msrb.mxu2 %v4958_v1 }
 0xdba   :  { %v1588_v6 = vmul.f32 %v1587_v2, %v1567_v39  ;;  %v1608_v43 = vor.u32 1.1754944e-38, %v1607_v37  ;;  %v4966_v2 = vld [vmem:[%s6515_s4 + $0x160] sm:$0xff] }
 0xdbb   :  { %vm1606_vm8 = vcmp.eq.f32.partialorder %v1605_v38, 8.507059e+37  ;;  %1941 = vmatpush.bf16.msrb.mxu3 %v4966_v2  ;;  %1957 = vmatpush.bf16.msra.mxu0 %v4972_v3  ;;  %v4269_v37 = vld [vmem:[%s6517_s6 + $0x26] ss:$8 sm:$0xf] }
 0xdbc   :  { %v1590_v18 = vsel %vm1589_vm3, %v1567_v39, %v1588_v6  ;;  %1971 = vmatpush.bf16.msra.mxu1 %v4980_v5  ;;  %v4965_v6 = vld [vmem:[%s6515_s4 + $0x158] sm:$0xff]  ;;  %v1635_v42 = vperm.slane %v4269_v37, 3 }
 0xdbd   :  { %v1593_v14 = vsel %vm1591_vm4, %v1592_v15, %v1590_v18  ;;  %1928 = vmatpush.bf16.msrb.mxu2 %v4957_v25  ;;  %v4970_v18 = vld [vmem:[%s6515_s4 + $0x180] sm:$0xff] }
 0xdbe   :  { %v5167_v20 = vpop.eup %5166  ;;  %v1595_v21 = vadd.f32 1e-06, %v1593_v14  ;;  %v4978_v14 = vld [vmem:[%s6515_s4 + $0x1c0] sm:$0xff] }
 0xdbf   :  { %v1597_v26 = vmul.f32 %v5167_v20, %v1594_v0  ;;  %vm1602_vm5 = vweird.f32 %v5167_v20  ;;  %1942 = vmatpush.bf16.msrb.mxu3 %v4965_v6  ;;  %1958 = vmatpush.bf16.msra.mxu0 %v4971_v12 }
 0xdc0   :  { %5168 = vrcp.f32 %v1595_v21  ;;  %vm1603_vm7 = vmor %vm1601_vm6, %vm1602_vm5  ;;  %v1622_v44 = vand.u32 2147483648, %v1595_v21  ;;  %v1620_v46 = vand.u32 2147483647, %v1595_v21  ;;  %vm1616_vm10 = vweird.f32 %v1595_v21  ;;  %1972 = vmatpush.bf16.msra.mxu1 %v4979_v13 }
 0xdc1   :  { %v1598_v31 = vsub.f32 1.0, %v1597_v26  ;;  %5170 = vrsqrt.f32 %v2116_v27  ;;  %1929 = vmatpush.bf16.msrb.mxu2 %v4956_v17  ;;  %v2105_v17 = vld [vmem:[%s6517_s6 + $0x42] ss:$0 sm:$0xff]  ;;  %vm1988_vm5 = vcmask 1040384   ;;  %vm2227_vm6 = vcmask 27648  }
 0xdc2   :  { %v1623_v50 = vor.u32 1.1754944e-38, %v1622_v44  ;;  %vm1621_vm12 = vcmp.eq.f32.partialorder %v1620_v46, 8.507059e+37 }
 0xdc3   :  { %v1599_v24 = vmul.f32 %v5167_v20, %v1598_v31  ;;  %1943 = vmatpush.bf16.msrb.mxu3 %v4964_v61  ;;  %1959 = vmatpush.bf16.msra.mxu0 %v4970_v18  ;;  %v2117_v18 = vmul.f32 %v5761_v4, %v2105_v17 }
 0xdc4   :  { %1973 = vmatpush.bf16.msra.mxu1 %v4978_v14 }
 0xdc5   :  { %v1600_v8 = vadd.f32 %v5167_v20, %v1599_v24 }
 0xdc6   :  { %v5169_v36 = vpop.eup %5168 }
 0xdc7   :  { %v1612_v39 = vmul.f32 %v5169_v36, %v1595_v21  ;;  %v1604_v40 = vsel %vm1603_vm7, %v5167_v20, %v1600_v8  ;;  %vm1617_vm9 = vweird.f32 %v5169_v36  ;;  %v5171_v19 = vpop.eup %5170  ;;  %v4955_v21 = vld [vmem:[%s6515_s4 + $0x108] sm:$0xff]  ;;  %1944 = vmatpush.bf16.msrb.mxu3 %v4963_v22  ;;  %v4491_v8 = vor.u32 %v4989_v34, %v4490_v32 }
 0xdc8   :  { %v1609_v47 = vsel %vm1606_vm8, %v1608_v43, %v1604_v40  ;;  %vm1618_vm11 = vmor %vm1616_vm10, %vm1617_vm9  ;;  %v2119_v35 = vmul.f32 %v5171_v19, %v2116_v27  ;;  %1930 = vmatpush.bf16.msrb.mxu2 %v4955_v21  ;;  %vm2282_vm7 = vcmask 1043456  }
 0xdc9   :  { %v1613_v41 = vsub.f32 1.0, %v1612_v39  ;;  %v1610_v52 = vmul.f32 %v1609_v47, %v1568_v48  ;;  %v1632_v48 = vperm.slane %v4269_v37, 0 }
 0xdca   :  { %v2120_v58 = vmul.f32 %v5171_v19, %v2119_v35 }
 0xdcb   :  { %v1614_v45 = vmul.f32 %v5169_v36, %v1613_v41  ;;  %v1626_v57 = vadd.f32 %v1610_v52, %v1547_v54  ;;  %1945 = vmatpush.bf16.msrb.mxu3 %v4962_v30  ;;  %v1634_v41 = vperm.slane %v4269_v37, 2 }
 0xdcc   :  { %v2121_v0 = vmul.f32 0.5, %v2120_v58  ;;  %1931 = vmatpush.bf16.msrb.mxu2 %v4954_v28 }
 0xdcd   :  { %v1615_v49 = vadd.f32 %v5169_v36, %v1614_v45 }
 0xdce   :  { %v2122_v9 = vsub.f32 1.5, %v2121_v0 }
 0xdcf   :  { %v1619_v53 = vsel %vm1618_vm11, %v5169_v36, %v1615_v49  ;;  %v1633_v49 = vperm.slane %v4269_v37, 1 }
 0xdd0   :  { %v1624_v55 = vsel %vm1621_vm12, %v1623_v50, %v1619_v53  ;;  %v2123_v15 = vmul.f32 %v5171_v19, %v2122_v9 }
 0xdd1   :  { %v1625_v56 = vmul.f32 %v1624_v55, %v1569_v51 }
 0xdd2   :  { %v2124_v20 = vmul.f32 %v2123_v15, %v2116_v27 }
 0xdd3   :  { %v1627_v59 = vadd.f32 %v1625_v56, %v1547_v54 }
 0xdd4   :  { %v2126_v26 = vsel %vm2125_vm13, %v2116_v27, %v2124_v20  ;;  %v2106_v20 = vld [vmem:[%s6517_s6 + $0x43] ss:$0 sm:$0xff]  ;;  %vm2278_vm13 = vcmask 31744  }
 0xdd5   :  { %v1628_v60 = vpack.c.bf16 %v1627_v59, %v1626_v57  ;;  %v2129_v31 = vsel %vm2127_vm14, %v2128_v23, %v2126_v26  ;;  %v1731_v23 = vld [vmem:[%s6517_s6 + $0x27] ss:$0 sm:$0xff] }
 0xdd6   :  { %v2130_v24 = vadd.f32 1e-06, %v2129_v31 }
 0xdd7   :  { %4286 = vmatmul.msk.bf16.vlgmr.msra.gmra.mxu2 %vm112_vm0, %v1628_v60  ;;  %4287 = vmatmul.msk.bf16.vlgmr.msra.gmra.mxu3 %vm112_vm0, %v1628_v60 }
 0xdd8   :  { %4288 = vmatmul.msk.bf16.vlgmr.msrb.gmra.mxu0 %vm112_vm0, %v1628_v60  ;;  %4289 = vmatmul.msk.bf16.vlgmr.msrb.gmra.mxu1 %vm112_vm0, %v1628_v60  ;;  %5172 = vrcp.f32 %v2130_v24  ;;  %vm2136_vm1 = vweird.f32 %v2130_v24  ;;  %v2140_v1 = vand.u32 2147483647, %v2130_v24  ;;  %v2142_v2 = vand.u32 2147483648, %v2130_v24 }
 0xdd9   :  { %2165 = vmatpush.bf16.msra.mxu2 %v4491_v8 }
 0xdda   :  { %v2143_v13 = vor.u32 1.1754944e-38, %v2142_v2  ;;  %vm2141_vm4 = vcmp.eq.f32.partialorder %v2140_v1, 8.507059e+37 }
 0xdde   :  { %v5173_v36 = vpop.eup %5172 }
 0xddf   :  { %v2132_v40 = vmul.f32 %v5173_v36, %v2130_v24  ;;  %vm2137_vm2 = vweird.f32 %v5173_v36 }
 0xde0   :  { %vm2138_vm3 = vmor %vm2136_vm1, %vm2137_vm2 }
 0xde1   :  { %v2133_v45 = vsub.f32 1.0, %v2132_v40 }
 0xde3   :  { %v2134_v54 = vmul.f32 %v5173_v36, %v2133_v45 }
 0xde5   :  { %v2135_v0 = vadd.f32 %v5173_v36, %v2134_v54 }
 0xde7   :  { %v2139_v15 = vsel %vm2138_vm3, %v5173_v36, %v2135_v0 }
 0xde8   :  { %v2144_v61 = vsel %vm2141_vm4, %v2143_v13, %v2139_v15 }
 0xde9   :  { %v2145_v14 = vmul.f32 %v2144_v61, %v2117_v18 }
 0xdeb   :  { %v2146_v21 = vadd.f32 %v2145_v14, %v2106_v20 }
 0xded   :  { %v2147_v22 = vpack.c.bf16 %v2146_v21, %v2146_v21 }
 0xe55   :  { %v1700_v38 = vpop.f32.mrf.mxu0  ;;  %v1714_v39 = vpop.f32.mrf.mxu1 }
 0xe56   :  { %v1701_v46 = vadd.f32 %v1700_v38, %v1634_v41  ;;  %v1715_v47 = vadd.f32 %v1714_v39, %v1635_v42 }
 0xe58   :  { %v1721_v55 = vmax.f32 %v1701_v46, 0.0  ;;  %v1722_v56 = vmax.f32 %v1715_v47, 0.0 }
 0xe5a   :  { %v1672_v43 = vpop.f32.mrf.mxu2  ;;  %v1686_v44 = vpop.f32.mrf.mxu3 }
 0xe5b   :  { %v1673_v60 = vadd.f32 %v1672_v43, %v1632_v48  ;;  %v1687_v7 = vadd.f32 %v1686_v44, %v1633_v49 }
 0xe5d   :  { %v1702_v50 = vpop.f32.mrf.mxu0  ;;  %v1716_v51 = vpop.f32.mrf.mxu1  ;;  %v1719_v3 = vmax.f32 %v1673_v60, 0.0  ;;  %v1720_v5 = vmax.f32 %v1687_v7, 0.0 }
 0xe5e   :  { %v1703_v52 = vadd.f32 %v1702_v50, %v1634_v41  ;;  %v1717_v53 = vadd.f32 %v1716_v51, %v1635_v42  ;;  %v2148_v42 = vld [vmem:[%s6517_s6 + $0x44] ss:$0 sm:$0xff] }
 0xe60   :  { %v1725_v57 = vmax.f32 %v1703_v52, 0.0  ;;  %v1726_v59 = vmax.f32 %v1717_v53, 0.0 }
 0xe62   :  { %v1729_v27 = vpack.c.bf16 %v1725_v57, %v1721_v55  ;;  %v1730_v19 = vpack.c.bf16 %v1726_v59, %v1722_v56  ;;  %v1674_v35 = vpop.f32.mrf.mxu2  ;;  %v1688_v58 = vpop.f32.mrf.mxu3 }
 0xe63   :  { %v1675_v62 = vadd.f32 %v1674_v35, %v1632_v48  ;;  %v1689_v63 = vadd.f32 %v1688_v58, %v1633_v49 }
 0xe64   :  { %1960 = vmatmul.bf16.vlgmr.msra.gmra.mxu0 %v1729_v27  ;;  %1974 = vmatmul.bf16.vlgmr.msra.gmra.mxu1 %v1730_v19 }
 0xe65   :  { %v1723_v9 = vmax.f32 %v1675_v62, 0.0  ;;  %v1724_v25 = vmax.f32 %v1689_v63, 0.0 }
 0xe67   :  { %v1727_v6 = vpack.c.bf16 %v1723_v9, %v1719_v3  ;;  %v1728_v12 = vpack.c.bf16 %v1724_v25, %v1720_v5 }
 0xe69   :  { %1932 = vmatmul.bf16.vlgmr.msrb.gmra.mxu2 %v1727_v6  ;;  %1946 = vmatmul.bf16.vlgmr.msrb.gmra.mxu3 %v1728_v12 }
 0xe79   :  { %4492 = vmatmul.msk.bf16.vlgmr.msra.gmra.mxu2 %vm112_vm0, %v2147_v22 }
 0xee1   :  { %v1961_v31 = vpop.f32.mrf.mxu0  ;;  %v1975_v34 = vpop.f32.mrf.mxu1 }
 0xee9   :  { %v1963_v39 = vpop.f32.mrf.mxu0  ;;  %v1977_v41 = vpop.f32.mrf.mxu1 }
 0xeec   :  { %v1933_v26 = vpop.f32.mrf.mxu2  ;;  %v1947_v28 = vpop.f32.mrf.mxu3 }
 0xeed   :  { %v1934_v30 = vadd.f32 %v1933_v26, %v1731_v23 }
 0xeef   :  { %v1948_v32 = vadd.f32 %v1947_v28, %v1934_v30 }
 0xef1   :  { %v1962_v4 = vadd.f32 %v1961_v31, %v1948_v32 }
 0xef3   :  { %v1976_v24 = vadd.f32 %v1975_v34, %v1962_v4 }
 0xef4   :  { %v1935_v8 = vpop.f32.mrf.mxu2  ;;  %v1949_v37 = vpop.f32.mrf.mxu3 }
 0xef5   :  { %v1936_v36 = vadd.f32 %v1935_v8, %v1731_v23  ;;  %v1980_v44 = vadd.f32 %v1976_v24, %v5726_v10 }
 0xef7   :  { %v1950_v38 = vadd.f32 %v1949_v37, %v1936_v36  ;;  %v1983_v49 = vrot.slane %v1980_v44, 7 }
 0xef9   :  { %v1964_v40 = vadd.f32 %v1963_v39, %v1950_v38 }
 0xefb   :  { %v1978_v43 = vadd.f32 %v1977_v41, %v1964_v40 }
 0xefc   :  { %v2167_v45 = vpop.f32.mrf.mxu2 }
 0xefd   :  { %v5925_v46 = vadd.f32 %v2167_v45, %v2148_v42  ;;  %v1981_v47 = vadd.f32 %v1978_v43, %v5734_v29 }
 0xeff   :  { %2173 = vrot.lane.b32.xlu0 %v5925_v46, %s5263_s19  ;;  %v5931_v48 = vrot.slane %v5925_v46, 4  ;;  %v1986_v50 = vrot.slane %v1981_v47, 6 }
 0xf01   :  { %2362 = vrot.lane.b32.xlu2 %v5931_v48, %s5262_s18  ;;  %2199 = vrot.lane.b32.xlu1 %v5931_v48, %s5263_s19  ;;  %v5938_v10 = vsel %vm1988_vm5, %v1983_v49, %v1986_v50 }
 0xf04   :  { %v2169_v51 = vpop.f32.mrf.mxu2 }
 0xf07   :  { %2334 = vrot.lane.b32.xlu0 %v5925_v46, %s5262_s18 }
 0xf09   :  { %2332 = vrot.lane.b32.xlu2 %v5925_v46, %s5264_s20 }
 0xf0f   :  { %2360 = vrot.lane.b32.xlu0 %v5931_v48, %s5264_s20 }
 0xf5b   :  { %v2363_v29 = vpop.permute.xlu2 %2362 }
 0xf5c   :  { %4503 = vmatpush.xpose.msk.msrb.mxu2 %vm235_vm15, %v2363_v29 }
 0xf63   :  { %v2333_v55 = vpop.permute.xlu2 %2332 }
 0xf71   :  { %v2174_v52 = vpop.permute.xlu0 %2173 }
 0xf72   :  { %4493 = vmatpush.xpose.msk.msra.mxu3 %vm235_vm15, %v2174_v52 }
 0xf73   :  { %v2200_v53 = vpop.permute.xlu1 %2199 }
 0xf74   :  { %4495 = vmatpush.xpose.msk.msrb.mxu0 %vm235_vm15, %v2200_v53 }
 0xf75   :  { %4494 = vmatmul.msk.f32.vlgmr.msra.gmra.mxu3 %vm235_vm15, %v5925_v46 }
 0xf77   :  { %4496 = vmatmul.msk.f32.vlgmr.msrb.gmra.mxu0 %vm235_vm15, %v5931_v48 }
 0xf79   :  { %v2335_v54 = vpop.permute.xlu0 %2334 }
 0xf7a   :  { %4501 = vmatpush.xpose.msk.msrb.mxu1 %vm235_vm15, %v2335_v54 }
 0xf7d   :  { %4502 = vmatmul.msk.f32.vlgmr.msrb.gmra.mxu1 %vm235_vm15, %v2333_v55 }
 0xf81   :  { %v2361_v56 = vpop.permute.xlu0 %2360 }
 0xf82   :  { %4504 = vmatmul.msk.f32.vlgmr.msrb.gmra.mxu2 %vm235_vm15, %v2361_v56 }
 0xff4   :  { %v2222_v57 = vpop.f32.mrf.mxu0 }
 0xff5   :  { %v2226_v59 = vmul.f32 0.35355338, %v2222_v57 }
 0xff7   :  { %v2231_v60 = vsel %vm2227_vm6, %v2226_v59, -inf }
 0xff8   :  { %v2196_v7 = vpop.f32.mrf.mxu3  ;;  %2232 = vmax.xlane.f32.xlu0 %v2231_v60 }
 0xff9   :  { %v2225_v27 = vmul.f32 0.35355338, %v2196_v7 }
 0xffa   :  { %v2357_v19 = vpop.f32.mrf.mxu1 }
 0xffb   :  { %v2388_v35 = vmul.f32 0.35355338, %v2357_v19  ;;  %v2228_v58 = vsel %vm2227_vm6, %v2225_v27, -inf }
 0xffc   :  { %2229 = vmax.xlane.f32.xlu1 %v2228_v58 }
 0xffd   :  { %v2390_v62 = vsel %vm2227_vm6, %v2388_v35, -inf }
 0xffe   :  { %2391 = vmax.xlane.f32.xlu2 %v2390_v62 }
0x1005   :  { %v2385_v63 = vpop.f32.mrf.mxu2 }
0x1006   :  { %v2389_v0 = vmul.f32 0.35355338, %v2385_v63 }
0x1008   :  { %v2393_v1 = vsel %vm2227_vm6, %v2389_v0, -inf }
0x1009   :  { %2394 = vmax.xlane.f32.xlu1 %v2393_v1 }
0x100c   :  { %2276 = vrot.lane.b32.xlu0 %v5925_v46, %s5265_s21 }
0x106b   :  { %v2233_v2 = vpop.xlane.xlu0 %2232 }
0x106c   :  { %v2235_v3 = vsub.f32 %v2226_v59, %v2233_v2 }
0x106e   :  { %v2238_v5 = vmul.f32 1.442695, %v2235_v3 }
0x106f   :  { %v2230_v9 = vpop.xlane.xlu1 %2229 }
0x1070   :  { %5174 = vpow2.f32 %v2238_v5  ;;  %v2234_v25 = vsub.f32 %v2225_v27, %v2230_v9 }
0x1071   :  { %v2392_v6 = vpop.xlane.xlu2 %2391 }
0x1072   :  { %v2236_v12 = vmul.f32 1.442695, %v2234_v25  ;;  %v2396_v13 = vsub.f32 %v2388_v35, %v2392_v6 }
0x1074   :  { %5176 = vpow2.f32 %v2236_v12  ;;  %v2398_v15 = vmul.f32 1.442695, %v2396_v13 }
0x1076   :  { %v5962_v17 = vpop.eup %5174  ;;  %5178 = vpow2.f32 %v2398_v15 }
0x1077   :  { %v2243_v61 = vsel %vm2227_vm6, %v5962_v17, 0.0 }
0x1078   :  { %2244 = vadd.xlane.f32.xlu0 %v2243_v61 }
0x107a   :  { %v5177_v18 = vpop.eup %5176 }
0x107b   :  { %v2240_v14 = vsel %vm2227_vm6, %v5177_v18, 0.0 }
0x107c   :  { %v5967_v20 = vpop.eup %5178  ;;  %2241 = vadd.xlane.f32.xlu2 %v2240_v14  ;;  %v2395_v21 = vpop.xlane.xlu1 %2394 }
0x107d   :  { %v2397_v22 = vsub.f32 %v2389_v0, %v2395_v21  ;;  %v2402_v23 = vsel %vm2227_vm6, %v5967_v20, 0.0 }
0x107e   :  { %2403 = vadd.xlane.f32.xlu1 %v2402_v23  ;;  %v2277_v26 = vpop.permute.xlu0 %2276 }
0x107f   :  { %v2400_v28 = vmul.f32 1.442695, %v2397_v22  ;;  %4497 = vmatpush.msk.msrb.mxu3 %vm2282_vm7, %v2277_v26 }
0x1081   :  { %5180 = vpow2.f32 %v2400_v28  ;;  %v4986_v28 = vld [vmem:[%s6514_s3 + $0x64] sm:$0xf] }
0x1087   :  { %v5972_v30 = vpop.eup %5180 }
0x1088   :  { %v2405_v31 = vsel %vm2227_vm6, %v5972_v30, 0.0 }
0x1089   :  { %2406 = vadd.xlane.f32.xlu2 %v2405_v31  ;;  %v4509_v31 = vld [vmem:[%s6514_s3 + $0x78] sm:$0xf0] }
0x108c   :  { %2465 = vrot.lane.b32.xlu0 %v5931_v48, %s5266_s22 }
0x1097   :  { %2305 = vrot.lane.b32.xlu1 %v5931_v48, %s5265_s21 }
0x10a1   :  { %2438 = vrot.lane.b32.xlu2 %v5925_v46, %s5266_s22 }
0x10eb   :  { %v2245_v32 = vpop.xlane.xlu0 %2244 }
0x10ec   :  { %5182 = vrcp.f32 %v2245_v32  ;;  %vm2266_vm1 = vweird.f32 %v2245_v32  ;;  %v2272_v53 = vand.u32 2147483648, %v2245_v32  ;;  %v2270_v57 = vand.u32 2147483647, %v2245_v32 }
0x10ee   :  { %v2273_v35 = vor.u32 1.1754944e-38, %v2272_v53  ;;  %v4525_v53 = vld [vmem:[%s6514_s3 + $0x70] sm:$0xf] }
0x10ef   :  { %v2242_v34 = vpop.xlane.xlu2 %2241 }
0x10f0   :  { %5184 = vrcp.f32 %v2242_v34  ;;  %v2255_v42 = vand.u32 2147483647, %v2242_v34  ;;  %v2257_v43 = vand.u32 2147483648, %v2242_v34  ;;  %vm2251_vm9 = vweird.f32 %v2242_v34 }
0x10f1   :  { %v2404_v4 = vpop.xlane.xlu1 %2403 }
0x10f2   :  { %v5183_v24 = vpop.eup %5182  ;;  %5186 = vrcp.f32 %v2404_v4  ;;  %vm2256_vm12 = vcmp.eq.f32.partialorder %v2255_v42, 8.507059e+37  ;;  %v2258_v50 = vor.u32 1.1754944e-38, %v2257_v43  ;;  %v2419_v55 = vand.u32 2147483648, %v2404_v4 }
0x10f3   :  { %v2262_v8 = vmul.f32 %v5183_v24, %v2245_v32  ;;  %vm2267_vm10 = vweird.f32 %v5183_v24  ;;  %vm2413_vm3 = vweird.f32 %v2404_v4  ;;  %v2417_v59 = vand.u32 2147483647, %v2404_v4 }
0x10f4   :  { %vm5982_vm2 = vmor %vm2266_vm1, %vm2267_vm10  ;;  %v2420_v58 = vor.u32 1.1754944e-38, %v2419_v55  ;;  %v4512_v32 = vor.u32 %v4986_v28, %v4509_v31  ;;  %v4996_v28 = vld [vmem:[%s6515_s4 + $0x220] sm:$0xff] }
0x10f5   :  { %v2263_v37 = vsub.f32 1.0, %v2262_v8  ;;  %v5004_v31 = vld [vmem:[%s6515_s4 + $0x260] sm:$0xff] }
0x10f6   :  { %v5185_v36 = vpop.eup %5184  ;;  %2522 = vmatpush.bf16.msra.mxu1 %v4512_v32 }
0x10f7   :  { %v2247_v38 = vmul.f32 %v5185_v36, %v2242_v34  ;;  %v2264_v44 = vmul.f32 %v5183_v24, %v2263_v37  ;;  %vm2252_vm8 = vweird.f32 %v5185_v36 }
0x10f8   :  { %v5187_v39 = vpop.eup %5186  ;;  %vm2253_vm11 = vmor %vm2251_vm9, %vm2252_vm8  ;;  %vm2271_vm8 = vcmp.eq.f32.partialorder %v2270_v57, 8.507059e+37  ;;  %vm2418_vm9 = vcmp.eq.f32.partialorder %v2417_v59, 8.507059e+37  ;;  %v4988_v57 = vld [vmem:[%s6514_s3 + $0x74] sm:$0xf]  ;;  %v4527_v59 = vld [vmem:[%s6514_s3 + $0x88] sm:$0xf0] }
0x10f9   :  { %v2248_v40 = vsub.f32 1.0, %v2247_v38  ;;  %v2409_v41 = vmul.f32 %v5187_v39, %v2404_v4  ;;  %v2265_v51 = vadd.f32 %v5183_v24, %v2264_v44  ;;  %vm2414_vm14 = vweird.f32 %v5187_v39 }
0x10fa   :  { %vm2415_vm4 = vmor %vm2413_vm3, %vm2414_vm14 }
0x10fb   :  { %v2249_v45 = vmul.f32 %v5185_v36, %v2248_v40  ;;  %v2410_v46 = vsub.f32 1.0, %v2409_v41  ;;  %v2269_v27 = vsel %vm5982_vm2, %v5183_v24, %v2265_v51  ;;  %v4987_v51 = vld [vmem:[%s6514_s3 + $0x6c] sm:$0xf] }
0x10fc   :  { %v2407_v47 = vpop.xlane.xlu2 %2406  ;;  %v2274_v0 = vsel %vm2271_vm8, %v2273_v35, %v2269_v27 }
0x10fd   :  { %v2250_v48 = vadd.f32 %v5185_v36, %v2249_v45  ;;  %v2411_v49 = vmul.f32 %v5187_v39, %v2410_v46  ;;  %5188 = vrcp.f32 %v2407_v47  ;;  %v2434_v5 = vand.u32 2147483648, %v2407_v47 }
0x10fe   :  { %v2432_v9 = vand.u32 2147483647, %v2407_v47  ;;  %v2275_v6 = vmul.f32 %v5962_v17, %v2274_v0  ;;  %v2466_v15 = vpop.permute.xlu0 %2465 }
0x10ff   :  { %v2254_v29 = vsel %vm2253_vm11, %v5185_v36, %v2250_v48  ;;  %v2412_v52 = vadd.f32 %v5187_v39, %v2411_v49  ;;  %vm2428_vm11 = vweird.f32 %v2407_v47 }
0x1100   :  { %v2259_v54 = vsel %vm2256_vm12, %v2258_v50, %v2254_v29  ;;  %vm2433_vm14 = vcmp.eq.f32.partialorder %v2432_v9, 8.507059e+37  ;;  %v4990_v50 = vld [vmem:[%s6514_s3 + $0x7c] sm:$0xf0] }
0x1101   :  { %v2260_v60 = vmul.f32 %v5177_v18, %v2259_v54  ;;  %v2416_v19 = vsel %vm2415_vm4, %v5187_v39, %v2412_v52  ;;  %v2435_v18 = vor.u32 1.1754944e-38, %v2434_v5  ;;  %v2507_v39 = vld [vmem:[%s6517_s6 + $0x45] ss:$0 sm:$0xff]  ;;  %v4991_v54 = vld [vmem:[%s6514_s3 + $0x84] sm:$0xf0]  ;;  %v5007_v5 = vld [vmem:[%s6515_s4 + $0x278] sm:$0xff] }
0x1102   :  { %v2421_v1 = vsel %vm2418_vm9, %v2420_v58, %v2416_v19  ;;  %v4519_v52 = vld [vmem:[%s6514_s3 + $0x80] sm:$0xf0]  ;;  %v4526_v56 = vor.u32 %v4991_v54, %v4525_v53  ;;  %v4994_v53 = vld [vmem:[%s6515_s4 + $0x210] sm:$0xff] }
0x1103   :  { %v5189_v7 = vpop.eup %5188  ;;  %4498 = vmatmul.msk.f32.vlgmr.msrb.gmra.mxu3 %vm2278_vm13, %v2260_v60  ;;  %v2422_v12 = vmul.f32 %v5967_v20, %v2421_v1  ;;  %v4522_v55 = vor.u32 %v4987_v51, %v4519_v52  ;;  %v4530_v60 = vor.u32 %v4988_v57, %v4527_v59  ;;  %v5015_v1 = vld [vmem:[%s6515_s4 + $0x2b8] sm:$0xff]  ;;  %v5017_v52 = vld [vmem:[%s6515_s4 + $0x2c8] sm:$0xff]  ;;  %v5002_v54 = vld [vmem:[%s6515_s4 + $0x250] sm:$0xff] }
0x1104   :  { %v2424_v62 = vmul.f32 %v5189_v7, %v2407_v47  ;;  %v2439_v63 = vpop.permute.xlu2 %2438  ;;  %vm2429_vm10 = vweird.f32 %v5189_v7  ;;  %v4993_v57 = vld [vmem:[%s6515_s4 + $0x208] sm:$0xff] }
0x1105   :  { %4505 = vmatpush.msk.msra.mxu3 %vm2282_vm7, %v2439_v63  ;;  %vm2430_vm12 = vmor %vm2428_vm11, %vm2429_vm10  ;;  %2652 = vmatpush.bf16.msrb.mxu1 %v4530_v60  ;;  %v5001_v59 = vld [vmem:[%s6515_s4 + $0x248] sm:$0xff]  ;;  %v4992_v60 = vld [vmem:[%s6515_s4 + $0x200] sm:$0xff] }
0x1106   :  { %v2425_v2 = vsub.f32 1.0, %v2424_v62 }
0x1107   :  { %2626 = vmatpush.bf16.msrb.mxu3 %v4522_v55  ;;  %v5008_v55 = vld [vmem:[%s6515_s4 + $0x280] sm:$0xff] }
0x1108   :  { %v2426_v3 = vmul.f32 %v5189_v7, %v2425_v2  ;;  %v5023_v2 = vld [vmem:[%s6515_s4 + $0x2f8] sm:$0xff] }
0x1109   :  { %v2306_v25 = vpop.permute.xlu1 %2305 }
0x110a   :  { %v2427_v13 = vadd.f32 %v5189_v7, %v2426_v3  ;;  %4499 = vmatpush.msk.msra.mxu0 %vm2282_vm7, %v2306_v25  ;;  %v4999_v3 = vld [vmem:[%s6515_s4 + $0x238] sm:$0xff]  ;;  %v5014_v25 = vld [vmem:[%s6515_s4 + $0x2b0] sm:$0xff] }
0x110b   :  { %4500 = vmatmul.msk.f32.vlgmr.msra.gmra.mxu0 %vm2278_vm13, %v2275_v6  ;;  %4506 = vmatmul.msk.f32.vlgmr.msra.gmra.mxu3 %vm2278_vm13, %v2422_v12  ;;  %v5022_v6 = vld [vmem:[%s6515_s4 + $0x2f0] sm:$0xff] }
0x110c   :  { %v2431_v61 = vsel %vm2430_vm12, %v5189_v7, %v2427_v13  ;;  %4507 = vmatpush.msk.msrb.mxu0 %vm2282_vm7, %v2466_v15  ;;  %2872 = vmatpush.bf16.msra.mxu3 %v5007_v5  ;;  %v4998_v13 = vld [vmem:[%s6515_s4 + $0x230] sm:$0xff] }
0x110d   :  { %v2436_v14 = vsel %vm2433_vm14, %v2435_v18, %v2431_v61  ;;  %v5006_v15 = vld [vmem:[%s6515_s4 + $0x270] sm:$0xff] }
0x110e   :  { %v2437_v17 = vmul.f32 %v5972_v30, %v2436_v14  ;;  %2639 = vmatpush.bf16.msra.mxu0 %v4526_v56  ;;  %v5016_v56 = vld [vmem:[%s6515_s4 + $0x2c0] sm:$0xff] }
0x1110   :  { %2873 = vmatpush.bf16.msra.mxu3 %v5006_v15 }
0x1113   :  { %4508 = vmatmul.msk.f32.vlgmr.msrb.gmra.mxu0 %vm2278_vm13, %v2437_v17  ;;  %v5013_v17 = vld [vmem:[%s6515_s4 + $0x2a8] sm:$0xff] }
0x1114   :  { %2885 = vmatpush.bf16.msrb.mxu0 %v5015_v1 }
0x1118   :  { %2886 = vmatpush.bf16.msrb.mxu0 %v5014_v25 }
0x111c   :  { %2887 = vmatpush.bf16.msrb.mxu0 %v5013_v17 }
0x1186   :  { %v2302_v20 = vpop.f32.mrf.mxu3 }
0x1188   :  { %v2329_v21 = vpop.f32.mrf.mxu0 }
0x118e   :  { %v2462_v22 = vpop.f32.mrf.mxu3 }
0x1190   :  { %v2489_v23 = vpop.f32.mrf.mxu0 }
0x1191   :  { %v5082_v26 = vpack.i.bf16 %v2462_v22, %v2489_v23  ;;  %v5005_v22 = vld [vmem:[%s6515_s4 + $0x268] sm:$0xff]  ;;  %v5012_v23 = vld [vmem:[%s6515_s4 + $0x2a0] sm:$0xff] }
0x1192   :  { %2874 = vmatpush.bf16.msra.mxu3 %v5005_v22  ;;  %2888 = vmatpush.bf16.msrb.mxu0 %v5012_v23 }
0x1193   :  { %5083 = vrot.lane.b32.xlu1 %v5082_v26, %s5267_s23  ;;  %v5020_v26 = vld [vmem:[%s6515_s4 + $0x2e0] sm:$0xff] }
0x1196   :  { %2875 = vmatpush.bf16.msra.mxu3 %v5004_v31 }
0x1205   :  { %v5084_v30 = vpop.permute.xlu1 %5083 }
0x1206   :  { %v5086_v34 = vunpack.i.h.bf16 %v5084_v30  ;;  %v5085_v4 = vunpack.i.l.bf16 %v5084_v30  ;;  %v5011_v30 = vld [vmem:[%s6515_s4 + $0x298] sm:$0xff] }
0x1207   :  { %2889 = vmatpush.bf16.msrb.mxu0 %v5011_v30  ;;  %v2666_v30 = vld [vmem:[%s6517_s6 + $0x61] ss:$0 sm:$0xff] }
0x1208   :  { %v2501_v24 = vsel %vm235_vm15, %v2329_v21, %v5085_v4  ;;  %v2500_v36 = vsel %vm235_vm15, %v2302_v20, %v5086_v34  ;;  %v5021_v20 = vld [vmem:[%s6515_s4 + $0x2e8] sm:$0xff]  ;;  %v5019_v34 = vld [vmem:[%s6515_s4 + $0x2d8] sm:$0xff] }
0x1209   :  { %v2503_v8 = vrot.slane %v2501_v24, 4  ;;  %v4997_v21 = vld [vmem:[%s6515_s4 + $0x228] sm:$0xff]  ;;  %v4995_v24 = vld [vmem:[%s6515_s4 + $0x218] sm:$0xff] }
0x120b   :  { %v2505_v37 = vsel %vm2282_vm7, %v2500_v36, %v2503_v8  ;;  %v5003_v8 = vld [vmem:[%s6515_s4 + $0x258] sm:$0xff] }
0x120c   :  { %v2506_v38 = vpack.c.bf16 %v2505_v37, %v2505_v37  ;;  %2876 = vmatpush.bf16.msra.mxu3 %v5003_v8 }
0x120e   :  { %4513 = vmatmul.msk.bf16.vlgmr.msra.gmra.mxu1 %vm112_vm0, %v2506_v38  ;;  %v5010_v38 = vld [vmem:[%s6515_s4 + $0x290] sm:$0xff] }
0x120f   :  { %2898 = vmatpush.bf16.msra.mxu1 %v5023_v2  ;;  %2890 = vmatpush.bf16.msrb.mxu0 %v5010_v38 }
0x1210   :  { %2877 = vmatpush.bf16.msra.mxu3 %v5002_v54 }
0x1213   :  { %2899 = vmatpush.bf16.msra.mxu1 %v5022_v6 }
0x1214   :  { %2878 = vmatpush.bf16.msra.mxu3 %v5001_v59 }
0x1217   :  { %2900 = vmatpush.bf16.msra.mxu1 %v5021_v20 }
0x121b   :  { %2901 = vmatpush.bf16.msra.mxu1 %v5020_v26 }
0x121f   :  { %2902 = vmatpush.bf16.msra.mxu1 %v5019_v34 }
0x128b   :  { %v2524_v40 = vpop.f32.mrf.mxu1 }
0x128c   :  { %v2525_v41 = vadd.f32 %v2524_v40, %v2507_v39  ;;  %v5018_v39 = vld [vmem:[%s6515_s4 + $0x2d0] sm:$0xff] }
0x128d   :  { %2903 = vmatpush.bf16.msra.mxu1 %v5018_v39 }
0x128e   :  { %v6013_v42 = vadd.f32 %v2525_v41, %v5741_v11  ;;  %v4517_v11 = vld [vmem:[%s6514_s3 + $0x68] sm:$0xf] }
0x128f   :  { %v4518_v29 = vor.u32 %v4990_v50, %v4517_v11 }
0x1290   :  { %v2531_v43 = vsel %vm112_vm0, %v6013_v42, 0.0 }
0x1291   :  { %2532 = vadd.xlane.f32.xlu0 %v2531_v43  ;;  %2613 = vmatpush.bf16.msra.mxu2 %v4518_v29  ;;  %v2529_v43 = vld [vmem:[%s6517_s6 + $0x46] ss:$0 sm:$0xff] }
0x1292   :  { %2904 = vmatpush.bf16.msra.mxu1 %v5017_v52 }
0x1293   :  { %v2526_v44 = vpop.f32.mrf.mxu1 }
0x1295   :  { %2859 = vmatpush.bf16.msrb.mxu2 %v4999_v3 }
0x1296   :  { %2905 = vmatpush.bf16.msra.mxu1 %v5016_v56 }
0x1299   :  { %2860 = vmatpush.bf16.msrb.mxu2 %v4998_v13 }
0x129d   :  { %2861 = vmatpush.bf16.msrb.mxu2 %v4997_v21 }
0x12a1   :  { %2862 = vmatpush.bf16.msrb.mxu2 %v4996_v28 }
0x12a5   :  { %2863 = vmatpush.bf16.msrb.mxu2 %v4995_v24 }
0x12a9   :  { %2864 = vmatpush.bf16.msrb.mxu2 %v4994_v53 }
0x12ad   :  { %2865 = vmatpush.bf16.msrb.mxu2 %v4993_v57 }
0x12b1   :  { %2866 = vmatpush.bf16.msrb.mxu2 %v4992_v60 }
0x1304   :  { %v2533_v45 = vpop.xlane.xlu0 %2532 }
0x1305   :  { %v2534_v46 = vmul.f32 %v2533_v45, %v5330_v16 }
0x1307   :  { %v6019_v47 = vsub.f32 %v6013_v42, %v2534_v46 }
0x1309   :  { %v2536_v48 = vmul.f32 %v6019_v47, %v6019_v47  ;;  %v2541_v46 = vmul.f32 %v6019_v47, %v2529_v43  ;;  %v5009_v47 = vld [vmem:[%s6515_s4 + $0x288] sm:$0xff] }
0x130a   :  { %2891 = vmatpush.bf16.msrb.mxu0 %v5009_v47 }
0x130b   :  { %v2537_v49 = vsel %vm112_vm0, %v2536_v48, 0.0 }
0x130c   :  { %2538 = vadd.xlane.f32.xlu2 %v2537_v49  ;;  %v2530_v49 = vld [vmem:[%s6517_s6 + $0x47] ss:$0 sm:$0xff] }
0x130e   :  { %2892 = vmatpush.bf16.msrb.mxu0 %v5008_v55 }
0x137f   :  { %v2539_v7 = vpop.xlane.xlu2 %2538 }
0x1380   :  { %v2540_v27 = vmul.f32 %v2539_v7, %v5346_v33  ;;  %v5000_v7 = vld [vmem:[%s6515_s4 + $0x240] sm:$0xff] }
0x1381   :  { %2879 = vmatpush.bf16.msra.mxu3 %v5000_v7 }
0x1382   :  { %5190 = vrsqrt.f32 %v2540_v27  ;;  %vm2549_vm1 = vcmp.eq.f32.partialorder %v2540_v27, inf  ;;  %v2552_v12 = vand.u32 2147483648, %v2540_v27  ;;  %vm2551_vm2 = vcmp.eq.f32.partialorder %v2540_v27, 0.0 }
0x1388   :  { %v5191_v19 = vpop.eup %5190 }
0x1389   :  { %v2543_v35 = vmul.f32 %v5191_v19, %v2540_v27 }
0x138b   :  { %v2544_v58 = vmul.f32 %v5191_v19, %v2543_v35 }
0x138d   :  { %v2545_v62 = vmul.f32 0.5, %v2544_v58 }
0x138f   :  { %v2546_v63 = vsub.f32 1.5, %v2545_v62 }
0x1391   :  { %v2547_v0 = vmul.f32 %v5191_v19, %v2546_v63 }
0x1393   :  { %v2548_v9 = vmul.f32 %v2547_v0, %v2540_v27 }
0x1395   :  { %v2550_v61 = vsel %vm2549_vm1, %v2540_v27, %v2548_v9  ;;  %v4514_v27 = vld [vmem:[%s6517_s6 + $0x60] ss:$8 sm:$0xf] }
0x1396   :  { %v2553_v18 = vsel %vm2551_vm2, %v2552_v12, %v2550_v61  ;;  %v2577_v19 = vperm.slane %v4514_v27, 2  ;;  %v2578_v35 = vperm.slane %v4514_v27, 3  ;;  %v2575_v1 = vperm.slane %v4514_v27, 0 }
0x1397   :  { %v2554_v14 = vadd.f32 1e-06, %v2553_v18  ;;  %v2576_v2 = vperm.slane %v4514_v27, 1 }
0x1399   :  { %5192 = vrcp.f32 %v2554_v14  ;;  %v2566_v37 = vand.u32 2147483648, %v2554_v14  ;;  %v2564_v41 = vand.u32 2147483647, %v2554_v14  ;;  %vm2560_vm4 = vweird.f32 %v2554_v14 }
0x139b   :  { %v2567_v45 = vor.u32 1.1754944e-38, %v2566_v37  ;;  %vm2565_vm9 = vcmp.eq.f32.partialorder %v2564_v41, 8.507059e+37 }
0x139f   :  { %v5193_v32 = vpop.eup %5192 }
0x13a0   :  { %v2556_v4 = vmul.f32 %v5193_v32, %v2554_v14  ;;  %vm2561_vm3 = vweird.f32 %v5193_v32 }
0x13a1   :  { %vm2562_vm8 = vmor %vm2560_vm4, %vm2561_vm3 }
0x13a2   :  { %v2557_v36 = vsub.f32 1.0, %v2556_v4 }
0x13a4   :  { %v2558_v40 = vmul.f32 %v5193_v32, %v2557_v36 }
0x13a6   :  { %v2559_v44 = vadd.f32 %v5193_v32, %v2558_v40 }
0x13a8   :  { %v2563_v48 = vsel %vm2562_vm8, %v5193_v32, %v2559_v44 }
0x13a9   :  { %v2568_v11 = vsel %vm2565_vm9, %v2567_v45, %v2563_v48 }
0x13aa   :  { %v2569_v50 = vmul.f32 %v2568_v11, %v2541_v46 }
0x13ac   :  { %v2570_v51 = vadd.f32 %v2569_v50, %v2530_v49  ;;  %v4735_v49 = vld [vmem:[%s6514_s3 + $0x90] sm:$0xf] }
0x13ae   :  { %v2571_v29 = vpack.c.bf16 %v2570_v51, %v2570_v51 }
0x13b0   :  { %4531 = vmatmul.msk.bf16.vlgmr.msra.gmra.mxu2 %vm112_vm0, %v2571_v29  ;;  %4532 = vmatmul.msk.bf16.vlgmr.msrb.gmra.mxu3 %vm112_vm0, %v2571_v29 }
0x13b1   :  { %4533 = vmatmul.msk.bf16.vlgmr.msra.gmra.mxu0 %vm112_vm0, %v2571_v29  ;;  %4534 = vmatmul.msk.bf16.vlgmr.msrb.gmra.mxu1 %vm112_vm0, %v2571_v29 }
0x142e   :  { %v2641_v58 = vpop.f32.mrf.mxu0  ;;  %v2654_v62 = vpop.f32.mrf.mxu1 }
0x142f   :  { %v2642_v63 = vadd.f32 %v2641_v58, %v2577_v19  ;;  %v2655_v0 = vadd.f32 %v2654_v62, %v2578_v35 }
0x1431   :  { %v2660_v3 = vmax.f32 %v2642_v63, 0.0  ;;  %v2661_v5 = vmax.f32 %v2655_v0, 0.0  ;;  %v2984_v0 = vld [vmem:[%s6517_s6 + $0x62] ss:$0 sm:$0xff] }
0x1433   :  { %v2664_v9 = vpack.c.bf16 %v2660_v3, %v2660_v3  ;;  %v2665_v25 = vpack.c.bf16 %v2661_v5, %v2661_v5  ;;  %v2615_v6 = vpop.f32.mrf.mxu2  ;;  %v2628_v12 = vpop.f32.mrf.mxu3 }
0x1434   :  { %v2616_v13 = vadd.f32 %v2615_v6, %v2575_v1  ;;  %v2629_v15 = vadd.f32 %v2628_v12, %v2576_v2 }
0x1435   :  { %2893 = vmatmul.bf16.vlgmr.msrb.gmra.mxu0 %v2664_v9  ;;  %2906 = vmatmul.bf16.vlgmr.msra.gmra.mxu1 %v2665_v25  ;;  %v2985_v9 = vld [vmem:[%s6517_s6 + $0x63] ss:$0 sm:$0xff] }
0x1436   :  { %v2658_v61 = vmax.f32 %v2616_v13, 0.0  ;;  %v2659_v18 = vmax.f32 %v2629_v15, 0.0  ;;  %v2643_v14 = vpop.f32.mrf.mxu0  ;;  %v2656_v17 = vpop.f32.mrf.mxu1  ;;  %v3027_v15 = vld [vmem:[%s6517_s6 + $0x64] ss:$0 sm:$0xff] }
0x1438   :  { %v2662_v20 = vpack.c.bf16 %v2658_v61, %v2658_v61  ;;  %v2663_v21 = vpack.c.bf16 %v2659_v18, %v2659_v18 }
0x143a   :  { %2867 = vmatmul.bf16.vlgmr.msrb.gmra.mxu2 %v2662_v20  ;;  %2880 = vmatmul.bf16.vlgmr.msra.gmra.mxu3 %v2663_v21 }
0x143b   :  { %v2617_v22 = vpop.f32.mrf.mxu2  ;;  %v2630_v23 = vpop.f32.mrf.mxu3 }
0x14b2   :  { %v2894_v26 = vpop.f32.mrf.mxu0  ;;  %v2907_v28 = vpop.f32.mrf.mxu1 }
0x14ba   :  { %v2896_v31 = vpop.f32.mrf.mxu0  ;;  %v2909_v32 = vpop.f32.mrf.mxu1 }
0x14bd   :  { %v2868_v34 = vpop.f32.mrf.mxu2  ;;  %v2881_v4 = vpop.f32.mrf.mxu3 }
0x14be   :  { %v2869_v24 = vadd.f32 %v2868_v34, %v2666_v30 }
0x14c0   :  { %v2882_v8 = vadd.f32 %v2881_v4, %v2869_v24 }
0x14c2   :  { %v2895_v36 = vadd.f32 %v2894_v26, %v2882_v8 }
0x14c4   :  { %v2908_v37 = vadd.f32 %v2907_v28, %v2895_v36 }
0x14c5   :  { %v2870_v38 = vpop.f32.mrf.mxu2  ;;  %v2883_v39 = vpop.f32.mrf.mxu3 }
0x14c6   :  { %v6163_v40 = vadd.f32 %v2908_v37, %v6013_v42  ;;  %v5027_v42 = vld [vmem:[%s6514_s3 + $0xa4] sm:$0xf0] }
0x14c7   :  { %v4736_v11 = vor.u32 %v5027_v42, %v4735_v49 }
0x14c8   :  { %v2986_v41 = vsel %vm112_vm0, %v6163_v40, 0.0 }
0x14c9   :  { %2987 = vadd.xlane.f32.xlu1 %v2986_v41  ;;  %3044 = vmatpush.bf16.msra.mxu2 %v4736_v11 }
0x153c   :  { %v2988_v43 = vpop.xlane.xlu1 %2987 }
0x153d   :  { %v2989_v44 = vmul.f32 %v2988_v43, %v5330_v16 }
0x153f   :  { %v2990_v45 = vsub.f32 %v6163_v40, %v2989_v44 }
0x1541   :  { %v2991_v46 = vmul.f32 %v2990_v45, %v2990_v45  ;;  %v2996_v3 = vmul.f32 %v2990_v45, %v2984_v0 }
0x1543   :  { %v2992_v48 = vsel %vm112_vm0, %v2991_v46, 0.0 }
0x1544   :  { %2993 = vadd.xlane.f32.xlu0 %v2992_v48 }
0x15b7   :  { %v2994_v50 = vpop.xlane.xlu0 %2993 }
0x15b8   :  { %v2995_v51 = vmul.f32 %v2994_v50, %v5346_v33 }
0x15ba   :  { %5194 = vrsqrt.f32 %v2995_v51  ;;  %vm3004_vm10 = vcmp.eq.f32.partialorder %v2995_v51, inf  ;;  %v3007_v57 = vand.u32 2147483648, %v2995_v51  ;;  %vm3006_vm11 = vcmp.eq.f32.partialorder %v2995_v51, 0.0 }
0x15c0   :  { %v5195_v29 = vpop.eup %5194 }
0x15c1   :  { %v2998_v47 = vmul.f32 %v5195_v29, %v2995_v51 }
0x15c3   :  { %v2999_v52 = vmul.f32 %v5195_v29, %v2998_v47 }
0x15c5   :  { %v3000_v53 = vmul.f32 0.5, %v2999_v52 }
0x15c7   :  { %v3001_v54 = vsub.f32 1.5, %v3000_v53 }
0x15c9   :  { %v3002_v55 = vmul.f32 %v5195_v29, %v3001_v54 }
0x15cb   :  { %v3003_v56 = vmul.f32 %v3002_v55, %v2995_v51 }
0x15cd   :  { %v3005_v59 = vsel %vm3004_vm10, %v2995_v51, %v3003_v56 }
0x15ce   :  { %v3008_v60 = vsel %vm3006_vm11, %v3007_v57, %v3005_v59 }
0x15cf   :  { %v3009_v7 = vadd.f32 1e-06, %v3008_v60 }
0x15d1   :  { %5196 = vrcp.f32 %v3009_v7  ;;  %v3021_v58 = vand.u32 2147483648, %v3009_v7  ;;  %v3019_v63 = vand.u32 2147483647, %v3009_v7  ;;  %vm3015_vm14 = vweird.f32 %v3009_v7 }
0x15d3   :  { %v3022_v2 = vor.u32 1.1754944e-38, %v3021_v58  ;;  %vm3020_vm2 = vcmp.eq.f32.partialorder %v3019_v63, 8.507059e+37 }
0x15d7   :  { %v5197_v27 = vpop.eup %5196 }
0x15d8   :  { %v3011_v19 = vmul.f32 %v5197_v27, %v3009_v7  ;;  %vm3016_vm12 = vweird.f32 %v5197_v27 }
0x15d9   :  { %vm3017_vm1 = vmor %vm3015_vm14, %vm3016_vm12 }
0x15da   :  { %v3012_v35 = vsub.f32 1.0, %v3011_v19 }
0x15dc   :  { %v3013_v62 = vmul.f32 %v5197_v27, %v3012_v35 }
0x15de   :  { %v3014_v1 = vadd.f32 %v5197_v27, %v3013_v62 }
0x15e0   :  { %v3018_v5 = vsel %vm3017_vm1, %v5197_v27, %v3014_v1 }
0x15e1   :  { %v3023_v25 = vsel %vm3020_vm2, %v3022_v2, %v3018_v5 }
0x15e2   :  { %v3024_v6 = vmul.f32 %v3023_v25, %v2996_v3 }
0x15e4   :  { %v3025_v12 = vadd.f32 %v3024_v6, %v2985_v9 }
0x15e6   :  { %v3026_v13 = vpack.c.bf16 %v3025_v12, %v3025_v12 }
0x15e8   :  { %4737 = vmatmul.msk.bf16.vlgmr.msra.gmra.mxu2 %vm112_vm0, %v3026_v13 }
0x166b   :  { %v3046_v61 = vpop.f32.mrf.mxu2 }
0x166c   :  { %v6187_v18 = vadd.f32 %v3046_v61, %v3027_v15 }
0x166e   :  { %3052 = vrot.lane.b32.xlu2 %v6187_v18, %s5263_s19  ;;  %v6192_v14 = vrot.slane %v6187_v18, 4 }
0x1670   :  { %3238 = vrot.lane.b32.xlu0 %v6192_v14, %s5262_s18  ;;  %3078 = vrot.lane.b32.xlu1 %v6192_v14, %s5263_s19 }
0x1673   :  { %v3048_v17 = vpop.f32.mrf.mxu2 }
0x1676   :  { %3210 = vrot.lane.b32.xlu2 %v6187_v18, %s5262_s18 }
0x1678   :  { %3236 = vrot.lane.b32.xlu0 %v6192_v14, %s5264_s20  ;;  %3208 = vrot.lane.b32.xlu1 %v6187_v18, %s5264_s20 }
0x16c8   :  { %v3053_v20 = vpop.permute.xlu2 %3052 }
0x16c9   :  { %4738 = vmatpush.xpose.msk.msrb.mxu3 %vm235_vm15, %v3053_v20 }
0x16cc   :  { %4739 = vmatmul.msk.f32.vlgmr.msrb.gmra.mxu3 %vm235_vm15, %v6187_v18 }
0x16d0   :  { %v3211_v21 = vpop.permute.xlu2 %3210 }
0x16d1   :  { %4746 = vmatpush.xpose.msk.msrb.mxu1 %vm235_vm15, %v3211_v21 }
0x16e2   :  { %v3239_v22 = vpop.permute.xlu0 %3238  ;;  %v3079_v23 = vpop.permute.xlu1 %3078 }
0x16e3   :  { %4740 = vmatpush.xpose.msk.msra.mxu0 %vm235_vm15, %v3079_v23  ;;  %4748 = vmatpush.xpose.msk.msrb.mxu2 %vm235_vm15, %v3239_v22 }
0x16e6   :  { %4741 = vmatmul.msk.f32.vlgmr.msra.gmra.mxu0 %vm235_vm15, %v6192_v14 }
0x16ea   :  { %v3237_v26 = vpop.permute.xlu0 %3236  ;;  %v3209_v28 = vpop.permute.xlu1 %3208 }
0x16eb   :  { %4747 = vmatmul.msk.f32.vlgmr.msrb.gmra.mxu1 %vm235_vm15, %v3209_v28  ;;  %4749 = vmatmul.msk.f32.vlgmr.msrb.gmra.mxu2 %vm235_vm15, %v3237_v26 }
0x174f   :  { %v3075_v31 = vpop.f32.mrf.mxu3 }
0x1750   :  { %v3104_v32 = vmul.f32 0.35355338, %v3075_v31 }
0x1752   :  { %v3106_v30 = vsel %vm2227_vm6, %v3104_v32, -inf }
0x1753   :  { %3107 = vmax.xlane.f32.xlu2 %v3106_v30 }
0x1763   :  { %v3101_v34 = vpop.f32.mrf.mxu0 }
0x1764   :  { %v3105_v4 = vmul.f32 0.35355338, %v3101_v34 }
0x1766   :  { %v3109_v24 = vsel %vm2227_vm6, %v3105_v4, -inf }
0x1767   :  { %3110 = vmax.xlane.f32.xlu0 %v3109_v24 }
0x1768   :  { %v3233_v8 = vpop.f32.mrf.mxu1 }
0x1769   :  { %v3264_v36 = vmul.f32 0.35355338, %v3233_v8 }
0x176b   :  { %v3266_v37 = vsel %vm2227_vm6, %v3264_v36, -inf }
0x176c   :  { %3267 = vmax.xlane.f32.xlu1 %v3266_v37 }
0x176e   :  { %v3261_v38 = vpop.f32.mrf.mxu2 }
0x176f   :  { %v3265_v39 = vmul.f32 0.35355338, %v3261_v38 }
0x1771   :  { %v3269_v41 = vsel %vm2227_vm6, %v3265_v39, -inf }
0x1772   :  { %3270 = vmax.xlane.f32.xlu2 %v3269_v41 }
0x177b   :  { %3314 = vrot.lane.b32.xlu0 %v6187_v18, %s5266_s22 }
0x17c6   :  { %v3108_v43 = vpop.xlane.xlu2 %3107 }
0x17c7   :  { %v3112_v44 = vsub.f32 %v3104_v32, %v3108_v43 }
0x17c9   :  { %v3114_v45 = vmul.f32 1.442695, %v3112_v44 }
0x17cb   :  { %5198 = vpow2.f32 %v3114_v45 }
0x17d1   :  { %v6220_v46 = vpop.eup %5198 }
0x17d2   :  { %v3118_v48 = vsel %vm2227_vm6, %v6220_v46, 0.0 }
0x17d3   :  { %3119 = vadd.xlane.f32.xlu0 %v3118_v48 }
0x17da   :  { %v3111_v49 = vpop.xlane.xlu0 %3110 }
0x17db   :  { %v3113_v42 = vsub.f32 %v3105_v4, %v3111_v49 }
0x17dd   :  { %v3116_v11 = vmul.f32 1.442695, %v3113_v42 }
0x17df   :  { %5200 = vpow2.f32 %v3116_v11  ;;  %v3268_v50 = vpop.xlane.xlu1 %3267 }
0x17e0   :  { %v3272_v51 = vsub.f32 %v3264_v36, %v3268_v50 }
0x17e2   :  { %v3274_v29 = vmul.f32 1.442695, %v3272_v51 }
0x17e4   :  { %5202 = vpow2.f32 %v3274_v29 }
0x17e5   :  { %v5201_v47 = vpop.eup %5200  ;;  %v3271_v52 = vpop.xlane.xlu2 %3270 }
0x17e6   :  { %v3273_v53 = vsub.f32 %v3265_v39, %v3271_v52  ;;  %v3121_v54 = vsel %vm2227_vm6, %v5201_v47, 0.0 }
0x17e7   :  { %3122 = vadd.xlane.f32.xlu1 %v3121_v54 }
0x17e8   :  { %v3276_v55 = vmul.f32 1.442695, %v3273_v53 }
0x17ea   :  { %v6225_v56 = vpop.eup %5202  ;;  %5204 = vpow2.f32 %v3276_v55 }
0x17eb   :  { %v3278_v57 = vsel %vm2227_vm6, %v6225_v56, 0.0 }
0x17ec   :  { %3279 = vadd.xlane.f32.xlu2 %v3278_v57 }
0x17ed   :  { %v6239_v7 = vpop.permute.xlu0 %3314 }
0x17f0   :  { %v6229_v59 = vpop.eup %5204 }
0x17f1   :  { %v3281_v60 = vsel %vm2227_vm6, %v6229_v59, 0.0 }
0x17f2   :  { %3282 = vadd.xlane.f32.xlu0 %v3281_v60  ;;  %v4754_v60 = vld [vmem:[%s6514_s3 + $0xa8] sm:$0xf0] }
0x1800   :  { %3154 = vrot.lane.b32.xlu1 %v6187_v18, %s5265_s21 }
0x1804   :  { %3181 = vrot.lane.b32.xlu2 %v6192_v14, %s5265_s21 }
0x1806   :  { %3341 = vrot.lane.b32.xlu0 %v6192_v14, %s5266_s22 }
0x1846   :  { %v3120_v27 = vpop.xlane.xlu0 %3119 }
0x1847   :  { %5206 = vrcp.f32 %v3120_v27  ;;  %v3135_v14 = vand.u32 2147483648, %v3120_v27  ;;  %vm3129_vm9 = vweird.f32 %v3120_v27  ;;  %v3133_v21 = vand.u32 2147483647, %v3120_v27 }
0x1849   :  { %v3136_v30 = vor.u32 1.1754944e-38, %v3135_v14  ;;  %vm3134_vm12 = vcmp.eq.f32.partialorder %v3133_v21, 8.507059e+37  ;;  %v5028_v14 = vld [vmem:[%s6514_s3 + $0xac] sm:$0xf0]  ;;  %v4764_v21 = vld [vmem:[%s6514_s3 + $0xb0] sm:$0xf0] }
0x184d   :  { %v5207_v19 = vpop.eup %5206 }
0x184e   :  { %v3125_v58 = vmul.f32 %v5207_v19, %v3120_v27  ;;  %vm3130_vm3 = vweird.f32 %v5207_v19 }
0x184f   :  { %vm3131_vm11 = vmor %vm3129_vm9, %vm3130_vm3 }
0x1850   :  { %v3126_v63 = vsub.f32 1.0, %v3125_v58 }
0x1852   :  { %v3127_v2 = vmul.f32 %v5207_v19, %v3126_v63 }
0x1854   :  { %v3128_v61 = vadd.f32 %v5207_v19, %v3127_v2 }
0x1856   :  { %v3132_v28 = vsel %vm3131_vm11, %v5207_v19, %v3128_v61 }
0x1857   :  { %v3137_v4 = vsel %vm3134_vm12, %v3136_v30, %v3132_v28 }
0x1858   :  { %v3138_v44 = vmul.f32 %v6220_v46, %v3137_v4 }
0x185a   :  { %v3123_v35 = vpop.xlane.xlu1 %3122 }
0x185b   :  { %5208 = vrcp.f32 %v3123_v35  ;;  %v3150_v5 = vand.u32 2147483648, %v3123_v35  ;;  %v3148_v12 = vand.u32 2147483647, %v3123_v35  ;;  %vm3144_vm4 = vweird.f32 %v3123_v35 }
0x185d   :  { %v3151_v17 = vor.u32 1.1754944e-38, %v3150_v5  ;;  %vm3149_vm10 = vcmp.eq.f32.partialorder %v3148_v12, 8.507059e+37 }
0x185f   :  { %v6241_v62 = vpop.xlane.xlu2 %3279 }
0x1860   :  { %5210 = vrcp.f32 %v6241_v62  ;;  %v3295_v37 = vand.u32 2147483648, %v6241_v62  ;;  %vm3289_vm2 = vweird.f32 %v6241_v62  ;;  %v3293_v41 = vand.u32 2147483647, %v6241_v62 }
0x1861   :  { %v5209_v0 = vpop.eup %5208 }
0x1862   :  { %v3140_v1 = vmul.f32 %v5209_v0, %v3123_v35  ;;  %vm3145_vm6 = vweird.f32 %v5209_v0  ;;  %v3296_v42 = vor.u32 1.1754944e-38, %v3295_v37  ;;  %vm3294_vm9 = vcmp.eq.f32.partialorder %v3293_v41, 8.507059e+37  ;;  %v5053_v41 = vld [vmem:[%s6515_s4 + $0x3b8] sm:$0xff] }
0x1863   :  { %vm3146_vm8 = vmor %vm3144_vm4, %vm3145_vm6 }
0x1864   :  { %v3141_v3 = vsub.f32 1.0, %v3140_v1  ;;  %v3383_v1 = vld [vmem:[%s6517_s6 + $0x65] ss:$0 sm:$0xff] }
0x1865   :  { %v3283_v9 = vpop.xlane.xlu0 %3282 }
0x1866   :  { %v5211_v25 = vpop.eup %5210  ;;  %v3142_v6 = vmul.f32 %v5209_v0, %v3141_v3  ;;  %5212 = vrcp.f32 %v3283_v9  ;;  %v3310_v36 = vand.u32 2147483648, %v3283_v9  ;;  %v3308_v39 = vand.u32 2147483647, %v3283_v9 }
0x1867   :  { %v3285_v13 = vmul.f32 %v5211_v25, %v6241_v62  ;;  %v3182_v15 = vpop.permute.xlu2 %3181  ;;  %vm3290_vm14 = vweird.f32 %v5211_v25  ;;  %vm3304_vm3 = vweird.f32 %v3283_v9 }
0x1868   :  { %v3143_v18 = vadd.f32 %v5209_v0, %v3142_v6  ;;  %4744 = vmatpush.msk.msrb.mxu0 %vm2282_vm7, %v3182_v15  ;;  %vm3291_vm6 = vmor %vm3289_vm2, %vm3290_vm14  ;;  %v3311_v49 = vor.u32 1.1754944e-38, %v3310_v36 }
0x1869   :  { %v3286_v20 = vsub.f32 1.0, %v3285_v13 }
0x186a   :  { %v3147_v22 = vsel %vm3146_vm8, %v5209_v0, %v3143_v18  ;;  %vm3309_vm8 = vcmp.eq.f32.partialorder %v3308_v39, 8.507059e+37  ;;  %v4762_v18 = vld [vmem:[%s6514_s3 + $0x98] sm:$0xf] }
0x186b   :  { %v3152_v23 = vsel %vm3149_vm10, %v3151_v17, %v3147_v22  ;;  %v3287_v31 = vmul.f32 %v5211_v25, %v3286_v20  ;;  %v5025_v17 = vld [vmem:[%s6514_s3 + $0x9c] sm:$0xf]  ;;  %v4763_v20 = vor.u32 %v5028_v14, %v4762_v18  ;;  %v4770_v22 = vld [vmem:[%s6514_s3 + $0xa0] sm:$0xf] }
0x186c   :  { %v5213_v26 = vpop.eup %5212  ;;  %v3153_v32 = vmul.f32 %v5201_v47, %v3152_v23  ;;  %v5029_v23 = vld [vmem:[%s6514_s3 + $0xb4] sm:$0xf0] }
0x186d   :  { %v3300_v34 = vmul.f32 %v5213_v26, %v3283_v9  ;;  %v3288_v8 = vadd.f32 %v5211_v25, %v3287_v31  ;;  %vm3305_vm1 = vweird.f32 %v5213_v26  ;;  %v4771_v28 = vor.u32 %v5029_v23, %v4770_v22  ;;  %v5026_v31 = vld [vmem:[%s6514_s3 + $0xa4] sm:$0xf]  ;;  %3489 = vmatpush.bf16.msra.mxu2 %v4763_v20  ;;  %v5032_v22 = vld [vmem:[%s6515_s4 + $0x310] sm:$0xff] }
0x186e   :  { %4745 = vmatmul.msk.f32.vlgmr.msrb.gmra.mxu0 %vm2278_vm13, %v3153_v32  ;;  %vm3306_vm4 = vmor %vm3304_vm3, %vm3305_vm1  ;;  %v4772_v32 = vld [vmem:[%s6514_s3 + $0xb8] sm:$0xf0]  ;;  %v5040_v23 = vld [vmem:[%s6515_s4 + $0x350] sm:$0xff] }
0x186f   :  { %v3301_v24 = vsub.f32 1.0, %v3300_v34  ;;  %v3292_v48 = vsel %vm3291_vm6, %v5211_v25, %v3288_v8  ;;  %v4775_v30 = vor.u32 %v5026_v31, %v4772_v32  ;;  %v5031_v31 = vld [vmem:[%s6515_s4 + $0x308] sm:$0xff] }
0x1870   :  { %v3297_v51 = vsel %vm3294_vm9, %v3296_v42, %v3292_v48  ;;  %v5060_v42 = vld [vmem:[%s6515_s4 + $0x3f0] sm:$0xff]  ;;  %v5039_v32 = vld [vmem:[%s6515_s4 + $0x348] sm:$0xff] }
0x1871   :  { %v3302_v38 = vmul.f32 %v5213_v26, %v3301_v24  ;;  %v3298_v47 = vmul.f32 %v6225_v56, %v3297_v51  ;;  %v5044_v51 = vld [vmem:[%s6515_s4 + $0x370] sm:$0xff] }
0x1872   :  { %v3155_v43 = vpop.permute.xlu1 %3154 }
0x1873   :  { %v3303_v45 = vadd.f32 %v5213_v26, %v3302_v38  ;;  %4742 = vmatpush.msk.msra.mxu3 %vm2282_vm7, %v3155_v43  ;;  %v5061_v43 = vld [vmem:[%s6515_s4 + $0x3f8] sm:$0xff] }
0x1874   :  { %4743 = vmatmul.msk.f32.vlgmr.msra.gmra.mxu3 %vm2278_vm13, %v3138_v44  ;;  %v5037_v44 = vld [vmem:[%s6515_s4 + $0x338] sm:$0xff] }
0x1875   :  { %v3307_v11 = vsel %vm3306_vm4, %v5213_v26, %v3303_v45  ;;  %4750 = vmatpush.msk.msrb.mxu3 %vm2282_vm7, %v6239_v7  ;;  %v4767_v26 = vor.u32 %v5025_v17, %v4764_v21  ;;  %v5045_v45 = vld [vmem:[%s6515_s4 + $0x378] sm:$0xff]  ;;  %3735 = vmatpush.bf16.msrb.mxu2 %v5037_v44  ;;  %v5055_v21 = vld [vmem:[%s6515_s4 + $0x3c8] sm:$0xff] }
0x1876   :  { %v3312_v50 = vsel %vm3309_vm8, %v3311_v49, %v3307_v11  ;;  %v5052_v49 = vld [vmem:[%s6515_s4 + $0x3b0] sm:$0xff] }
0x1877   :  { %v3313_v46 = vmul.f32 %v6229_v59, %v3312_v50  ;;  %v5024_v59 = vld [vmem:[%s6514_s3 + $0x94] sm:$0xf]  ;;  %3502 = vmatpush.bf16.msra.mxu3 %v4767_v26  ;;  %v5046_v26 = vld [vmem:[%s6515_s4 + $0x380] sm:$0xff] }
0x1878   :  { %v3342_v29 = vpop.permute.xlu0 %3341  ;;  %v4757_v7 = vor.u32 %v5024_v59, %v4754_v60  ;;  %v5036_v50 = vld [vmem:[%s6515_s4 + $0x330] sm:$0xff]  ;;  %v5058_v59 = vld [vmem:[%s6515_s4 + $0x3e0] sm:$0xff] }
0x1879   :  { %4752 = vmatpush.msk.msra.mxu0 %vm2282_vm7, %v3342_v29  ;;  %3736 = vmatpush.bf16.msrb.mxu2 %v5036_v50  ;;  %v5034_v60 = vld [vmem:[%s6515_s4 + $0x320] sm:$0xff] }
0x187a   :  { %4753 = vmatmul.msk.f32.vlgmr.msra.gmra.mxu0 %vm2278_vm13, %v3313_v46  ;;  %3398 = vmatpush.bf16.msra.mxu1 %v4757_v7  ;;  %v5042_v7 = vld [vmem:[%s6515_s4 + $0x360] sm:$0xff] }
0x187b   :  { %3515 = vmatpush.bf16.msrb.mxu0 %v4771_v28  ;;  %v5054_v28 = vld [vmem:[%s6515_s4 + $0x3c0] sm:$0xff] }
0x187c   :  { %4751 = vmatmul.msk.f32.vlgmr.msrb.gmra.mxu3 %vm2278_vm13, %v3298_v47 }
0x187d   :  { %3748 = vmatpush.bf16.msrb.mxu3 %v5045_v45 }
0x187e   :  { %3528 = vmatpush.bf16.msrb.mxu1 %v4775_v30  ;;  %v5030_v30 = vld [vmem:[%s6515_s4 + $0x300] sm:$0xff] }
0x187f   :  { %3761 = vmatpush.bf16.msra.mxu0 %v5053_v41 }
0x1881   :  { %3749 = vmatpush.bf16.msrb.mxu3 %v5044_v51 }
0x1883   :  { %3762 = vmatpush.bf16.msra.mxu0 %v5052_v49 }
0x18eb   :  { %v3205_v52 = vpop.f32.mrf.mxu0 }
0x18f7   :  { %v3178_v53 = vpop.f32.mrf.mxu3  ;;  %v3365_v54 = vpop.f32.mrf.mxu0 }
0x18ff   :  { %v3338_v55 = vpop.f32.mrf.mxu3 }
0x1900   :  { %v5087_v57 = vpack.i.bf16 %v3338_v55, %v3365_v54  ;;  %v5035_v54 = vld [vmem:[%s6515_s4 + $0x328] sm:$0xff] }
0x1901   :  { %v5043_v55 = vld [vmem:[%s6515_s4 + $0x368] sm:$0xff]  ;;  %3737 = vmatpush.bf16.msrb.mxu2 %v5035_v54 }
0x1902   :  { %5088 = vrot.lane.b32.xlu1 %v5087_v57, %s5267_s23  ;;  %v5050_v57 = vld [vmem:[%s6515_s4 + $0x3a0] sm:$0xff]  ;;  %3750 = vmatpush.bf16.msrb.mxu3 %v5043_v55 }
0x1905   :  { %3738 = vmatpush.bf16.msrb.mxu2 %v5034_v60 }
0x1906   :  { %3751 = vmatpush.bf16.msrb.mxu3 %v5042_v7 }
0x1974   :  { %v5089_v56 = vpop.permute.xlu1 %5088 }
0x1975   :  { %v5091_v27 = vunpack.i.h.bf16 %v5089_v56  ;;  %v5090_v19 = vunpack.i.l.bf16 %v5089_v56 }
0x1977   :  { %v3377_v35 = vsel %vm235_vm15, %v3205_v52, %v5090_v19  ;;  %v3376_v62 = vsel %vm235_vm15, %v3178_v53, %v5091_v27  ;;  %vm1992_vm15 = vcmask 123904   ;;  %v5051_v52 = vld [vmem:[%s6515_s4 + $0x3a8] sm:$0xff]  ;;  %v5049_v27 = vld [vmem:[%s6515_s4 + $0x398] sm:$0xff] }
0x1978   :  { %v3379_v58 = vrot.slane %v3377_v35, 4  ;;  %v1993_v6 = vsel %vm1992_vm15, %v5938_v10, 0.0  ;;  %v5059_v53 = vld [vmem:[%s6515_s4 + $0x3e8] sm:$0xff]  ;;  %3763 = vmatpush.bf16.msra.mxu0 %v5051_v52  ;;  %v5057_v19 = vld [vmem:[%s6515_s4 + $0x3d8] sm:$0xff] }
0x197a   :  { %v3381_v63 = vsel %vm2282_vm7, %v3376_v62, %v3379_v58  ;;  %v5033_v58 = vld [vmem:[%s6515_s4 + $0x318] sm:$0xff] }
0x197b   :  { %v3382_v0 = vpack.c.bf16 %v3381_v63, %v3381_v63  ;;  %v5041_v62 = vld [vmem:[%s6515_s4 + $0x358] sm:$0xff]  ;;  %3739 = vmatpush.bf16.msrb.mxu2 %v5033_v58 }
0x197c   :  { %3764 = vmatpush.bf16.msra.mxu0 %v5050_v57  ;;  %3752 = vmatpush.bf16.msrb.mxu3 %v5041_v62 }
0x197d   :  { %4758 = vmatmul.msk.bf16.vlgmr.msra.gmra.mxu1 %vm112_vm0, %v3382_v0 }
0x197e   :  { %3774 = vmatpush.bf16.msra.mxu1 %v5061_v43 }
0x197f   :  { %3740 = vmatpush.bf16.msrb.mxu2 %v5032_v22 }
0x1980   :  { %3765 = vmatpush.bf16.msra.mxu0 %v5049_v27  ;;  %3753 = vmatpush.bf16.msrb.mxu3 %v5040_v23  ;;  %v3542_v27 = vld [vmem:[%s6517_s6 + $0x81] ss:$0 sm:$0xff] }
0x1982   :  { %3775 = vmatpush.bf16.msra.mxu1 %v5060_v42 }
0x1983   :  { %3741 = vmatpush.bf16.msrb.mxu2 %v5031_v31 }
0x1984   :  { %3754 = vmatpush.bf16.msrb.mxu3 %v5039_v32  ;;  %v6442_v32 = vld [vmem:[%s6516_s5 + $0x18] sm:$0xff] }
0x1986   :  { %3776 = vmatpush.bf16.msra.mxu1 %v5059_v53 }
0x1987   :  { %3742 = vmatpush.bf16.msrb.mxu2 %v5030_v30  ;;  %v6447_v30 = vld [vmem:[%s6516_s5 + $0x10] sm:$0xff] }
0x198a   :  { %3777 = vmatpush.bf16.msra.mxu1 %v5058_v59 }
0x198e   :  { %3778 = vmatpush.bf16.msra.mxu1 %v5057_v19 }
0x19fa   :  { %v3400_v2 = vpop.f32.mrf.mxu1 }
0x19fb   :  { %v3401_v3 = vadd.f32 %v3400_v2, %v3383_v1  ;;  %v5048_v1 = vld [vmem:[%s6515_s4 + $0x390] sm:$0xff] }
0x19fc   :  { %v5056_v2 = vld [vmem:[%s6515_s4 + $0x3d0] sm:$0xff]  ;;  %3766 = vmatpush.bf16.msra.mxu0 %v5048_v1 }
0x19fd   :  { %v6275_v5 = vadd.f32 %v3401_v3, %v6163_v40  ;;  %3779 = vmatpush.bf16.msra.mxu1 %v5056_v2 }
0x19ff   :  { %v3407_v9 = vsel %vm112_vm0, %v6275_v5, 0.0 }
0x1a00   :  { %3408 = vadd.xlane.f32.xlu2 %v3407_v9 }
0x1a01   :  { %3780 = vmatpush.bf16.msra.mxu1 %v5055_v21 }
0x1a02   :  { %v3402_v25 = vpop.f32.mrf.mxu1 }
0x1a03   :  { %v3405_v25 = vld [vmem:[%s6517_s6 + $0x66] ss:$0 sm:$0xff] }
0x1a05   :  { %3781 = vmatpush.bf16.msra.mxu1 %v5054_v28 }
0x1a08   :  { %1994 = vadd.xlane.f32.xlu2 %v1993_v6 }
0x1a73   :  { %v3409_v12 = vpop.xlane.xlu2 %3408 }
0x1a74   :  { %v3410_v13 = vmul.f32 %v3409_v12, %v5330_v16 }
0x1a76   :  { %v6283_v15 = vsub.f32 %v6275_v5, %v3410_v13 }
0x1a78   :  { %v3412_v40 = vmul.f32 %v6283_v15, %v6283_v15  ;;  %v3417_v13 = vmul.f32 %v6283_v15, %v3405_v25  ;;  %v5047_v15 = vld [vmem:[%s6515_s4 + $0x388] sm:$0xff] }
0x1a79   :  { %3767 = vmatpush.bf16.msra.mxu0 %v5047_v15 }
0x1a7a   :  { %v3413_v61 = vsel %vm112_vm0, %v3412_v40, 0.0 }
0x1a7b   :  { %3414 = vadd.xlane.f32.xlu0 %v3413_v61  ;;  %v3406_v61 = vld [vmem:[%s6517_s6 + $0x67] ss:$0 sm:$0xff] }
0x1a7d   :  { %3768 = vmatpush.bf16.msra.mxu0 %v5046_v26 }
0x1aee   :  { %v3415_v34 = vpop.xlane.xlu0 %3414 }
0x1aef   :  { %v3416_v4 = vmul.f32 %v3415_v34, %v5346_v33  ;;  %v5038_v34 = vld [vmem:[%s6515_s4 + $0x340] sm:$0xff] }
0x1af0   :  { %3755 = vmatpush.bf16.msrb.mxu3 %v5038_v34 }
0x1af1   :  { %5214 = vrsqrt.f32 %v3416_v4  ;;  %vm3425_vm7 = vcmp.eq.f32.partialorder %v3416_v4, inf  ;;  %v3428_v11 = vand.u32 2147483648, %v3416_v4  ;;  %vm3427_vm13 = vcmp.eq.f32.partialorder %v3416_v4, 0.0 }
0x1af7   :  { %v5215_v24 = vpop.eup %5214 }
0x1af8   :  { %v3419_v8 = vmul.f32 %v5215_v24, %v3416_v4 }
0x1afa   :  { %v3420_v36 = vmul.f32 %v5215_v24, %v3419_v8 }
0x1afc   :  { %v3421_v37 = vmul.f32 0.5, %v3420_v36 }
0x1afe   :  { %v3422_v38 = vsub.f32 1.5, %v3421_v37 }
0x1b00   :  { %v3423_v39 = vmul.f32 %v5215_v24, %v3422_v38 }
0x1b02   :  { %v3424_v48 = vmul.f32 %v3423_v39, %v3416_v4 }
0x1b04   :  { %v3426_v46 = vsel %vm3425_vm7, %v3416_v4, %v3424_v48  ;;  %v4759_v4 = vld [vmem:[%s6517_s6 + $0x80] ss:$8 sm:$0xf] }
0x1b05   :  { %v3429_v29 = vsel %vm3427_vm13, %v3428_v11, %v3426_v46  ;;  %v3453_v24 = vperm.slane %v4759_v4, 2  ;;  %v3454_v8 = vperm.slane %v4759_v4, 3  ;;  %v3451_v41 = vperm.slane %v4759_v4, 0 }
0x1b06   :  { %v3430_v47 = vadd.f32 1e-06, %v3429_v29  ;;  %v3452_v43 = vperm.slane %v4759_v4, 1  ;;  %v5092_v4 = vpack.i.bf16 %v6447_v30, %v6442_v32 }
0x1b08   :  { %5216 = vrcp.f32 %v3430_v47  ;;  %v3442_v0 = vand.u32 2147483648, %v3430_v47  ;;  %v3440_v9 = vand.u32 2147483647, %v3430_v47  ;;  %vm3436_vm11 = vweird.f32 %v3430_v47 }
0x1b0a   :  { %v3443_v12 = vor.u32 1.1754944e-38, %v3442_v0  ;;  %vm3441_vm14 = vcmp.eq.f32.partialorder %v3440_v9, 8.507059e+37  ;;  %v1995_v0 = vpop.xlane.xlu2 %1994 }
0x1b0b   :  { %v1996_v25 = vmul.f32 %v1995_v0, %v5330_v16 }
0x1b0e   :  { %v5217_v56 = vpop.eup %5216 }
0x1b0f   :  { %v3432_v35 = vmul.f32 %v5217_v56, %v3430_v47  ;;  %vm3437_vm10 = vweird.f32 %v5217_v56 }
0x1b10   :  { %vm3438_vm12 = vmor %vm3436_vm11, %vm3437_vm10 }
0x1b11   :  { %v3433_v63 = vsub.f32 1.0, %v3432_v35 }
0x1b13   :  { %v3434_v3 = vmul.f32 %v5217_v56, %v3433_v63 }
0x1b15   :  { %v3435_v6 = vadd.f32 %v5217_v56, %v3434_v3 }
0x1b17   :  { %v3439_v40 = vsel %vm3438_vm12, %v5217_v56, %v3435_v6  ;;  %vm3846_vm12 = vcmask 261120  }
0x1b18   :  { %v3444_v18 = vsel %vm3441_vm14, %v3443_v12, %v3439_v40  ;;  %v6430_v40 = vsub.f32 %v5938_v10, %v1996_v25 }
0x1b19   :  { %v3445_v14 = vmul.f32 %v3444_v18, %v3417_v13 }
0x1b1a   :  { %v1998_v18 = vmul.f32 %v6430_v40, %v6430_v40 }
0x1b1b   :  { %v3446_v17 = vadd.f32 %v3445_v14, %v3406_v61 }
0x1b1c   :  { %v1999_v14 = vsel %vm1992_vm15, %v1998_v18, 0.0 }
0x1b1d   :  { %v3447_v20 = vpack.c.bf16 %v3446_v17, %v3446_v17 }
0x1b1f   :  { %4776 = vmatmul.msk.bf16.vlgmr.msra.gmra.mxu2 %vm112_vm0, %v3447_v20  ;;  %4777 = vmatmul.msk.bf16.vlgmr.msra.gmra.mxu3 %vm112_vm0, %v3447_v20 }
0x1b20   :  { %4778 = vmatmul.msk.bf16.vlgmr.msrb.gmra.mxu0 %vm112_vm0, %v3447_v20  ;;  %4779 = vmatmul.msk.bf16.vlgmr.msrb.gmra.mxu1 %vm112_vm0, %v3447_v20 }
0x1b21   :  { %3862 = vmatpush.msra.mxu2 %v6442_v32 }
0x1b23   :  { %3863 = vmatpush.msra.mxu2 %v6447_v30 }
0x1b9d   :  { %v3517_v36 = vpop.f32.mrf.mxu0  ;;  %v3530_v37 = vpop.f32.mrf.mxu1 }
0x1b9e   :  { %v3518_v38 = vadd.f32 %v3517_v36, %v3453_v24  ;;  %v3531_v39 = vadd.f32 %v3530_v37, %v3454_v8  ;;  %v6455_v24 = vld [vmem:[%s6516_s5 + $0x8] sm:$0xff] }
0x1b9f   :  { %3864 = vmatpush.msra.mxu2 %v6455_v24 }
0x1ba0   :  { %v3536_v44 = vmax.f32 %v3518_v38, 0.0  ;;  %v3537_v45 = vmax.f32 %v3531_v39, 0.0 }
0x1ba2   :  { %v3540_v48 = vpack.c.bf16 %v3536_v44, %v3536_v44  ;;  %v3541_v49 = vpack.c.bf16 %v3537_v45, %v3537_v45  ;;  %v3491_v42 = vpop.f32.mrf.mxu2  ;;  %v3504_v11 = vpop.f32.mrf.mxu3 }
0x1ba3   :  { %v3492_v50 = vadd.f32 %v3491_v42, %v3451_v41  ;;  %v3505_v51 = vadd.f32 %v3504_v11, %v3452_v43  ;;  %v3794_v11 = vld [vmem:[%s6517_s6 + $0x82] ss:$0 sm:$0xff] }
0x1ba4   :  { %3769 = vmatmul.bf16.vlgmr.msra.gmra.mxu0 %v3540_v48  ;;  %3782 = vmatmul.bf16.vlgmr.msra.gmra.mxu1 %v3541_v49 }
0x1ba5   :  { %v3534_v46 = vmax.f32 %v3492_v50, 0.0  ;;  %v3535_v29 = vmax.f32 %v3505_v51, 0.0  ;;  %v3519_v47 = vpop.f32.mrf.mxu0  ;;  %v3532_v52 = vpop.f32.mrf.mxu1 }
0x1ba6   :  { %v3795_v47 = vld [vmem:[%s6517_s6 + $0x83] ss:$0 sm:$0xff] }
0x1ba7   :  { %v3538_v53 = vpack.c.bf16 %v3534_v46, %v3534_v46  ;;  %v3539_v54 = vpack.c.bf16 %v3535_v29, %v3535_v29 }
0x1ba9   :  { %3743 = vmatmul.bf16.vlgmr.msrb.gmra.mxu2 %v3538_v53  ;;  %3756 = vmatmul.bf16.vlgmr.msrb.gmra.mxu3 %v3539_v54 }
0x1baa   :  { %v3493_v55 = vpop.f32.mrf.mxu2  ;;  %v3506_v57 = vpop.f32.mrf.mxu3 }
0x1c21   :  { %v3770_v59 = vpop.f32.mrf.mxu0  ;;  %v3783_v60 = vpop.f32.mrf.mxu1 }
0x1c29   :  { %v3772_v7 = vpop.f32.mrf.mxu0  ;;  %v3785_v56 = vpop.f32.mrf.mxu1 }
0x1c2c   :  { %v3744_v19 = vpop.f32.mrf.mxu2  ;;  %v3757_v35 = vpop.f32.mrf.mxu3 }
0x1c2d   :  { %v3745_v58 = vadd.f32 %v3744_v19, %v3542_v27 }
0x1c2f   :  { %v3758_v62 = vadd.f32 %v3757_v35, %v3745_v58 }
0x1c31   :  { %v3771_v63 = vadd.f32 %v3770_v59, %v3758_v62 }
0x1c33   :  { %v3784_v1 = vadd.f32 %v3783_v60, %v3771_v63 }
0x1c34   :  { %v3746_v2 = vpop.f32.mrf.mxu2  ;;  %v3759_v3 = vpop.f32.mrf.mxu3 }
0x1c35   :  { %v3787_v9 = vadd.f32 %v3784_v1, %v6275_v5  ;;  %v3836_v1 = vld [vmem:[%s6516_s5] sm:$0xff] }
0x1c36   :  { %3865 = vmatpush.msra.mxu2 %v3836_v1 }
0x1c37   :  { %v3789_v6 = vrot.slane %v3787_v9, 3  ;;  %v3791_v12 = vrot.slane %v3787_v9, 6 }
0x1c39   :  { %v3793_v13 = vsel %vm1988_vm5, %v3789_v6, %v3791_v12 }
0x1c3a   :  { %v3796_v61 = vsel %vm1992_vm15, %v3793_v13, 0.0 }
0x1c3b   :  { %3797 = vadd.xlane.f32.xlu1 %v3796_v61  ;;  %v1990_v61 = vld [vmem:[%s6517_s6 + $0x40] ss:$0 sm:$0xff] }
0x1c43   :  { %2000 = vadd.xlane.f32.xlu1 %v1999_v14 }
0x1cae   :  { %v3798_v17 = vpop.xlane.xlu1 %3797 }
0x1caf   :  { %v3799_v5 = vmul.f32 %v3798_v17, %v5330_v16  ;;  %v2003_v17 = vmul.f32 %v6430_v40, %v1990_v61 }
0x1cb1   :  { %v3800_v20 = vsub.f32 %v3793_v13, %v3799_v5 }
0x1cb3   :  { %v3801_v15 = vmul.f32 %v3800_v20, %v3800_v20  ;;  %v3806_v46 = vmul.f32 %v3800_v20, %v3794_v11  ;;  %v1991_v20 = vld [vmem:[%s6517_s6 + $0x41] ss:$0 sm:$0xff] }
0x1cb5   :  { %v3802_v21 = vsel %vm1992_vm15, %v3801_v15, 0.0 }
0x1cb6   :  { %3803 = vadd.xlane.f32.xlu0 %v3802_v21  ;;  %v2001_v55 = vpop.xlane.xlu1 %2000 }
0x1cb7   :  { %v2002_v57 = vmul.f32 %v2001_v55, %v5346_v33 }
0x1cb9   :  { %vm2011_vm8 = vcmp.eq.f32.partialorder %v2002_v57, inf  ;;  %v2014_v62 = vand.u32 2147483648, %v2002_v57  ;;  %vm2013_vm9 = vcmp.eq.f32.partialorder %v2002_v57, 0.0 }
0x1d29   :  { %v3804_v22 = vpop.xlane.xlu0 %3803 }
0x1d2a   :  { %v3805_v10 = vmul.f32 %v3804_v22, %v5346_v33 }
0x1d2c   :  { %5218 = vrsqrt.f32 %v3805_v10  ;;  %vm3814_vm5 = vcmp.eq.f32.partialorder %v3805_v10, inf  ;;  %v3817_v37 = vand.u32 2147483648, %v3805_v10  ;;  %vm3816_vm1 = vcmp.eq.f32.partialorder %v3805_v10, 0.0 }
0x1d32   :  { %v5219_v23 = vpop.eup %5218 }
0x1d33   :  { %v3808_v26 = vmul.f32 %v5219_v23, %v3805_v10 }
0x1d35   :  { %v3809_v28 = vmul.f32 %v5219_v23, %v3808_v26 }
0x1d37   :  { %v3810_v31 = vmul.f32 0.5, %v3809_v28 }
0x1d39   :  { %v3811_v34 = vsub.f32 1.5, %v3810_v31 }
0x1d3b   :  { %v3812_v8 = vmul.f32 %v5219_v23, %v3811_v34 }
0x1d3d   :  { %v3813_v36 = vmul.f32 %v3812_v8, %v3805_v10 }
0x1d3f   :  { %v3815_v38 = vsel %vm3814_vm5, %v3805_v10, %v3813_v36  ;;  %v3845_v10 = vld [vmem:[%s6517_s6 + $0x84] ss:$0 sm:$0xff] }
0x1d40   :  { %v3818_v39 = vsel %vm3816_vm1, %v3817_v37, %v3815_v38 }
0x1d41   :  { %v3819_v41 = vadd.f32 1e-06, %v3818_v39 }
0x1d43   :  { %5220 = vrcp.f32 %v3819_v41  ;;  %v3831_v48 = vand.u32 2147483648, %v3819_v41  ;;  %v3829_v42 = vand.u32 2147483647, %v3819_v41  ;;  %vm3825_vm6 = vweird.f32 %v3819_v41 }
0x1d44   :  { %5222 = vrsqrt.f32 %v2002_v57 }
0x1d45   :  { %v3832_v51 = vor.u32 1.1754944e-38, %v3831_v48  ;;  %vm3830_vm4 = vcmp.eq.f32.partialorder %v3829_v42, 8.507059e+37 }
0x1d49   :  { %v5221_v43 = vpop.eup %5220 }
0x1d4a   :  { %v3821_v44 = vmul.f32 %v5221_v43, %v3819_v41  ;;  %vm3826_vm2 = vweird.f32 %v5221_v43  ;;  %v5223_v59 = vpop.eup %5222 }
0x1d4b   :  { %vm3827_vm3 = vmor %vm3825_vm6, %vm3826_vm2  ;;  %v2005_v60 = vmul.f32 %v5223_v59, %v2002_v57 }
0x1d4c   :  { %v3822_v45 = vsub.f32 1.0, %v3821_v44 }
0x1d4d   :  { %v2006_v7 = vmul.f32 %v5223_v59, %v2005_v60 }
0x1d4e   :  { %v3823_v49 = vmul.f32 %v5221_v43, %v3822_v45  ;;  %v5097_v45 = vpack.i.bf16 %v3836_v1, %v6455_v24 }
0x1d4f   :  { %v2007_v56 = vmul.f32 0.5, %v2006_v7 }
0x1d50   :  { %v3824_v50 = vadd.f32 %v5221_v43, %v3823_v49 }
0x1d51   :  { %v2008_v27 = vsub.f32 1.5, %v2007_v56 }
0x1d52   :  { %v3828_v29 = vsel %vm3827_vm3, %v5221_v43, %v3824_v50 }
0x1d53   :  { %v3833_v52 = vsel %vm3830_vm4, %v3832_v51, %v3828_v29  ;;  %v2009_v19 = vmul.f32 %v5223_v59, %v2008_v27 }
0x1d54   :  { %v3834_v53 = vmul.f32 %v3833_v52, %v3806_v46 }
0x1d55   :  { %v2010_v35 = vmul.f32 %v2009_v19, %v2002_v57 }
0x1d56   :  { %v3835_v54 = vadd.f32 %v3834_v53, %v3795_v47 }
0x1d57   :  { %v2012_v58 = vsel %vm2011_vm8, %v2002_v57, %v2010_v35  ;;  %v3870_v35 = vld [vmem:[%s6517_s6 + $0x85] ss:$0 sm:$0xff] }
0x1d58   :  { %3841 = vrot.lane.b32.xlu2 %v3835_v54, %s5268_s30  ;;  %v2015_v63 = vsel %vm2013_vm9, %v2014_v62, %v2012_v58 }
0x1d59   :  { %v2016_v0 = vadd.f32 1e-06, %v2015_v63 }
0x1d5b   :  { %5224 = vrcp.f32 %v2016_v0  ;;  %v2028_v6 = vand.u32 2147483648, %v2016_v0  ;;  %vm2022_vm13 = vweird.f32 %v2016_v0  ;;  %v2026_v12 = vand.u32 2147483647, %v2016_v0 }
0x1d5d   :  { %v2029_v18 = vor.u32 1.1754944e-38, %v2028_v6  ;;  %vm2027_vm11 = vcmp.eq.f32.partialorder %v2026_v12, 8.507059e+37 }
0x1d61   :  { %v5225_v33 = vpop.eup %5224 }
0x1d62   :  { %v2018_v2 = vmul.f32 %v5225_v33, %v2016_v0  ;;  %vm2023_vm7 = vweird.f32 %v5225_v33 }
0x1d63   :  { %vm2024_vm10 = vmor %vm2022_vm13, %vm2023_vm7 }
0x1d64   :  { %v2019_v3 = vsub.f32 1.0, %v2018_v2  ;;  %v3871_v2 = vld [vmem:[%s6517_s6 + $0x86] ss:$0 sm:$0xff] }
0x1d66   :  { %v2020_v9 = vmul.f32 %v5225_v33, %v2019_v3 }
0x1d68   :  { %v2021_v25 = vadd.f32 %v5225_v33, %v2020_v9 }
0x1d6a   :  { %v2025_v13 = vsel %vm2024_vm10, %v5225_v33, %v2021_v25 }
0x1d6b   :  { %v2030_v14 = vsel %vm2027_vm11, %v2029_v18, %v2025_v13 }
0x1d6c   :  { %v2031_v5 = vmul.f32 %v2030_v14, %v2003_v17 }
0x1d6e   :  { %v2032_v15 = vadd.f32 %v2031_v5, %v1991_v20 }
0x1db2   :  { %v3842_v21 = vpop.permute.xlu2 %3841 }
0x1db3   :  { %v3844_v22 = vsel %vm112_vm0, %v2032_v15, %v3842_v21 }
0x1db4   :  { %4908 = vmatmul.msk.f32.vlgmr.msra.gmra.mxu2 %vm3846_vm12, %v3844_v22 }
0x1e37   :  { %v3867_v23 = vpop.f32.mrf.mxu2 }
0x1e38   :  { %v3868_v26 = vadd.f32 %v3867_v23, %v3845_v10 }
0x1e3a   :  { %3897 = vrot.lane.b32.xlu0 %v3868_v26, %s5263_s19  ;;  %v3872_v31 = vsel %vm1992_vm15, %v3868_v26, 0.0 }
0x1eac   :  { %v3898_v40 = vpop.permute.xlu0 %3897 }
0x1ead   :  { %v3900_v28 = vsel %vm1992_vm15, %v3898_v40, 0.0 }
0x1eae   :  { %3901 = vadd.xlane.f32.xlu1 %v3900_v28  ;;  %v3948_v28 = vld [vmem:[%s6517_s6 + $0x87] ss:$0 sm:$0xff] }
0x1eb6   :  { %3873 = vadd.xlane.f32.xlu1 %v3872_v31 }
0x1f21   :  { %v3902_v34 = vpop.xlane.xlu1 %3901 }
0x1f22   :  { %v3903_v8 = vmul.f32 %v3902_v34, %v5330_v16 }
0x1f24   :  { %v3904_v36 = vsub.f32 %v3868_v26, %v3903_v8 }
0x1f26   :  { %v3905_v37 = vmul.f32 %v3904_v36, %v3904_v36 }
0x1f28   :  { %3907 = vrot.lane.b32.xlu1 %v3905_v37, %s5263_s19 }
0x1f29   :  { %v3874_v38 = vpop.xlane.xlu1 %3873 }
0x1f2a   :  { %v3875_v39 = vmul.f32 %v3874_v38, %v5330_v16 }
0x1f2c   :  { %v3876_v41 = vsub.f32 %v3868_v26, %v3875_v39 }
0x1f2e   :  { %v3877_v43 = vmul.f32 %v3876_v41, %v3876_v41 }
0x1f30   :  { %v3878_v44 = vsel %vm1992_vm15, %v3877_v43, 0.0  ;;  %5093 = vrot.lane.b32.xlu1 %v5092_v4, %s5265_s21 }
0x1f31   :  { %3879 = vadd.xlane.f32.xlu2 %v3878_v44 }
0x1f38   :  { %5098 = vrot.lane.b32.xlu1 %v5097_v45, %s5265_s21 }
0x1f9a   :  { %v3908_v48 = vpop.permute.xlu1 %3907 }
0x1f9b   :  { %v3910_v49 = vsel %vm1992_vm15, %v3908_v48, 0.0 }
0x1f9c   :  { %3911 = vadd.xlane.f32.xlu0 %v3910_v49 }
0x1fa2   :  { %v5094_v53 = vpop.permute.xlu1 %5093 }
0x1fa3   :  { %v5096_v57 = vunpack.i.h.bf16 %v5094_v53  ;;  %v5095_v59 = vunpack.i.l.bf16 %v5094_v53 }
0x1fa4   :  { %v3880_v42 = vpop.xlane.xlu2 %3879 }
0x1fa5   :  { %v3881_v11 = vmul.f32 %v3880_v42, %v5330_v16  ;;  %3980 = vmatpush.msra.mxu3 %v5095_v59 }
0x1fa7   :  { %v3882_v50 = vadd.f32 1e-05, %v3881_v11  ;;  %3981 = vmatpush.msra.mxu3 %v5096_v57 }
0x1fa9   :  { %5226 = vrsqrt.f32 %v3882_v50  ;;  %vm3889_vm15 = vweird.f32 %v3882_v50 }
0x1faa   :  { %v5099_v19 = vpop.permute.xlu1 %5098 }
0x1fab   :  { %v5101_v62 = vunpack.i.h.bf16 %v5099_v19  ;;  %v5100_v63 = vunpack.i.l.bf16 %v5099_v19 }
0x1fad   :  { %3982 = vmatpush.msra.mxu3 %v5100_v63 }
0x1faf   :  { %v5227_v51 = vpop.eup %5226  ;;  %3983 = vmatpush.msra.mxu3 %v5101_v62 }
0x1fb0   :  { %v3884_v46 = vmul.f32 %v5227_v51, %v3882_v50  ;;  %vm3890_vm14 = vweird.f32 %v5227_v51 }
0x1fb1   :  { %vm3891_vm5 = vmor %vm3889_vm15, %vm3890_vm14 }
0x1fb2   :  { %v3885_v29 = vmul.f32 %v5227_v51, %v3884_v46 }
0x1fb4   :  { %v3886_v4 = vmul.f32 0.5, %v3885_v29 }
0x1fb6   :  { %v3887_v24 = vsub.f32 1.5, %v3886_v4 }
0x1fb8   :  { %v3888_v54 = vmul.f32 %v5227_v51, %v3887_v24 }
0x1fba   :  { %v3892_v7 = vsel %vm3891_vm5, %v5227_v51, %v3888_v54 }
0x200f   :  { %v3912_v47 = vpop.xlane.xlu0 %3911 }
0x2010   :  { %v3913_v32 = vmul.f32 %v3912_v47, %v5330_v16  ;;  %v3893_v16 = vmul.f32 %v3892_v7, %v3876_v41 }
0x2012   :  { %v3914_v30 = vadd.f32 1e-05, %v3913_v32  ;;  %v3894_v1 = vmul.f32 %v3893_v16, %v3870_v35 }
0x2014   :  { %5228 = vrsqrt.f32 %v3914_v30  ;;  %vm3921_vm2 = vweird.f32 %v3914_v30  ;;  %v3895_v9 = vadd.f32 %v3894_v1, %v3871_v2 }
0x201a   :  { %v5229_v52 = vpop.eup %5228 }
0x201b   :  { %v3916_v55 = vmul.f32 %v5229_v52, %v3914_v30  ;;  %vm3922_vm1 = vweird.f32 %v5229_v52 }
0x201c   :  { %vm3923_vm6 = vmor %vm3921_vm2, %vm3922_vm1 }
0x201d   :  { %v3917_v60 = vmul.f32 %v5229_v52, %v3916_v55 }
0x201f   :  { %v3918_v56 = vmul.f32 0.5, %v3917_v60 }
0x2021   :  { %v3919_v27 = vsub.f32 1.5, %v3918_v56 }
0x2023   :  { %v3920_v58 = vmul.f32 %v5229_v52, %v3919_v27 }
0x2025   :  { %v3924_v0 = vsel %vm3923_vm6, %v5229_v52, %v3920_v58 }
0x2026   :  { %v3925_v33 = vmul.f32 %v3924_v0, %v3904_v36 }
0x2028   :  { %v3926_v3 = vmul.f32 %v3925_v33, %v3870_v35 }
0x202a   :  { %v3927_v25 = vadd.f32 %v3926_v3, %v3871_v2 }
0x202c   :  { %v3928_v6 = vsel %vm112_vm0, %v3895_v9, %v3927_v25  ;;  %vm3988_vm0 = vcmask 254976  }
0x202d   :  { %v3929_v12 = vsub.f32 0.0, %v3928_v6 }
0x202f   :  { %v3930_v13 = vmul.f32 1.442695, %v3929_v12 }
0x2031   :  { %5230 = vpow2.f32 %v3930_v13 }
0x2037   :  { %v5231_v61 = vpop.eup %5230 }
0x2038   :  { %v3932_v18 = vadd.f32 1.0, %v5231_v61 }
0x203a   :  { %5232 = vrcp.f32 %v3932_v18  ;;  %v3944_v20 = vand.u32 2147483648, %v3932_v18  ;;  %v3942_v21 = vand.u32 2147483647, %v3932_v18  ;;  %vm3938_vm4 = vweird.f32 %v3932_v18 }
0x203c   :  { %v3945_v10 = vor.u32 1.1754944e-38, %v3944_v20  ;;  %vm3943_vm9 = vcmp.eq.f32.partialorder %v3942_v21, 8.507059e+37 }
0x2040   :  { %v5233_v14 = vpop.eup %5232 }
0x2041   :  { %v3934_v17 = vmul.f32 %v5233_v14, %v3932_v18  ;;  %vm3939_vm3 = vweird.f32 %v5233_v14 }
0x2042   :  { %vm3940_vm8 = vmor %vm3938_vm4, %vm3939_vm3 }
0x2043   :  { %v3935_v5 = vsub.f32 1.0, %v3934_v17 }
0x2045   :  { %v3936_v15 = vmul.f32 %v5233_v14, %v3935_v5 }
0x2047   :  { %v3937_v22 = vadd.f32 %v5233_v14, %v3936_v15 }
0x2049   :  { %v3941_v23 = vsel %vm3940_vm8, %v5233_v14, %v3937_v22 }
0x204a   :  { %v3946_v26 = vsel %vm3943_vm9, %v3945_v10, %v3941_v23 }
0x204b   :  { %v3947_v40 = vmul.f32 %v3946_v26, %v3928_v6 }
0x204d   :  { %4909 = vmatmul.msk.f32.vlgmr.msra.gmra.mxu3 %vm3846_vm12, %v3947_v40 }
0x20d0   :  { %v3985_v31 = vpop.f32.mrf.mxu3 }
0x20d1   :  { %v3986_v34 = vadd.f32 %v3985_v31, %v3948_v28 }
0x20d3   :  { %3989 = vst.msk [vmem:[#allocation2] sm:$0x3] %vm3988_vm0, %v3986_v34 }
0x20d4   :  { %4000 = dma.vmem_to_hbm [thread:$0]  %s3996_s24, 32, %s3998_s26, [#allocation3]  }
0x20d5   :  { %5258 = dma.done.wait [#allocation3], 32  }
0x20d6   :  { %5259 = vsyncadd [#allocation3], 4294967264 }
0x20d7   :  { %4005 = vsyncpa [#allocation3], 1 }

</bundles_post_ra>
